<compile_context>
chip_gen: v7x
topology: tpu7x:2x2x1
jax: 0.10.0
libtpu: 0.0.40
codegen_flags: <defaults>
</compile_context>

<pallas_src>
import jax
import jax.numpy as jnp
from jax.experimental import pallas as pl
from jax.experimental.pallas import tpu as pltpu

KERNEL = 4
STRIDE = 2
BN_EPS = 1e-5
LRELU_SLOPE = 0.2
LANE = 128
TILE_M_TARGET = 512


def _round_up(x, m):
    return ((x + m - 1) // m) * m


def _vmem_budget(tile_m, k, cpad):
    """Double-buffered P tile (bf16) + y tile (f32) + resident W/bias/vectors, with headroom."""
    p_bytes = tile_m * k * 2
    y_bytes = tile_m * cpad * 4
    w_bytes = k * cpad * 2
    misc = 16 * cpad * 4
    total = 2 * (p_bytes + y_bytes) + w_bytes + misc
    return int(min(max(2 * total, 16 << 20), 32 << 20))


# ----------------------------- Pallas kernels ------------------------------ #

def _gemm_stats_kernel(p_ref, w_ref, b_ref, y_ref, sums_ref):
    """Pass 1: y = P @ W + b; emit per-tile partial sum(y), sum(y^2)."""
    y = jnp.dot(p_ref[...], w_ref[...], preferred_element_type=jnp.float32)
    y = y + b_ref[...]                                   # (tile_m, Cpad) + (1, Cpad)
    y_ref[...] = y
    s1 = jnp.sum(y, axis=0, keepdims=True)               # (1, Cpad)
    s2 = jnp.sum(y * y, axis=0, keepdims=True)           # (1, Cpad)
    sums_ref[...] = jnp.concatenate([s1, s2], axis=0)[None]   # (1, 2, Cpad)


def _affine_lrelu_kernel(y_ref, scale_ref, shift_ref, o_ref):
    """Pass 2: folded BatchNorm (scale/shift) + LeakyReLU(0.2)."""
    z = y_ref[...] * scale_ref[...] + shift_ref[...]
    o_ref[...] = jnp.where(z >= 0.0, z, LRELU_SLOPE * z)


def _gemm_bias_kernel(p_ref, w_ref, b_ref, o_ref):
    """Last block: plain conv -> y = P @ W + b."""
    y = jnp.dot(p_ref[...], w_ref[...], preferred_element_type=jnp.float32)
    o_ref[...] = y + b_ref[...]


# ------------------------------- JAX glue ---------------------------------- #

def im2col(x):
    """x: (N, H, W, C) -> patches (N*Ho*Wo, C*KH*KW), column order (ci, kh, kw)."""
    N, H, W, C = x.shape
    Ho = (H - KERNEL) // STRIDE + 1
    Wo = (W - KERNEL) // STRIDE + 1
    cols = []
    for kh in range(KERNEL):
        for kw in range(KERNEL):
            cols.append(
                x[:, kh:kh + STRIDE * (Ho - 1) + 1:STRIDE,
                     kw:kw + STRIDE * (Wo - 1) + 1:STRIDE, :]
            )  # (N, Ho, Wo, C)
    p = jnp.stack(cols, axis=-1)                     # (N, Ho, Wo, C, KH*KW)
    p = p.reshape(N * Ho * Wo, C * KERNEL * KERNEL)
    return p, (N, Ho, Wo)


def _prepare_gemm(x, w, b):
    """im2col + padding to lane-dense / tile-aligned GEMM operands (bf16 P/W, f32 bias)."""
    p, (N, Ho, Wo) = im2col(x)
    M, K = p.shape
    Cout = w.shape[0]
    Cpad = _round_up(Cout, LANE)

    tile_m = min(TILE_M_TARGET, _round_up(M, 8))
    M_pad = _round_up(M, tile_m)
    n_tiles = M_pad // tile_m

    p_pad = jnp.pad(p, ((0, M_pad - M), (0, 0))).astype(jnp.bfloat16)
    # (Cout, Cin, KH, KW) -> (Cin*KH*KW, Cout); row order (ci, kh, kw) matches im2col cols.
    wmat = jnp.transpose(w, (1, 2, 3, 0)).reshape(K, Cout)
    w_pad = jnp.pad(wmat, ((0, 0), (0, Cpad - Cout))).astype(jnp.bfloat16)
    b_pad = jnp.pad(b, (0, Cpad - Cout)).reshape(1, Cpad).astype(jnp.float32)

    dims = dict(N=N, Ho=Ho, Wo=Wo, M=M, K=K, Cout=Cout, Cpad=Cpad,
                tile_m=tile_m, M_pad=M_pad, n_tiles=n_tiles)
    return p_pad, w_pad, b_pad, dims


def conv_bn_lrelu_block(x, w, b, gamma, beta):
    """Conv2d(4,2) + BatchNorm2d(batch stats) + LeakyReLU(0.2).  x NHWC -> NHWC."""
    p_pad, w_pad, b_pad, d = _prepare_gemm(x, w, b)
    tile_m, K, Cpad = d["tile_m"], d["K"], d["Cpad"]
    n_tiles = d["n_tiles"]
    vmem = _vmem_budget(tile_m, K, Cpad)

    # ---- pass 1: tiled GEMM + bias, per-tile partial batch-stat sums ----
    y, partials = pl.pallas_call(
        _gemm_stats_kernel,
        grid=(n_tiles,),
        in_specs=[
            pl.BlockSpec((tile_m, K), lambda i: (i, 0)),
            pl.BlockSpec((K, Cpad), lambda i: (0, 0)),
            pl.BlockSpec((1, Cpad), lambda i: (0, 0)),
        ],
        out_specs=[
            pl.BlockSpec((tile_m, Cpad), lambda i: (i, 0)),
            pl.BlockSpec((1, 2, Cpad), lambda i: (i, 0, 0)),   # per-tile partials
        ],
        out_shape=(
            jax.ShapeDtypeStruct((d["M_pad"], Cpad), jnp.float32),
            jax.ShapeDtypeStruct((n_tiles, 2, Cpad), jnp.float32),
        ),
        compiler_params=pltpu.CompilerParams(
            dimension_semantics=("parallel",),       # no resident accumulator -> megacore OK
            vmem_limit_bytes=vmem,
        ),
    )(p_pad, w_pad, b_pad)

    # ---- fold BN into per-channel scale/shift (O(Cpad) host-side math) ----
    # Zero-padded rows contribute exactly (b, b^2) each; subtract them out.
    m_real = float(d["M"])
    n_pad = float(d["M_pad"] - d["M"])
    b_vec = b_pad[0]                                        # (Cpad,) f32
    sum_y = jnp.sum(partials[:, 0, :], axis=0) - n_pad * b_vec
    sumsq_y = jnp.sum(partials[:, 1, :], axis=0) - n_pad * (b_vec * b_vec)
    mean = sum_y / m_real
    var = jnp.maximum(sumsq_y / m_real - mean * mean, 0.0)   # biased var, like BN train()
    gamma_pad = jnp.pad(gamma.astype(jnp.float32), (0, Cpad - d["Cout"]))
    beta_pad = jnp.pad(beta.astype(jnp.float32), (0, Cpad - d["Cout"]))
    scale_v = gamma_pad * jax.lax.rsqrt(var + BN_EPS)
    shift_v = beta_pad - mean * scale_v
    scale = scale_v.reshape(1, Cpad).astype(jnp.float32)
    shift = shift_v.reshape(1, Cpad).astype(jnp.float32)

    # ---- pass 2: fused scale/shift + LeakyReLU, parallel over M tiles, in-place on y ----
    out = pl.pallas_call(
        _affine_lrelu_kernel,
        grid=(n_tiles,),
        in_specs=[
            pl.BlockSpec((tile_m, Cpad), lambda i: (i, 0)),
            pl.BlockSpec((1, Cpad), lambda i: (0, 0)),
            pl.BlockSpec((1, Cpad), lambda i: (0, 0)),
        ],
        out_specs=pl.BlockSpec((tile_m, Cpad), lambda i: (i, 0)),
        out_shape=jax.ShapeDtypeStruct((d["M_pad"], Cpad), jnp.float32),
        input_output_aliases={0: 0},                 # reuse y's HBM buffer for the output
        compiler_params=pltpu.CompilerParams(
            dimension_semantics=("parallel",),
            vmem_limit_bytes=vmem,
        ),
    )(y, scale, shift)

    out = out[:d["M"], :d["Cout"]].reshape(d["N"], d["Ho"], d["Wo"], d["Cout"])
    return out


def conv_block(x, w, b):
    """Last block: Conv2d(4,2) only.  x NHWC -> NHWC."""
    p_pad, w_pad, b_pad, d = _prepare_gemm(x, w, b)
    tile_m, K, Cpad = d["tile_m"], d["K"], d["Cpad"]

    y = pl.pallas_call(
        _gemm_bias_kernel,
        grid=(d["n_tiles"],),
        in_specs=[
            pl.BlockSpec((tile_m, K), lambda i: (i, 0)),
            pl.BlockSpec((K, Cpad), lambda i: (0, 0)),
            pl.BlockSpec((1, Cpad), lambda i: (0, 0)),
        ],
        out_specs=pl.BlockSpec((tile_m, Cpad), lambda i: (i, 0)),
        out_shape=jax.ShapeDtypeStruct((d["M_pad"], Cpad), jnp.float32),
        compiler_params=pltpu.CompilerParams(
            dimension_semantics=("parallel",),
            vmem_limit_bytes=_vmem_budget(tile_m, K, Cpad),
        ),
    )(p_pad, w_pad, b_pad)

    return y[:d["M"], :d["Cout"]].reshape(d["N"], d["Ho"], d["Wo"], d["Cout"])


def discriminador_condicional_forward(image_nchw, params):
    """Equivalent of DiscriminadorCondicional.forward: 4 blocks then flatten (NCHW order)."""
    x = jnp.transpose(image_nchw, (0, 2, 3, 1))       # NCHW -> NHWC
    n_layers = len(params)
    for i, layer in enumerate(params):
        if i == n_layers - 1:
            x = conv_block(x, layer["w"], layer["b"])
        else:
            x = conv_bn_lrelu_block(x, layer["w"], layer["b"],
                                    layer["gamma"], layer["beta"])
    pred = jnp.transpose(x, (0, 3, 1, 2))             # back to NCHW
    return pred.reshape(pred.shape[0], -1)            # pred.view(len(pred), -1)


def init_params(key, in_chan=1, hidden=8):
    """Deterministic PyTorch-like init (uniform(-1/sqrt(fan_in), +), BN gamma=1, beta=0)."""
    chans = [(in_chan, hidden),
             (hidden, hidden * 2),
             (hidden * 2, hidden * 4),
             (hidden * 4, in_chan)]
    params = []
    for idx, (ci, co) in enumerate(chans):
        key, kw, kb = jax.random.split(key, 3)
        fan_in = ci * KERNEL * KERNEL
        bound = float(fan_in) ** -0.5
        w = jax.random.uniform(kw, (co, ci, KERNEL, KERNEL), jnp.float32, -bound, bound)
        b = jax.random.uniform(kb, (co,), jnp.float32, -bound, bound)
        layer = {"w": w, "b": b}
        if idx < len(chans) - 1:
            layer["gamma"] = jnp.ones((co,), jnp.float32)
            layer["beta"] = jnp.zeros((co,), jnp.float32)
        params.append(layer)
    return params


if __name__ == "__main__":
    key = jax.random.PRNGKey(0)
    kp, kx = jax.random.split(key)
    # small config: inChan=1, hiddenDim=8, batch=2, 48x48 input (-> 23 -> 10 -> 4 -> 1 spatial)
    params = init_params(kp, in_chan=1, hidden=8)
    x = jax.random.normal(kx, (2, 1, 48, 48), jnp.float32)

    fwd = jax.jit(discriminador_condicional_forward)
    out = fwd(x, params)
    out = jax.block_until_ready(out)
    assert out.shape == (2, 1), out.shape
    assert bool(jnp.all(jnp.isfinite(out)))
    print("KERNEL_OK")
</pallas_src>

<mosaic_0001>
module attributes {stable_mosaic.version = 11 : i64} {
  func.func @_gemm_stats_kernel(%arg0: i32, %arg1: memref<512x16xbf16, #tpu.memory_space<vmem>>, %arg2: memref<16x128xbf16, #tpu.memory_space<vmem>>, %arg3: memref<1x128xf32, #tpu.memory_space<vmem>>, %arg4: memref<512x128xf32, #tpu.memory_space<vmem>>, %arg5: memref<1x2x128xf32, #tpu.memory_space<vmem>>) attributes {dimension_semantics = [#tpu.dimension_semantics<parallel>], iteration_bounds = array<i64: 3>, scalar_prefetch = 0 : i64, scratch_operands = 0 : i64, tpu.core_type = #tpu.core_type<tc>, window_params = [{transform_indices = @transform_0, window_bounds = array<i64: 512, 16>}, {pipeline_mode = #tpu.pipeline_mode<synchronous>, transform_indices = @transform_1, window_bounds = array<i64: 16, 128>}, {pipeline_mode = #tpu.pipeline_mode<synchronous>, transform_indices = @transform_2, window_bounds = array<i64: 1, 128>}, {transform_indices = @transform_3, window_bounds = array<i64: 512, 128>}, {transform_indices = @transform_4, window_bounds = array<i64: 1, 2, 128>}]} {
    %c0 = arith.constant 0 : index
    %c0_0 = arith.constant 0 : index
    %0 = vector.load %arg1[%c0, %c0_0] : memref<512x16xbf16, #tpu.memory_space<vmem>>, vector<512x16xbf16>
    %c0_1 = arith.constant 0 : index
    %c0_2 = arith.constant 0 : index
    %1 = vector.load %arg2[%c0_1, %c0_2] : memref<16x128xbf16, #tpu.memory_space<vmem>>, vector<16x128xbf16>
    %cst = arith.constant dense<0.000000e+00> : vector<512x128xf32>
    %2 = tpu.matmul %0, %1, %cst {dimension_numbers = #tpu.dot_dimension_numbers<[1], [0], [0], [1], [0, 0, 1, 1], [], []>} : vector<512x16xbf16>, vector<16x128xbf16>, vector<512x128xf32> -> vector<512x128xf32>
    %c0_3 = arith.constant 0 : index
    %c0_4 = arith.constant 0 : index
    %3 = vector.load %arg3[%c0_3, %c0_4] : memref<1x128xf32, #tpu.memory_space<vmem>>, vector<1x128xf32>
    %4 = vector.broadcast %3 : vector<1x128xf32> to vector<512x128xf32>
    %5 = arith.addf %2, %4 : vector<512x128xf32>
    %c0_5 = arith.constant 0 : index
    %c0_6 = arith.constant 0 : index
    %6 = vector.load %arg4[%c0_5, %c0_6] : memref<512x128xf32, #tpu.memory_space<vmem>>, vector<512x128xf32>
    tpu.vector_store %arg4[%c0_5, %c0_6], %5 {strides = array<i32>} : memref<512x128xf32, #tpu.memory_space<vmem>>, vector<512x128xf32>,
    %cst_7 = arith.constant dense<0.000000e+00> : vector<128xf32>
    %7 = vector.multi_reduction <add>, %5, %cst_7 [0] : vector<512x128xf32> to vector<128xf32>
    %8 = vector.shape_cast %7 : vector<128xf32> to vector<1x128xf32>
    %9 = arith.mulf %5, %5 : vector<512x128xf32>
    %cst_8 = arith.constant dense<0.000000e+00> : vector<128xf32>
    %10 = vector.multi_reduction <add>, %9, %cst_8 [0] : vector<512x128xf32> to vector<128xf32>
    %11 = vector.shape_cast %10 : vector<128xf32> to vector<1x128xf32>
    %12 = tpu.concatenate %8, %11 in 0 : vector<1x128xf32>, vector<1x128xf32> -> vector<2x128xf32>
    %13 = vector.shape_cast %12 : vector<2x128xf32> to vector<1x2x128xf32>
    %c0_9 = arith.constant 0 : index
    %c0_10 = arith.constant 0 : index
    %c0_11 = arith.constant 0 : index
    %14 = vector.load %arg5[%c0_9, %c0_10, %c0_11] : memref<1x2x128xf32, #tpu.memory_space<vmem>>, vector<1x2x128xf32>
    tpu.vector_store %arg5[%c0_9, %c0_10, %c0_11], %13 {strides = array<i32>} : memref<1x2x128xf32, #tpu.memory_space<vmem>>, vector<1x2x128xf32>,
    return
  }
  func.func @transform_0(%arg0: i32) -> (i32, i32) {
    %c0_i32 = arith.constant 0 : i32
    %c0_i32_0 = arith.constant 0 : i32
    return %arg0, %c0_i32 : i32, i32
  }
  func.func @transform_1(%arg0: i32) -> (i32, i32) {
    %c0_i32 = arith.constant 0 : i32
    %c0_i32_0 = arith.constant 0 : i32
    %c0_i32_1 = arith.constant 0 : i32
    return %c0_i32, %c0_i32_0 : i32, i32
  }
  func.func @transform_2(%arg0: i32) -> (i32, i32) {
    %c0_i32 = arith.constant 0 : i32
    %c0_i32_0 = arith.constant 0 : i32
    %c0_i32_1 = arith.constant 0 : i32
    return %c0_i32, %c0_i32_0 : i32, i32
  }
  func.func @transform_3(%arg0: i32) -> (i32, i32) {
    %c0_i32 = arith.constant 0 : i32
    %c0_i32_0 = arith.constant 0 : i32
    return %arg0, %c0_i32 : i32, i32
  }
  func.func @transform_4(%arg0: i32) -> (i32, i32, i32) {
    %c0_i32 = arith.constant 0 : i32
    %c0_i32_0 = arith.constant 0 : i32
    %c0_i32_1 = arith.constant 0 : i32
    return %arg0, %c0_i32, %c0_i32_0 : i32, i32, i32
  }
}

module attributes {stable_mosaic.version = 11 : i64} {
  func.func @_affine_lrelu_kernel(%arg0: i32, %arg1: memref<512x128xf32, #tpu.memory_space<vmem>>, %arg2: memref<1x128xf32, #tpu.memory_space<vmem>>, %arg3: memref<1x128xf32, #tpu.memory_space<vmem>>, %arg4: memref<512x128xf32, #tpu.memory_space<vmem>>) attributes {dimension_semantics = [#tpu.dimension_semantics<parallel>], iteration_bounds = array<i64: 3>, scalar_prefetch = 0 : i64, scratch_operands = 0 : i64, tpu.core_type = #tpu.core_type<tc>, window_params = [{transform_indices = @transform_0, window_bounds = array<i64: 512, 128>}, {pipeline_mode = #tpu.pipeline_mode<synchronous>, transform_indices = @transform_1, window_bounds = array<i64: 1, 128>}, {pipeline_mode = #tpu.pipeline_mode<synchronous>, transform_indices = @transform_2, window_bounds = array<i64: 1, 128>}, {transform_indices = @transform_3, window_bounds = array<i64: 512, 128>}]} {
    %c0 = arith.constant 0 : index
    %c0_0 = arith.constant 0 : index
    %0 = vector.load %arg1[%c0, %c0_0] : memref<512x128xf32, #tpu.memory_space<vmem>>, vector<512x128xf32>
    %c0_1 = arith.constant 0 : index
    %c0_2 = arith.constant 0 : index
    %1 = vector.load %arg2[%c0_1, %c0_2] : memref<1x128xf32, #tpu.memory_space<vmem>>, vector<1x128xf32>
    %2 = vector.broadcast %1 : vector<1x128xf32> to vector<512x128xf32>
    %3 = arith.mulf %0, %2 : vector<512x128xf32>
    %c0_3 = arith.constant 0 : index
    %c0_4 = arith.constant 0 : index
    %4 = vector.load %arg3[%c0_3, %c0_4] : memref<1x128xf32, #tpu.memory_space<vmem>>, vector<1x128xf32>
    %5 = vector.broadcast %4 : vector<1x128xf32> to vector<512x128xf32>
    %6 = arith.addf %3, %5 : vector<512x128xf32>
    %cst = arith.constant 0.000000e+00 : f32
    %7 = vector.broadcast %cst : f32 to vector<512x128xf32>
    %8 = arith.cmpf oge, %6, %7 : vector<512x128xf32>
    %cst_5 = arith.constant 2.000000e-01 : f32
    %9 = vector.broadcast %cst_5 : f32 to vector<512x128xf32>
    %10 = arith.mulf %9, %6 : vector<512x128xf32>
    %11 = arith.select %8, %6, %10 : vector<512x128xi1>, vector<512x128xf32>
    %c0_6 = arith.constant 0 : index
    %c0_7 = arith.constant 0 : index
    %12 = vector.load %arg4[%c0_6, %c0_7] : memref<512x128xf32, #tpu.memory_space<vmem>>, vector<512x128xf32>
    tpu.vector_store %arg4[%c0_6, %c0_7], %11 {strides = array<i32>} : memref<512x128xf32, #tpu.memory_space<vmem>>, vector<512x128xf32>,
    return
  }
  func.func @transform_0(%arg0: i32) -> (i32, i32) {
    %c0_i32 = arith.constant 0 : i32
    %c0_i32_0 = arith.constant 0 : i32
    return %arg0, %c0_i32 : i32, i32
  }
  func.func @transform_1(%arg0: i32) -> (i32, i32) {
    %c0_i32 = arith.constant 0 : i32
    %c0_i32_0 = arith.constant 0 : i32
    %c0_i32_1 = arith.constant 0 : i32
    return %c0_i32, %c0_i32_0 : i32, i32
  }
  func.func @transform_2(%arg0: i32) -> (i32, i32) {
    %c0_i32 = arith.constant 0 : i32
    %c0_i32_0 = arith.constant 0 : i32
    %c0_i32_1 = arith.constant 0 : i32
    return %c0_i32, %c0_i32_0 : i32, i32
  }
  func.func @transform_3(%arg0: i32) -> (i32, i32) {
    %c0_i32 = arith.constant 0 : i32
    %c0_i32_0 = arith.constant 0 : i32
    return %arg0, %c0_i32 : i32, i32
  }
}

module attributes {stable_mosaic.version = 11 : i64} {
  func.func @_gemm_stats_kernel(%arg0: i32, %arg1: memref<200x128xbf16, #tpu.memory_space<vmem>>, %arg2: memref<128x128xbf16, #tpu.memory_space<vmem>>, %arg3: memref<1x128xf32, #tpu.memory_space<vmem>>, %arg4: memref<200x128xf32, #tpu.memory_space<vmem>>, %arg5: memref<1x2x128xf32, #tpu.memory_space<vmem>>) attributes {dimension_semantics = [#tpu.dimension_semantics<parallel>], iteration_bounds = array<i64: 1>, scalar_prefetch = 0 : i64, scratch_operands = 0 : i64, tpu.core_type = #tpu.core_type<tc>, window_params = [{transform_indices = @transform_0, window_bounds = array<i64: 200, 128>}, {pipeline_mode = #tpu.pipeline_mode<synchronous>, transform_indices = @transform_1, window_bounds = array<i64: 128, 128>}, {pipeline_mode = #tpu.pipeline_mode<synchronous>, transform_indices = @transform_2, window_bounds = array<i64: 1, 128>}, {transform_indices = @transform_3, window_bounds = array<i64: 200, 128>}, {transform_indices = @transform_4, window_bounds = array<i64: 1, 2, 128>}]} {
    %c0 = arith.constant 0 : index
    %c0_0 = arith.constant 0 : index
    %0 = vector.load %arg1[%c0, %c0_0] : memref<200x128xbf16, #tpu.memory_space<vmem>>, vector<200x128xbf16>
    %c0_1 = arith.constant 0 : index
    %c0_2 = arith.constant 0 : index
    %1 = vector.load %arg2[%c0_1, %c0_2] : memref<128x128xbf16, #tpu.memory_space<vmem>>, vector<128x128xbf16>
    %cst = arith.constant dense<0.000000e+00> : vector<200x128xf32>
    %2 = tpu.matmul %0, %1, %cst {dimension_numbers = #tpu.dot_dimension_numbers<[1], [0], [0], [1], [0, 0, 1, 1], [], []>} : vector<200x128xbf16>, vector<128x128xbf16>, vector<200x128xf32> -> vector<200x128xf32>
    %c0_3 = arith.constant 0 : index
    %c0_4 = arith.constant 0 : index
    %3 = vector.load %arg3[%c0_3, %c0_4] : memref<1x128xf32, #tpu.memory_space<vmem>>, vector<1x128xf32>
    %4 = vector.broadcast %3 : vector<1x128xf32> to vector<200x128xf32>
    %5 = arith.addf %2, %4 : vector<200x128xf32>
    %c0_5 = arith.constant 0 : index
    %c0_6 = arith.constant 0 : index
    %6 = vector.load %arg4[%c0_5, %c0_6] : memref<200x128xf32, #tpu.memory_space<vmem>>, vector<200x128xf32>
    tpu.vector_store %arg4[%c0_5, %c0_6], %5 {strides = array<i32>} : memref<200x128xf32, #tpu.memory_space<vmem>>, vector<200x128xf32>,
    %cst_7 = arith.constant dense<0.000000e+00> : vector<128xf32>
    %7 = vector.multi_reduction <add>, %5, %cst_7 [0] : vector<200x128xf32> to vector<128xf32>
    %8 = vector.shape_cast %7 : vector<128xf32> to vector<1x128xf32>
    %9 = arith.mulf %5, %5 : vector<200x128xf32>
    %cst_8 = arith.constant dense<0.000000e+00> : vector<128xf32>
    %10 = vector.multi_reduction <add>, %9, %cst_8 [0] : vector<200x128xf32> to vector<128xf32>
    %11 = vector.shape_cast %10 : vector<128xf32> to vector<1x128xf32>
    %12 = tpu.concatenate %8, %11 in 0 : vector<1x128xf32>, vector<1x128xf32> -> vector<2x128xf32>
    %13 = vector.shape_cast %12 : vector<2x128xf32> to vector<1x2x128xf32>
    %c0_9 = arith.constant 0 : index
    %c0_10 = arith.constant 0 : index
    %c0_11 = arith.constant 0 : index
    %14 = vector.load %arg5[%c0_9, %c0_10, %c0_11] : memref<1x2x128xf32, #tpu.memory_space<vmem>>, vector<1x2x128xf32>
    tpu.vector_store %arg5[%c0_9, %c0_10, %c0_11], %13 {strides = array<i32>} : memref<1x2x128xf32, #tpu.memory_space<vmem>>, vector<1x2x128xf32>,
    return
  }
  func.func @transform_0(%arg0: i32) -> (i32, i32) {
    %c0_i32 = arith.constant 0 : i32
    %c0_i32_0 = arith.constant 0 : i32
    return %arg0, %c0_i32 : i32, i32
  }
  func.func @transform_1(%arg0: i32) -> (i32, i32) {
    %c0_i32 = arith.constant 0 : i32
    %c0_i32_0 = arith.constant 0 : i32
    %c0_i32_1 = arith.constant 0 : i32
    return %c0_i32, %c0_i32_0 : i32, i32
  }
  func.func @transform_2(%arg0: i32) -> (i32, i32) {
    %c0_i32 = arith.constant 0 : i32
    %c0_i32_0 = arith.constant 0 : i32
    %c0_i32_1 = arith.constant 0 : i32
    return %c0_i32, %c0_i32_0 : i32, i32
  }
  func.func @transform_3(%arg0: i32) -> (i32, i32) {
    %c0_i32 = arith.constant 0 : i32
    %c0_i32_0 = arith.constant 0 : i32
    return %arg0, %c0_i32 : i32, i32
  }
  func.func @transform_4(%arg0: i32) -> (i32, i32, i32) {
    %c0_i32 = arith.constant 0 : i32
    %c0_i32_0 = arith.constant 0 : i32
    %c0_i32_1 = arith.constant 0 : i32
    return %arg0, %c0_i32, %c0_i32_0 : i32, i32, i32
  }
}

module attributes {stable_mosaic.version = 11 : i64} {
  func.func @_affine_lrelu_kernel(%arg0: i32, %arg1: memref<200x128xf32, #tpu.memory_space<vmem>>, %arg2: memref<1x128xf32, #tpu.memory_space<vmem>>, %arg3: memref<1x128xf32, #tpu.memory_space<vmem>>, %arg4: memref<200x128xf32, #tpu.memory_space<vmem>>) attributes {dimension_semantics = [#tpu.dimension_semantics<parallel>], iteration_bounds = array<i64: 1>, scalar_prefetch = 0 : i64, scratch_operands = 0 : i64, tpu.core_type = #tpu.core_type<tc>, window_params = [{transform_indices = @transform_0, window_bounds = array<i64: 200, 128>}, {pipeline_mode = #tpu.pipeline_mode<synchronous>, transform_indices = @transform_1, window_bounds = array<i64: 1, 128>}, {pipeline_mode = #tpu.pipeline_mode<synchronous>, transform_indices = @transform_2, window_bounds = array<i64: 1, 128>}, {transform_indices = @transform_3, window_bounds = array<i64: 200, 128>}]} {
    %c0 = arith.constant 0 : index
    %c0_0 = arith.constant 0 : index
    %0 = vector.load %arg1[%c0, %c0_0] : memref<200x128xf32, #tpu.memory_space<vmem>>, vector<200x128xf32>
    %c0_1 = arith.constant 0 : index
    %c0_2 = arith.constant 0 : index
    %1 = vector.load %arg2[%c0_1, %c0_2] : memref<1x128xf32, #tpu.memory_space<vmem>>, vector<1x128xf32>
    %2 = vector.broadcast %1 : vector<1x128xf32> to vector<200x128xf32>
    %3 = arith.mulf %0, %2 : vector<200x128xf32>
    %c0_3 = arith.constant 0 : index
    %c0_4 = arith.constant 0 : index
    %4 = vector.load %arg3[%c0_3, %c0_4] : memref<1x128xf32, #tpu.memory_space<vmem>>, vector<1x128xf32>
    %5 = vector.broadcast %4 : vector<1x128xf32> to vector<200x128xf32>
    %6 = arith.addf %3, %5 : vector<200x128xf32>
    %cst = arith.constant 0.000000e+00 : f32
    %7 = vector.broadcast %cst : f32 to vector<200x128xf32>
    %8 = arith.cmpf oge, %6, %7 : vector<200x128xf32>
    %cst_5 = arith.constant 2.000000e-01 : f32
    %9 = vector.broadcast %cst_5 : f32 to vector<200x128xf32>
    %10 = arith.mulf %9, %6 : vector<200x128xf32>
    %11 = arith.select %8, %6, %10 : vector<200x128xi1>, vector<200x128xf32>
    %c0_6 = arith.constant 0 : index
    %c0_7 = arith.constant 0 : index
    %12 = vector.load %arg4[%c0_6, %c0_7] : memref<200x128xf32, #tpu.memory_space<vmem>>, vector<200x128xf32>
    tpu.vector_store %arg4[%c0_6, %c0_7], %11 {strides = array<i32>} : memref<200x128xf32, #tpu.memory_space<vmem>>, vector<200x128xf32>,
    return
  }
  func.func @transform_0(%arg0: i32) -> (i32, i32) {
    %c0_i32 = arith.constant 0 : i32
    %c0_i32_0 = arith.constant 0 : i32
    return %arg0, %c0_i32 : i32, i32
  }
  func.func @transform_1(%arg0: i32) -> (i32, i32) {
    %c0_i32 = arith.constant 0 : i32
    %c0_i32_0 = arith.constant 0 : i32
    %c0_i32_1 = arith.constant 0 : i32
    return %c0_i32, %c0_i32_0 : i32, i32
  }
  func.func @transform_2(%arg0: i32) -> (i32, i32) {
    %c0_i32 = arith.constant 0 : i32
    %c0_i32_0 = arith.constant 0 : i32
    %c0_i32_1 = arith.constant 0 : i32
    return %c0_i32, %c0_i32_0 : i32, i32
  }
  func.func @transform_3(%arg0: i32) -> (i32, i32) {
    %c0_i32 = arith.constant 0 : i32
    %c0_i32_0 = arith.constant 0 : i32
    return %arg0, %c0_i32 : i32, i32
  }
}

module attributes {stable_mosaic.version = 11 : i64} {
  func.func @_affine_lrelu_kernel(%arg0: i32, %arg1: memref<32x128xf32, #tpu.memory_space<vmem>>, %arg2: memref<1x128xf32, #tpu.memory_space<vmem>>, %arg3: memref<1x128xf32, #tpu.memory_space<vmem>>, %arg4: memref<32x128xf32, #tpu.memory_space<vmem>>) attributes {dimension_semantics = [#tpu.dimension_semantics<parallel>], iteration_bounds = array<i64: 1>, scalar_prefetch = 0 : i64, scratch_operands = 0 : i64, tpu.core_type = #tpu.core_type<tc>, window_params = [{transform_indices = @transform_0, window_bounds = array<i64: 32, 128>}, {pipeline_mode = #tpu.pipeline_mode<synchronous>, transform_indices = @transform_1, window_bounds = array<i64: 1, 128>}, {pipeline_mode = #tpu.pipeline_mode<synchronous>, transform_indices = @transform_2, window_bounds = array<i64: 1, 128>}, {transform_indices = @transform_3, window_bounds = array<i64: 32, 128>}]} {
    %c0 = arith.constant 0 : index
    %c0_0 = arith.constant 0 : index
    %0 = vector.load %arg1[%c0, %c0_0] : memref<32x128xf32, #tpu.memory_space<vmem>>, vector<32x128xf32>
    %c0_1 = arith.constant 0 : index
    %c0_2 = arith.constant 0 : index
    %1 = vector.load %arg2[%c0_1, %c0_2] : memref<1x128xf32, #tpu.memory_space<vmem>>, vector<1x128xf32>
    %2 = vector.broadcast %1 : vector<1x128xf32> to vector<32x128xf32>
    %3 = arith.mulf %0, %2 : vector<32x128xf32>
    %c0_3 = arith.constant 0 : index
    %c0_4 = arith.constant 0 : index
    %4 = vector.load %arg3[%c0_3, %c0_4] : memref<1x128xf32, #tpu.memory_space<vmem>>, vector<1x128xf32>
    %5 = vector.broadcast %4 : vector<1x128xf32> to vector<32x128xf32>
    %6 = arith.addf %3, %5 : vector<32x128xf32>
    %cst = arith.constant 0.000000e+00 : f32
    %7 = vector.broadcast %cst : f32 to vector<32x128xf32>
    %8 = arith.cmpf oge, %6, %7 : vector<32x128xf32>
    %cst_5 = arith.constant 2.000000e-01 : f32
    %9 = vector.broadcast %cst_5 : f32 to vector<32x128xf32>
    %10 = arith.mulf %9, %6 : vector<32x128xf32>
    %11 = arith.select %8, %6, %10 : vector<32x128xi1>, vector<32x128xf32>
    %c0_6 = arith.constant 0 : index
    %c0_7 = arith.constant 0 : index
    %12 = vector.load %arg4[%c0_6, %c0_7] : memref<32x128xf32, #tpu.memory_space<vmem>>, vector<32x128xf32>
    tpu.vector_store %arg4[%c0_6, %c0_7], %11 {strides = array<i32>} : memref<32x128xf32, #tpu.memory_space<vmem>>, vector<32x128xf32>,
    return
  }
  func.func @transform_0(%arg0: i32) -> (i32, i32) {
    %c0_i32 = arith.constant 0 : i32
    %c0_i32_0 = arith.constant 0 : i32
    return %arg0, %c0_i32 : i32, i32
  }
  func.func @transform_1(%arg0: i32) -> (i32, i32) {
    %c0_i32 = arith.constant 0 : i32
    %c0_i32_0 = arith.constant 0 : i32
    %c0_i32_1 = arith.constant 0 : i32
    return %c0_i32, %c0_i32_0 : i32, i32
  }
  func.func @transform_2(%arg0: i32) -> (i32, i32) {
    %c0_i32 = arith.constant 0 : i32
    %c0_i32_0 = arith.constant 0 : i32
    %c0_i32_1 = arith.constant 0 : i32
    return %c0_i32, %c0_i32_0 : i32, i32
  }
  func.func @transform_3(%arg0: i32) -> (i32, i32) {
    %c0_i32 = arith.constant 0 : i32
    %c0_i32_0 = arith.constant 0 : i32
    return %arg0, %c0_i32 : i32, i32
  }
}

module attributes {stable_mosaic.version = 11 : i64} {
  func.func @_gemm_stats_kernel(%arg0: i32, %arg1: memref<32x256xbf16, #tpu.memory_space<vmem>>, %arg2: memref<256x128xbf16, #tpu.memory_space<vmem>>, %arg3: memref<1x128xf32, #tpu.memory_space<vmem>>, %arg4: memref<32x128xf32, #tpu.memory_space<vmem>>, %arg5: memref<1x2x128xf32, #tpu.memory_space<vmem>>) attributes {dimension_semantics = [#tpu.dimension_semantics<parallel>], iteration_bounds = array<i64: 1>, scalar_prefetch = 0 : i64, scratch_operands = 0 : i64, tpu.core_type = #tpu.core_type<tc>, window_params = [{transform_indices = @transform_0, window_bounds = array<i64: 32, 256>}, {pipeline_mode = #tpu.pipeline_mode<synchronous>, transform_indices = @transform_1, window_bounds = array<i64: 256, 128>}, {pipeline_mode = #tpu.pipeline_mode<synchronous>, transform_indices = @transform_2, window_bounds = array<i64: 1, 128>}, {transform_indices = @transform_3, window_bounds = array<i64: 32, 128>}, {transform_indices = @transform_4, window_bounds = array<i64: 1, 2, 128>}]} {
    %c0 = arith.constant 0 : index
    %c0_0 = arith.constant 0 : index
    %0 = vector.load %arg1[%c0, %c0_0] : memref<32x256xbf16, #tpu.memory_space<vmem>>, vector<32x256xbf16>
    %c0_1 = arith.constant 0 : index
    %c0_2 = arith.constant 0 : index
    %1 = vector.load %arg2[%c0_1, %c0_2] : memref<256x128xbf16, #tpu.memory_space<vmem>>, vector<256x128xbf16>
    %cst = arith.constant dense<0.000000e+00> : vector<32x128xf32>
    %2 = tpu.matmul %0, %1, %cst {dimension_numbers = #tpu.dot_dimension_numbers<[1], [0], [0], [1], [0, 0, 1, 1], [], []>} : vector<32x256xbf16>, vector<256x128xbf16>, vector<32x128xf32> -> vector<32x128xf32>
    %c0_3 = arith.constant 0 : index
    %c0_4 = arith.constant 0 : index
    %3 = vector.load %arg3[%c0_3, %c0_4] : memref<1x128xf32, #tpu.memory_space<vmem>>, vector<1x128xf32>
    %4 = vector.broadcast %3 : vector<1x128xf32> to vector<32x128xf32>
    %5 = arith.addf %2, %4 : vector<32x128xf32>
    %c0_5 = arith.constant 0 : index
    %c0_6 = arith.constant 0 : index
    %6 = vector.load %arg4[%c0_5, %c0_6] : memref<32x128xf32, #tpu.memory_space<vmem>>, vector<32x128xf32>
    tpu.vector_store %arg4[%c0_5, %c0_6], %5 {strides = array<i32>} : memref<32x128xf32, #tpu.memory_space<vmem>>, vector<32x128xf32>,
    %cst_7 = arith.constant dense<0.000000e+00> : vector<128xf32>
    %7 = vector.multi_reduction <add>, %5, %cst_7 [0] : vector<32x128xf32> to vector<128xf32>
    %8 = vector.shape_cast %7 : vector<128xf32> to vector<1x128xf32>
    %9 = arith.mulf %5, %5 : vector<32x128xf32>
    %cst_8 = arith.constant dense<0.000000e+00> : vector<128xf32>
    %10 = vector.multi_reduction <add>, %9, %cst_8 [0] : vector<32x128xf32> to vector<128xf32>
    %11 = vector.shape_cast %10 : vector<128xf32> to vector<1x128xf32>
    %12 = tpu.concatenate %8, %11 in 0 : vector<1x128xf32>, vector<1x128xf32> -> vector<2x128xf32>
    %13 = vector.shape_cast %12 : vector<2x128xf32> to vector<1x2x128xf32>
    %c0_9 = arith.constant 0 : index
    %c0_10 = arith.constant 0 : index
    %c0_11 = arith.constant 0 : index
    %14 = vector.load %arg5[%c0_9, %c0_10, %c0_11] : memref<1x2x128xf32, #tpu.memory_space<vmem>>, vector<1x2x128xf32>
    tpu.vector_store %arg5[%c0_9, %c0_10, %c0_11], %13 {strides = array<i32>} : memref<1x2x128xf32, #tpu.memory_space<vmem>>, vector<1x2x128xf32>,
    return
  }
  func.func @transform_0(%arg0: i32) -> (i32, i32) {
    %c0_i32 = arith.constant 0 : i32
    %c0_i32_0 = arith.constant 0 : i32
    return %arg0, %c0_i32 : i32, i32
  }
  func.func @transform_1(%arg0: i32) -> (i32, i32) {
    %c0_i32 = arith.constant 0 : i32
    %c0_i32_0 = arith.constant 0 : i32
    %c0_i32_1 = arith.constant 0 : i32
    return %c0_i32, %c0_i32_0 : i32, i32
  }
  func.func @transform_2(%arg0: i32) -> (i32, i32) {
    %c0_i32 = arith.constant 0 : i32
    %c0_i32_0 = arith.constant 0 : i32
    %c0_i32_1 = arith.constant 0 : i32
    return %c0_i32, %c0_i32_0 : i32, i32
  }
  func.func @transform_3(%arg0: i32) -> (i32, i32) {
    %c0_i32 = arith.constant 0 : i32
    %c0_i32_0 = arith.constant 0 : i32
    return %arg0, %c0_i32 : i32, i32
  }
  func.func @transform_4(%arg0: i32) -> (i32, i32, i32) {
    %c0_i32 = arith.constant 0 : i32
    %c0_i32_0 = arith.constant 0 : i32
    %c0_i32_1 = arith.constant 0 : i32
    return %arg0, %c0_i32, %c0_i32_0 : i32, i32, i32
  }
}

module attributes {stable_mosaic.version = 11 : i64} {
  func.func @_gemm_bias_kernel(%arg0: i32, %arg1: memref<8x512xbf16, #tpu.memory_space<vmem>>, %arg2: memref<512x128xbf16, #tpu.memory_space<vmem>>, %arg3: memref<1x128xf32, #tpu.memory_space<vmem>>, %arg4: memref<8x128xf32, #tpu.memory_space<vmem>>) attributes {dimension_semantics = [#tpu.dimension_semantics<parallel>], iteration_bounds = array<i64: 1>, scalar_prefetch = 0 : i64, scratch_operands = 0 : i64, tpu.core_type = #tpu.core_type<tc>, window_params = [{transform_indices = @transform_0, window_bounds = array<i64: 8, 512>}, {pipeline_mode = #tpu.pipeline_mode<synchronous>, transform_indices = @transform_1, window_bounds = array<i64: 512, 128>}, {pipeline_mode = #tpu.pipeline_mode<synchronous>, transform_indices = @transform_2, window_bounds = array<i64: 1, 128>}, {transform_indices = @transform_3, window_bounds = array<i64: 8, 128>}]} {
    %c0 = arith.constant 0 : index
    %c0_0 = arith.constant 0 : index
    %0 = vector.load %arg1[%c0, %c0_0] : memref<8x512xbf16, #tpu.memory_space<vmem>>, vector<8x512xbf16>
    %c0_1 = arith.constant 0 : index
    %c0_2 = arith.constant 0 : index
    %1 = vector.load %arg2[%c0_1, %c0_2] : memref<512x128xbf16, #tpu.memory_space<vmem>>, vector<512x128xbf16>
    %cst = arith.constant dense<0.000000e+00> : vector<8x128xf32>
    %2 = tpu.matmul %0, %1, %cst {dimension_numbers = #tpu.dot_dimension_numbers<[1], [0], [0], [1], [0, 0, 1, 1], [], []>} : vector<8x512xbf16>, vector<512x128xbf16>, vector<8x128xf32> -> vector<8x128xf32>
    %c0_3 = arith.constant 0 : index
    %c0_4 = arith.constant 0 : index
    %3 = vector.load %arg3[%c0_3, %c0_4] : memref<1x128xf32, #tpu.memory_space<vmem>>, vector<1x128xf32>
    %4 = vector.broadcast %3 : vector<1x128xf32> to vector<8x128xf32>
    %5 = arith.addf %2, %4 : vector<8x128xf32>
    %c0_5 = arith.constant 0 : index
    %c0_6 = arith.constant 0 : index
    %6 = vector.load %arg4[%c0_5, %c0_6] : memref<8x128xf32, #tpu.memory_space<vmem>>, vector<8x128xf32>
    tpu.vector_store %arg4[%c0_5, %c0_6], %5 {strides = array<i32>} : memref<8x128xf32, #tpu.memory_space<vmem>>, vector<8x128xf32>,
    return
  }
  func.func @transform_0(%arg0: i32) -> (i32, i32) {
    %c0_i32 = arith.constant 0 : i32
    %c0_i32_0 = arith.constant 0 : i32
    return %arg0, %c0_i32 : i32, i32
  }
  func.func @transform_1(%arg0: i32) -> (i32, i32) {
    %c0_i32 = arith.constant 0 : i32
    %c0_i32_0 = arith.constant 0 : i32
    %c0_i32_1 = arith.constant 0 : i32
    return %c0_i32, %c0_i32_0 : i32, i32
  }
  func.func @transform_2(%arg0: i32) -> (i32, i32) {
    %c0_i32 = arith.constant 0 : i32
    %c0_i32_0 = arith.constant 0 : i32
    %c0_i32_1 = arith.constant 0 : i32
    return %c0_i32, %c0_i32_0 : i32, i32
  }
  func.func @transform_3(%arg0: i32) -> (i32, i32) {
    %c0_i32 = arith.constant 0 : i32
    %c0_i32_0 = arith.constant 0 : i32
    return %arg0, %c0_i32 : i32, i32
  }
}

</mosaic_0001>

<bundles_post_ra>
// kernel: discriminador_condicional_forward.8
= control target key start
LH: loop header
LB: loop body
LE: loop exit
PB: predicated region body
PF: predicated region fallthrough
CT: control target
= control target key end

     0   :  { %s741_s12 = smov 0   ;;  %s1206_s0 = inlined_call_operand.vmem [shape: f32[1536,128], index: 0, kind: input, shape index: {}, may-alias: {0,3}]   ;;  %s1207_s1 = inlined_call_operand.vmem [shape: f32[1,128], index: 1, kind: input, shape index: {}]   ;;  %s1208_s2 = inlined_call_operand.vmem [shape: f32[1,128], index: 2, kind: input, shape index: {}]   ;;  %s1209_s3 = inlined_call_operand.vmem [shape: f32[1536,128], index: 3, kind: output, shape index: {}, may-alias: {0,3}]  }
   0x1 LB: > { %s692_s13 = sadd.s32 4294967295, %s719_s12   ;;  %p696_p0 = scmp.ge.s32.totalorder %s719_s12, 1  ;;  %s719_s12 = sphi %s741_s12, %s13_s12  }
   0x2   : > { %p138_p1 = scmp.lt.s32.totalorder %s719_s12, 4 }
   0x4   : > { %p139_p2 = pnand %p696_p0, %p138_p1 }
   0x6   : > { %142 = sbr.rel (%p139_p2) target bundleno = 105 (0x69), region = 32 }
   0xd   : > { %s697_s14 = sshll.u32 %s692_s13, 6  ;;  %v755_v0 = vld [vmem:[%s1207_s1] ss:$0 sm:$0xff] }
   0xe   : > { %p163_p3 = scmp.lt.s32.totalorder %s697_s14, 191  ;;  %v767_v1 = vld [vmem:[%s1208_s2] ss:$0 sm:$0xff] }
  0x10   : > { %s1225_s14 = smov (!%p163_p3, %s697_s14), 191 }
  0x11   : > { %s698_s15 = sshll.u32 %s1225_s14, 3 }
  0x12   : > { %s762_s20 = scalar_lea.vmem %s1206_s0, %s698_s15  ;;  %s848_s25 = scalar_lea.vmem %s1209_s3, %s698_s15 }
  0x13   : > { %v174_v2 = vld [vmem:[%s762_s20] sm:$0xff]  ;;  %v175_v3 = vld [vmem:[%s762_s20 + $0x8] sm:$0xff]  ;;  %v176_v4 = vld [vmem:[%s762_s20 + $0x10] sm:$0xff] }
  0x14   : > { %v177_v5 = vld [vmem:[%s762_s20 + $0x18] sm:$0xff]  ;;  %v178_v6 = vld [vmem:[%s762_s20 + $0x20] sm:$0xff]  ;;  %v179_v7 = vld [vmem:[%s762_s20 + $0x28] sm:$0xff]  ;;  %v245_v8 = vmul.f32 %v755_v0, %v174_v2  ;;  %v246_v9 = vmul.f32 %v755_v0, %v175_v3  ;;  %v247_v10 = vmul.f32 %v755_v0, %v176_v4 }
  0x15   : > { %v180_v11 = vld [vmem:[%s762_s20 + $0x30] sm:$0xff]  ;;  %v181_v12 = vld [vmem:[%s762_s20 + $0x38] sm:$0xff]  ;;  %v182_v13 = vld [vmem:[%s762_s20 + $0x40] sm:$0xff]  ;;  %v248_v14 = vmul.f32 %v755_v0, %v177_v5  ;;  %v249_v15 = vmul.f32 %v755_v0, %v178_v6  ;;  %v250_v16 = vmul.f32 %v755_v0, %v179_v7 }
  0x16   : > { %v183_v17 = vld [vmem:[%s762_s20 + $0x48] sm:$0xff]  ;;  %v316_v18 = vadd.f32 %v767_v1, %v245_v8  ;;  %v317_v19 = vadd.f32 %v767_v1, %v246_v9  ;;  %v318_v20 = vadd.f32 %v767_v1, %v247_v10  ;;  %v251_v21 = vmul.f32 %v755_v0, %v180_v11  ;;  %v184_v29 = vld [vmem:[%s762_s20 + $0x50] sm:$0xff]  ;;  %v185_v33 = vld [vmem:[%s762_s20 + $0x58] sm:$0xff] }
  0x17   : > { %v319_v22 = vadd.f32 %v767_v1, %v248_v14  ;;  %v320_v23 = vadd.f32 %v767_v1, %v249_v15  ;;  %v321_v24 = vadd.f32 %v767_v1, %v250_v16  ;;  %v252_v25 = vmul.f32 %v755_v0, %v181_v12  ;;  %v186_v43 = vld [vmem:[%s762_s20 + $0x60] sm:$0xff]  ;;  %v187_v47 = vld [vmem:[%s762_s20 + $0x68] sm:$0xff]  ;;  %v188_v57 = vld [vmem:[%s762_s20 + $0x70] sm:$0xff] }
  0x18   : > { %vm380_vm0 = vcmp.ge.f32.partialorder %v316_v18, 0.0  ;;  %v444_v26 = vmul.f32 0.2, %v316_v18  ;;  %v322_v27 = vadd.f32 %v767_v1, %v251_v21  ;;  %v253_v28 = vmul.f32 %v755_v0, %v182_v13  ;;  %v189_v61 = vld [vmem:[%s762_s20 + $0x78] sm:$0xff]  ;;  %v190_v3 = vld [vmem:[%s762_s20 + $0x80] sm:$0xff]  ;;  %v191_v4 = vld [vmem:[%s762_s20 + $0x88] sm:$0xff] }
  0x19   : > { %vm381_vm1 = vcmp.ge.f32.partialorder %v317_v19, 0.0  ;;  %v445_v30 = vmul.f32 0.2, %v317_v19  ;;  %v323_v31 = vadd.f32 %v767_v1, %v252_v25  ;;  %v254_v32 = vmul.f32 %v755_v0, %v183_v17  ;;  %v192_v8 = vld [vmem:[%s762_s20 + $0x90] sm:$0xff]  ;;  %v193_v9 = vld [vmem:[%s762_s20 + $0x98] sm:$0xff]  ;;  %v851_v16 = vld [vmem:[%s762_s20 + $0xa0] sm:$0xff] }
  0x1a   : > { %v799_v34 = vsel %vm380_vm0, %v316_v18, %v444_v26  ;;  %vm382_vm2 = vcmp.ge.f32.partialorder %v318_v20, 0.0  ;;  %v446_v35 = vmul.f32 0.2, %v318_v20  ;;  %v324_v36 = vadd.f32 %v767_v1, %v253_v28  ;;  %v854_v17 = vld [vmem:[%s762_s20 + $0xa8] sm:$0xff]  ;;  %v857_v18 = vld [vmem:[%s762_s20 + $0xb0] sm:$0xff]  ;;  %v887_v28 = vld [vmem:[%s762_s20 + $0x100] sm:$0xff] }
  0x1b   : > { %v802_v37 = vsel %vm381_vm1, %v317_v19, %v445_v30  ;;  %vm383_vm3 = vcmp.ge.f32.partialorder %v319_v22, 0.0  ;;  %v447_v38 = vmul.f32 0.2, %v319_v22  ;;  %v325_v39 = vadd.f32 %v767_v1, %v254_v32  ;;  %v860_v19 = vld [vmem:[%s762_s20 + $0xb8] sm:$0xff]  ;;  %v866_v21 = vld [vmem:[%s762_s20 + $0xc8] sm:$0xff]  ;;  %v881_v26 = vld [vmem:[%s762_s20 + $0xf0] sm:$0xff] }
  0x1c   : > { %v805_v40 = vsel %vm382_vm2, %v318_v20, %v446_v35  ;;  %vm384_vm4 = vcmp.ge.f32.partialorder %v320_v23, 0.0  ;;  %v448_v41 = vmul.f32 0.2, %v320_v23  ;;  %v255_v42 = vmul.f32 %v755_v0, %v184_v29  ;;  %v863_v20 = vld [vmem:[%s762_s20 + $0xc0] sm:$0xff]  ;;  %v878_v25 = vld [vmem:[%s762_s20 + $0xe8] sm:$0xff]  ;;  %v893_v30 = vld [vmem:[%s762_s20 + $0x110] sm:$0xff] }
  0x1d   : > { %v809_v44 = vsel %vm383_vm3, %v319_v22, %v447_v38  ;;  %vm385_vm5 = vcmp.ge.f32.partialorder %v321_v24, 0.0  ;;  %v449_v45 = vmul.f32 0.2, %v321_v24  ;;  %v256_v46 = vmul.f32 %v755_v0, %v185_v33  ;;  %v869_v22 = vld [vmem:[%s762_s20 + $0xd0] sm:$0xff]  ;;  %v890_v29 = vld [vmem:[%s762_s20 + $0x108] sm:$0xff]  ;;  %v899_v32 = vld [vmem:[%s762_s20 + $0x120] sm:$0xff] }
  0x1e   : > { %v813_v48 = vsel %vm384_vm4, %v320_v23, %v448_v41  ;;  %vm386_vm6 = vcmp.ge.f32.partialorder %v322_v27, 0.0  ;;  %v450_v49 = vmul.f32 0.2, %v322_v27  ;;  %v326_v50 = vadd.f32 %v767_v1, %v255_v42  ;;  %v872_v23 = vld [vmem:[%s762_s20 + $0xd8] sm:$0xff]  ;;  %v902_v33 = vld [vmem:[%s762_s20 + $0x128] sm:$0xff]  ;;  %v905_v35 = vld [vmem:[%s762_s20 + $0x130] sm:$0xff] }
  0x1f   : > { %v816_v51 = vsel %vm385_vm5, %v321_v24, %v449_v45  ;;  %vm387_vm7 = vcmp.ge.f32.partialorder %v323_v31, 0.0  ;;  %v451_v52 = vmul.f32 0.2, %v323_v31  ;;  %v327_v53 = vadd.f32 %v767_v1, %v256_v46  ;;  %v875_v24 = vld [vmem:[%s762_s20 + $0xe0] sm:$0xff]  ;;  %v917_v41 = vld [vmem:[%s762_s20 + $0x150] sm:$0xff]  ;;  %v920_v42 = vld [vmem:[%s762_s20 + $0x158] sm:$0xff] }
  0x20   : > { %v819_v54 = vsel %vm386_vm6, %v322_v27, %v450_v49  ;;  %vm388_vm8 = vcmp.ge.f32.partialorder %v324_v36, 0.0  ;;  %v452_v55 = vmul.f32 0.2, %v324_v36  ;;  %v257_v56 = vmul.f32 %v755_v0, %v186_v43  ;;  %v884_v27 = vld [vmem:[%s762_s20 + $0xf8] sm:$0xff]  ;;  %v911_v38 = vld [vmem:[%s762_s20 + $0x140] sm:$0xff]  ;;  %v926_v45 = vld [vmem:[%s762_s20 + $0x168] sm:$0xff] }
  0x21   : > { %v823_v58 = vsel %vm387_vm7, %v323_v31, %v451_v52  ;;  %vm389_vm9 = vcmp.ge.f32.partialorder %v325_v39, 0.0  ;;  %v453_v59 = vmul.f32 0.2, %v325_v39  ;;  %v258_v60 = vmul.f32 %v755_v0, %v187_v47  ;;  %v896_v31 = vld [vmem:[%s762_s20 + $0x118] sm:$0xff]  ;;  %v923_v43 = vld [vmem:[%s762_s20 + $0x160] sm:$0xff]  ;;  %v929_v46 = vld [vmem:[%s762_s20 + $0x170] sm:$0xff] }
  0x22   : > { %v827_v62 = vsel %vm388_vm8, %v324_v36, %v452_v55  ;;  %vm390_vm10 = vcmp.ge.f32.partialorder %v326_v50, 0.0  ;;  %v454_v63 = vmul.f32 0.2, %v326_v50  ;;  %v328_v2 = vadd.f32 %v767_v1, %v257_v56  ;;  %v908_v36 = vld [vmem:[%s762_s20 + $0x138] sm:$0xff]  ;;  %v935_v49 = vld [vmem:[%s762_s20 + $0x180] sm:$0xff]  ;;  %v941_v52 = vld [vmem:[%s762_s20 + $0x190] sm:$0xff] }
  0x23   : > { %v832_v5 = vsel %vm389_vm9, %v325_v39, %v453_v59  ;;  %vm391_vm11 = vcmp.ge.f32.partialorder %v327_v53, 0.0  ;;  %v455_v6 = vmul.f32 0.2, %v327_v53  ;;  %v329_v7 = vadd.f32 %v767_v1, %v258_v60  ;;  %v914_v39 = vld [vmem:[%s762_s20 + $0x148] sm:$0xff]  ;;  %v932_v47 = vld [vmem:[%s762_s20 + $0x178] sm:$0xff]  ;;  %v947_v55 = vld [vmem:[%s762_s20 + $0x1a0] sm:$0xff] }
  0x24   : > { %v837_v10 = vsel %vm390_vm10, %v326_v50, %v454_v63  ;;  %vm392_vm12 = vcmp.ge.f32.partialorder %v328_v2, 0.0  ;;  %v456_v11 = vmul.f32 0.2, %v328_v2  ;;  %v259_v12 = vmul.f32 %v755_v0, %v188_v57  ;;  %v938_v50 = vld [vmem:[%s762_s20 + $0x188] sm:$0xff]  ;;  %1211 = vst [vmem:[#allocation3_spill] sm:$0xff] %v947_v55  ;;  %v953_v57 = vld [vmem:[%s762_s20 + $0x1b0] sm:$0xff] }
  0x25   : > { %v840_v13 = vsel %vm391_vm11, %v327_v53, %v455_v6  ;;  %vm393_vm13 = vcmp.ge.f32.partialorder %v329_v7, 0.0  ;;  %v457_v14 = vmul.f32 0.2, %v329_v7  ;;  %v260_v15 = vmul.f32 %v755_v0, %v189_v61  ;;  %v944_v53 = vld [vmem:[%s762_s20 + $0x198] sm:$0xff]  ;;  %v950_v56 = vld [vmem:[%s762_s20 + $0x1a8] sm:$0xff]  ;;  %1213 = vst [vmem:[#allocation5_spill] sm:$0xff] %v953_v57 }
  0x26   : > { %1210 = vst [vmem:[#allocation2_spill] sm:$0xff] %v944_v53  ;;  %1212 = vst [vmem:[#allocation4_spill] sm:$0xff] %v950_v56  ;;  %v956_v59 = vld [vmem:[%s762_s20 + $0x1b8] sm:$0xff]  ;;  %v959_v60 = vld [vmem:[%s762_s20 + $0x1c0] sm:$0xff]  ;;  %v520_v63 = vsel %vm392_vm12, %v328_v2, %v456_v11  ;;  %v330_v6 = vadd.f32 %v767_v1, %v259_v12  ;;  %v261_v53 = vmul.f32 %v755_v0, %v190_v3 }
  0x27   : > { %1214 = vst [vmem:[#allocation6_spill] sm:$0xff] %v956_v59  ;;  %v962_v61 = vld [vmem:[%s762_s20 + $0x1c8] sm:$0xff]  ;;  %v262_v56 = vmul.f32 %v755_v0, %v191_v4  ;;  %v969_v55 = vld [vmem:[%s762_s20 + $0x1d0] sm:$0xff]  ;;  %v972_v57 = vld [vmem:[%s762_s20 + $0x1d8] sm:$0xff]  ;;  %v331_v2 = vadd.f32 %v767_v1, %v260_v15  ;;  %v263_v3 = vmul.f32 %v755_v0, %v192_v8  ;;  %v264_v4 = vmul.f32 %v755_v0, %v193_v9 }
  0x28   : > { %1215 = vst [vmem:[#allocation7_spill] sm:$0xff] %v962_v61  ;;  %v975_v59 = vld [vmem:[%s762_s20 + $0x1e0] sm:$0xff]  ;;  %v521_v61 = vsel %vm393_vm13, %v329_v7, %v457_v14  ;;  %v982_v11 = vld [vmem:[%s762_s20 + $0x1e8] sm:$0xff]  ;;  %v985_v12 = vld [vmem:[%s762_s20 + $0x1f0] sm:$0xff]  ;;  %vm394_vm14 = vcmp.ge.f32.partialorder %v330_v6, 0.0  ;;  %v332_v14 = vadd.f32 %v767_v1, %v261_v53  ;;  %v265_v9 = vmul.f32 %v755_v0, %v851_v16 }
  0x29   : > { %1216 = vst [vmem:[#allocation8_spill] sm:$0xff] %v975_v59  ;;  %v988_v59 = vld [vmem:[%s762_s20 + $0x1f8] sm:$0xff]  ;;  %v458_v7 = vmul.f32 0.2, %v330_v6  ;;  %v333_v8 = vadd.f32 %v767_v1, %v262_v56  ;;  %vm395_vm15 = vcmp.ge.f32.partialorder %v331_v2, 0.0  ;;  %v266_v15 = vmul.f32 %v755_v0, %v854_v17 }
  0x2a   : > { %572 = vst [vmem:[%s848_s25] sm:$0xff] %v799_v34  ;;  %573 = vst [vmem:[%s848_s25 + $0x8] sm:$0xff] %v802_v37  ;;  %v459_v34 = vmul.f32 0.2, %v331_v2  ;;  %v334_v37 = vadd.f32 %v767_v1, %v263_v3  ;;  %vm396_vm0 = vcmp.ge.f32.partialorder %v332_v14, 0.0  ;;  %v267_v53 = vmul.f32 %v755_v0, %v857_v18 }
  0x2b   : > { %574 = vst [vmem:[%s848_s25 + $0x10] sm:$0xff] %v805_v40  ;;  %575 = vst [vmem:[%s848_s25 + $0x18] sm:$0xff] %v809_v44  ;;  %v335_v40 = vadd.f32 %v767_v1, %v264_v4  ;;  %v522_v44 = vsel %vm394_vm14, %v330_v6, %v458_v7  ;;  %vm397_vm1 = vcmp.ge.f32.partialorder %v333_v8, 0.0  ;;  %v269_v16 = vmul.f32 %v755_v0, %v863_v20 }
  0x2c   : > { %576 = vst [vmem:[%s848_s25 + $0x20] sm:$0xff] %v813_v48  ;;  %577 = vst [vmem:[%s848_s25 + $0x28] sm:$0xff] %v816_v51  ;;  %v460_v48 = vmul.f32 0.2, %v332_v14  ;;  %v523_v51 = vsel %vm395_vm15, %v331_v2, %v459_v34  ;;  %vm398_vm2 = vcmp.ge.f32.partialorder %v334_v37, 0.0  ;;  %v337_v6 = vadd.f32 %v767_v1, %v266_v15 }
  0x2d   : > { %578 = vst [vmem:[%s848_s25 + $0x30] sm:$0xff] %v819_v54  ;;  %579 = vst [vmem:[%s848_s25 + $0x38] sm:$0xff] %v823_v58  ;;  %v461_v54 = vmul.f32 0.2, %v333_v8  ;;  %v462_v58 = vmul.f32 0.2, %v334_v37  ;;  %v338_v17 = vadd.f32 %v767_v1, %v267_v53  ;;  %v270_v18 = vmul.f32 %v755_v0, %v866_v21 }
  0x2e   : > { %580 = vst [vmem:[%s848_s25 + $0x40] sm:$0xff] %v827_v62  ;;  %581 = vst [vmem:[%s848_s25 + $0x48] sm:$0xff] %v832_v5  ;;  %v524_v62 = vsel %vm396_vm0, %v332_v14, %v460_v48  ;;  %vm399_vm3 = vcmp.ge.f32.partialorder %v335_v40, 0.0  ;;  %v463_v5 = vmul.f32 0.2, %v335_v40  ;;  %v271_v2 = vmul.f32 %v755_v0, %v869_v22 }
  0x2f   : > { %582 = vst [vmem:[%s848_s25 + $0x50] sm:$0xff] %v837_v10  ;;  %583 = vst [vmem:[%s848_s25 + $0x58] sm:$0xff] %v840_v13  ;;  %v525_v10 = vsel %vm397_vm1, %v333_v8, %v461_v54  ;;  %v526_v13 = vsel %vm398_vm2, %v334_v37, %v462_v58  ;;  %v340_v20 = vadd.f32 %v767_v1, %v269_v16  ;;  %vm401_vm5 = vcmp.ge.f32.partialorder %v337_v6, 0.0 }
  0x30   : > { %584 = vst [vmem:[%s848_s25 + $0x60] sm:$0xff] %v520_v63  ;;  %585 = vst [vmem:[%s848_s25 + $0x68] sm:$0xff] %v521_v61  ;;  %v527_v56 = vsel %vm399_vm3, %v335_v40, %v463_v5  ;;  %v336_v61 = vadd.f32 %v767_v1, %v265_v9  ;;  %v268_v63 = vmul.f32 %v755_v0, %v860_v19  ;;  %v465_v4 = vmul.f32 0.2, %v337_v6 }
  0x31   : > { %586 = vst [vmem:[%s848_s25 + $0x70] sm:$0xff] %v522_v44  ;;  %587 = vst [vmem:[%s848_s25 + $0x78] sm:$0xff] %v523_v51  ;;  %vm402_vm6 = vcmp.ge.f32.partialorder %v338_v17, 0.0  ;;  %v466_v7 = vmul.f32 0.2, %v338_v17  ;;  %vm404_vm8 = vcmp.ge.f32.partialorder %v340_v20, 0.0  ;;  %v341_v37 = vadd.f32 %v767_v1, %v270_v18 }
  0x32   : > { %588 = vst [vmem:[%s848_s25 + $0x80] sm:$0xff] %v524_v62  ;;  %589 = vst [vmem:[%s848_s25 + $0x88] sm:$0xff] %v525_v10  ;;  %vm400_vm4 = vcmp.ge.f32.partialorder %v336_v61, 0.0  ;;  %v464_v3 = vmul.f32 0.2, %v336_v61  ;;  %v339_v19 = vadd.f32 %v767_v1, %v268_v63  ;;  %v529_v21 = vsel %vm401_vm5, %v337_v6, %v465_v4 }
  0x33   : > { %590 = vst [vmem:[%s848_s25 + $0x90] sm:$0xff] %v526_v13  ;;  %591 = vst [vmem:[%s848_s25 + $0x98] sm:$0xff] %v527_v56  ;;  %v530_v22 = vsel %vm402_vm6, %v338_v17, %v466_v7  ;;  %v468_v34 = vmul.f32 0.2, %v340_v20  ;;  %v342_v44 = vadd.f32 %v767_v1, %v271_v2  ;;  %v272_v48 = vmul.f32 %v755_v0, %v872_v23 }
  0x34   : > { %v528_v14 = vsel %vm400_vm4, %v336_v61, %v464_v3  ;;  %vm403_vm7 = vcmp.ge.f32.partialorder %v339_v19, 0.0  ;;  %v467_v8 = vmul.f32 0.2, %v339_v19  ;;  %593 = vst [vmem:[%s848_s25 + $0xa8] sm:$0xff] %v529_v21  ;;  %594 = vst [vmem:[%s848_s25 + $0xb0] sm:$0xff] %v530_v22  ;;  %v273_v51 = vmul.f32 %v755_v0, %v875_v24 }
  0x35   : > { %592 = vst [vmem:[%s848_s25 + $0xa0] sm:$0xff] %v528_v14  ;;  %v532_v54 = vsel %vm404_vm8, %v340_v20, %v468_v34  ;;  %vm405_vm9 = vcmp.ge.f32.partialorder %v341_v37, 0.0  ;;  %v469_v58 = vmul.f32 0.2, %v341_v37  ;;  %v274_v62 = vmul.f32 %v755_v0, %v878_v25 }
  0x36   : > { %v531_v40 = vsel %vm403_vm7, %v339_v19, %v467_v8  ;;  %596 = vst [vmem:[%s848_s25 + $0xc0] sm:$0xff] %v532_v54  ;;  %vm406_vm10 = vcmp.ge.f32.partialorder %v342_v44, 0.0  ;;  %v470_v5 = vmul.f32 0.2, %v342_v44  ;;  %v343_v9 = vadd.f32 %v767_v1, %v272_v48 }
  0x37   : > { %595 = vst [vmem:[%s848_s25 + $0xb8] sm:$0xff] %v531_v40  ;;  %v344_v10 = vadd.f32 %v767_v1, %v273_v51  ;;  %v533_v23 = vsel %vm405_vm9, %v341_v37, %v469_v58  ;;  %v345_v13 = vadd.f32 %v767_v1, %v274_v62  ;;  %v275_v24 = vmul.f32 %v755_v0, %v881_v26 }
  0x38   : > { %v276_v15 = vmul.f32 %v755_v0, %v884_v27  ;;  %597 = vst [vmem:[%s848_s25 + $0xc8] sm:$0xff] %v533_v23  ;;  %v534_v53 = vsel %vm406_vm10, %v342_v44, %v470_v5  ;;  %vm407_vm11 = vcmp.ge.f32.partialorder %v343_v9, 0.0  ;;  %v471_v25 = vmul.f32 0.2, %v343_v9 }
  0x39   : > { %vm408_vm12 = vcmp.ge.f32.partialorder %v344_v10, 0.0  ;;  %598 = vst [vmem:[%s848_s25 + $0xd0] sm:$0xff] %v534_v53  ;;  %v472_v56 = vmul.f32 0.2, %v344_v10  ;;  %vm409_vm13 = vcmp.ge.f32.partialorder %v345_v13, 0.0  ;;  %v346_v63 = vadd.f32 %v767_v1, %v275_v24 }
  0x3a   : > { %v473_v61 = vmul.f32 0.2, %v345_v13  ;;  %v535_v16 = vsel %vm407_vm11, %v343_v9, %v471_v25  ;;  %v347_v26 = vadd.f32 %v767_v1, %v276_v15  ;;  %v277_v6 = vmul.f32 %v755_v0, %v887_v28 }
  0x3b   : > { %v278_v27 = vmul.f32 %v755_v0, %v890_v29  ;;  %599 = vst [vmem:[%s848_s25 + $0xd8] sm:$0xff] %v535_v16  ;;  %v536_v17 = vsel %vm408_vm12, %v344_v10, %v472_v56  ;;  %vm410_vm14 = vcmp.ge.f32.partialorder %v346_v63, 0.0  ;;  %v474_v2 = vmul.f32 0.2, %v346_v63 }
  0x3c   : > { %v537_v18 = vsel %vm409_vm13, %v345_v13, %v473_v61  ;;  %600 = vst [vmem:[%s848_s25 + $0xe0] sm:$0xff] %v536_v17  ;;  %vm411_vm15 = vcmp.ge.f32.partialorder %v347_v26, 0.0  ;;  %v475_v3 = vmul.f32 0.2, %v347_v26  ;;  %v348_v19 = vadd.f32 %v767_v1, %v277_v6 }
  0x3d   : > { %601 = vst [vmem:[%s848_s25 + $0xe8] sm:$0xff] %v537_v18  ;;  %v349_v20 = vadd.f32 %v767_v1, %v278_v27  ;;  %v538_v4 = vsel %vm410_vm14, %v346_v63, %v474_v2  ;;  %v279_v28 = vmul.f32 %v755_v0, %v893_v30  ;;  %v280_v29 = vmul.f32 %v755_v0, %v896_v31 }
  0x3e   : > { %v281_v7 = vmul.f32 %v755_v0, %v899_v32  ;;  %602 = vst [vmem:[%s848_s25 + $0xf0] sm:$0xff] %v538_v4  ;;  %v539_v14 = vsel %vm411_vm15, %v347_v26, %v475_v3  ;;  %vm412_vm0 = vcmp.ge.f32.partialorder %v348_v19, 0.0  ;;  %v476_v8 = vmul.f32 0.2, %v348_v19 }
  0x3f   : > { %vm413_vm1 = vcmp.ge.f32.partialorder %v349_v20, 0.0  ;;  %603 = vst [vmem:[%s848_s25 + $0xf8] sm:$0xff] %v539_v14  ;;  %v477_v21 = vmul.f32 0.2, %v349_v20  ;;  %v350_v22 = vadd.f32 %v767_v1, %v279_v28  ;;  %v351_v34 = vadd.f32 %v767_v1, %v280_v29 }
  0x40   : > { %v352_v30 = vadd.f32 %v767_v1, %v281_v7  ;;  %v540_v37 = vsel %vm412_vm0, %v348_v19, %v476_v8  ;;  %v282_v31 = vmul.f32 %v755_v0, %v902_v33  ;;  %v283_v32 = vmul.f32 %v755_v0, %v905_v35 }
  0x41   : > { %v284_v40 = vmul.f32 %v755_v0, %v908_v36  ;;  %604 = vst [vmem:[%s848_s25 + $0x100] sm:$0xff] %v540_v37  ;;  %v541_v44 = vsel %vm413_vm1, %v349_v20, %v477_v21  ;;  %vm414_vm2 = vcmp.ge.f32.partialorder %v350_v22, 0.0  ;;  %v478_v48 = vmul.f32 0.2, %v350_v22 }
  0x42   : > { %vm415_vm3 = vcmp.ge.f32.partialorder %v351_v34, 0.0  ;;  %605 = vst [vmem:[%s848_s25 + $0x108] sm:$0xff] %v541_v44  ;;  %v479_v51 = vmul.f32 0.2, %v351_v34  ;;  %vm416_vm4 = vcmp.ge.f32.partialorder %v352_v30, 0.0  ;;  %v353_v33 = vadd.f32 %v767_v1, %v282_v31  ;;  %v1218_v31 = vld [vmem:[#allocation3_spill] sm:$0xff] }
  0x43   : > { %v480_v54 = vmul.f32 0.2, %v352_v30  ;;  %v542_v58 = vsel %vm414_vm2, %v350_v22, %v478_v48  ;;  %v354_v35 = vadd.f32 %v767_v1, %v283_v32  ;;  %v355_v62 = vadd.f32 %v767_v1, %v284_v40 }
  0x44   : > { %v285_v36 = vmul.f32 %v755_v0, %v911_v38  ;;  %606 = vst [vmem:[%s848_s25 + $0x110] sm:$0xff] %v542_v58  ;;  %v543_v5 = vsel %vm415_vm3, %v351_v34, %v479_v51  ;;  %vm417_vm5 = vcmp.ge.f32.partialorder %v353_v33, 0.0  ;;  %v481_v10 = vmul.f32 0.2, %v353_v33  ;;  %v1219_v58 = vld [vmem:[#allocation4_spill] sm:$0xff] }
  0x45   : > { %v544_v9 = vsel %vm416_vm4, %v352_v30, %v480_v54  ;;  %607 = vst [vmem:[%s848_s25 + $0x118] sm:$0xff] %v543_v5  ;;  %vm418_vm6 = vcmp.ge.f32.partialorder %v354_v35, 0.0  ;;  %v482_v23 = vmul.f32 0.2, %v354_v35  ;;  %vm419_vm7 = vcmp.ge.f32.partialorder %v355_v62, 0.0  ;;  %v1217_v30 = vld [vmem:[#allocation2_spill] sm:$0xff] }
  0x46   : > { %608 = vst [vmem:[%s848_s25 + $0x120] sm:$0xff] %v544_v9  ;;  %v483_v13 = vmul.f32 0.2, %v355_v62  ;;  %v545_v24 = vsel %vm417_vm5, %v353_v33, %v481_v10  ;;  %v356_v15 = vadd.f32 %v767_v1, %v285_v36  ;;  %v286_v38 = vmul.f32 %v755_v0, %v914_v39 }
  0x47   : > { %v287_v53 = vmul.f32 %v755_v0, %v917_v41  ;;  %609 = vst [vmem:[%s848_s25 + $0x128] sm:$0xff] %v545_v24  ;;  %v546_v25 = vsel %vm418_vm6, %v354_v35, %v482_v23  ;;  %v288_v61 = vmul.f32 %v755_v0, %v920_v42  ;;  %v289_v63 = vmul.f32 %v755_v0, %v923_v43 }
  0x48   : > { %v547_v56 = vsel %vm419_vm7, %v355_v62, %v483_v13  ;;  %610 = vst [vmem:[%s848_s25 + $0x130] sm:$0xff] %v546_v25  ;;  %vm420_vm8 = vcmp.ge.f32.partialorder %v356_v15, 0.0  ;;  %v484_v16 = vmul.f32 0.2, %v356_v15  ;;  %v357_v26 = vadd.f32 %v767_v1, %v286_v38  ;;  %v1220_v62 = vld [vmem:[#allocation5_spill] sm:$0xff] }
  0x49   : > { %611 = vst [vmem:[%s848_s25 + $0x138] sm:$0xff] %v547_v56  ;;  %v358_v39 = vadd.f32 %v767_v1, %v287_v53  ;;  %v359_v41 = vadd.f32 %v767_v1, %v288_v61  ;;  %v360_v6 = vadd.f32 %v767_v1, %v289_v63  ;;  %v290_v42 = vmul.f32 %v755_v0, %v926_v45  ;;  %v1221_v56 = vld [vmem:[#allocation6_spill] sm:$0xff] }
  0x4a   : > { %v291_v27 = vmul.f32 %v755_v0, %v929_v46  ;;  %v548_v43 = vsel %vm420_vm8, %v356_v15, %v484_v16  ;;  %vm421_vm9 = vcmp.ge.f32.partialorder %v357_v26, 0.0  ;;  %v485_v17 = vmul.f32 0.2, %v357_v26 }
  0x4b   : > { %vm422_vm10 = vcmp.ge.f32.partialorder %v358_v39, 0.0  ;;  %612 = vst [vmem:[%s848_s25 + $0x140] sm:$0xff] %v548_v43  ;;  %v486_v18 = vmul.f32 0.2, %v358_v39  ;;  %vm423_vm11 = vcmp.ge.f32.partialorder %v359_v41, 0.0  ;;  %vm424_vm12 = vcmp.ge.f32.partialorder %v360_v6, 0.0 }
  0x4c   : > { %v487_v2 = vmul.f32 0.2, %v359_v41  ;;  %v549_v3 = vsel %vm421_vm9, %v357_v26, %v485_v17  ;;  %v488_v19 = vmul.f32 0.2, %v360_v6  ;;  %v361_v20 = vadd.f32 %v767_v1, %v290_v42  ;;  %v1222_v42 = vld [vmem:[#allocation7_spill] sm:$0xff] }
  0x4d   : > { %v362_v45 = vadd.f32 %v767_v1, %v291_v27  ;;  %613 = vst [vmem:[%s848_s25 + $0x148] sm:$0xff] %v549_v3  ;;  %v550_v46 = vsel %vm422_vm10, %v358_v39, %v486_v18  ;;  %v292_v28 = vmul.f32 %v755_v0, %v932_v47  ;;  %v293_v29 = vmul.f32 %v755_v0, %v935_v49  ;;  %v1223_v18 = vld [vmem:[#allocation8_spill] sm:$0xff] }
  0x4e   : > { %v551_v4 = vsel %vm423_vm11, %v359_v41, %v487_v2  ;;  %614 = vst [vmem:[%s848_s25 + $0x150] sm:$0xff] %v550_v46  ;;  %v552_v7 = vsel %vm424_vm12, %v360_v6, %v488_v19  ;;  %vm425_vm13 = vcmp.ge.f32.partialorder %v361_v20, 0.0  ;;  %v489_v14 = vmul.f32 0.2, %v361_v20 }
  0x4f   : > { %615 = vst [vmem:[%s848_s25 + $0x158] sm:$0xff] %v551_v4  ;;  %vm426_vm14 = vcmp.ge.f32.partialorder %v362_v45, 0.0  ;;  %616 = vst [vmem:[%s848_s25 + $0x160] sm:$0xff] %v552_v7  ;;  %v490_v8 = vmul.f32 0.2, %v362_v45  ;;  %v363_v21 = vadd.f32 %v767_v1, %v292_v28  ;;  %v364_v22 = vadd.f32 %v767_v1, %v293_v29 }
  0x50   : > { %v294_v47 = vmul.f32 %v755_v0, %v938_v50  ;;  %v553_v34 = vsel %vm425_vm13, %v361_v20, %v489_v14  ;;  %v295_v49 = vmul.f32 %v755_v0, %v941_v52  ;;  %v296_v37 = vmul.f32 %v755_v0, %v1217_v30 }
  0x51   : > { %v297_v32 = vmul.f32 %v755_v0, %v1218_v31  ;;  %617 = vst [vmem:[%s848_s25 + $0x168] sm:$0xff] %v553_v34  ;;  %v554_v40 = vsel %vm426_vm14, %v362_v45, %v490_v8  ;;  %vm427_vm15 = vcmp.ge.f32.partialorder %v363_v21, 0.0  ;;  %v491_v44 = vmul.f32 0.2, %v363_v21 }
  0x52   : > { %vm428_vm0 = vcmp.ge.f32.partialorder %v364_v22, 0.0  ;;  %618 = vst [vmem:[%s848_s25 + $0x170] sm:$0xff] %v554_v40  ;;  %v492_v48 = vmul.f32 0.2, %v364_v22  ;;  %v365_v50 = vadd.f32 %v767_v1, %v294_v47  ;;  %v366_v51 = vadd.f32 %v767_v1, %v295_v49 }
  0x53   : > { %v367_v52 = vadd.f32 %v767_v1, %v296_v37  ;;  %v555_v54 = vsel %vm427_vm15, %v363_v21, %v491_v44  ;;  %v368_v33 = vadd.f32 %v767_v1, %v297_v32  ;;  %v298_v35 = vmul.f32 %v755_v0, %v1219_v58 }
  0x54   : > { %v299_v36 = vmul.f32 %v755_v0, %v1220_v62  ;;  %619 = vst [vmem:[%s848_s25 + $0x178] sm:$0xff] %v555_v54  ;;  %v556_v5 = vsel %vm428_vm0, %v364_v22, %v492_v48  ;;  %vm429_vm1 = vcmp.ge.f32.partialorder %v365_v50, 0.0  ;;  %v493_v9 = vmul.f32 0.2, %v365_v50 }
  0x55   : > { %vm430_vm2 = vcmp.ge.f32.partialorder %v366_v51, 0.0  ;;  %620 = vst [vmem:[%s848_s25 + $0x180] sm:$0xff] %v556_v5  ;;  %v494_v10 = vmul.f32 0.2, %v366_v51  ;;  %vm431_vm3 = vcmp.ge.f32.partialorder %v367_v52, 0.0  ;;  %vm432_vm4 = vcmp.ge.f32.partialorder %v368_v33, 0.0 }
  0x56   : > { %v495_v23 = vmul.f32 0.2, %v367_v52  ;;  %v557_v13 = vsel %vm429_vm1, %v365_v50, %v493_v9  ;;  %v496_v24 = vmul.f32 0.2, %v368_v33  ;;  %v369_v15 = vadd.f32 %v767_v1, %v298_v35 }
  0x57   : > { %v370_v38 = vadd.f32 %v767_v1, %v299_v36  ;;  %621 = vst [vmem:[%s848_s25 + $0x188] sm:$0xff] %v557_v13  ;;  %v558_v53 = vsel %vm430_vm2, %v366_v51, %v494_v10  ;;  %v300_v61 = vmul.f32 %v755_v0, %v1221_v56  ;;  %v301_v63 = vmul.f32 %v755_v0, %v959_v60 }
  0x58   : > { %v559_v25 = vsel %vm431_vm3, %v367_v52, %v495_v23  ;;  %622 = vst [vmem:[%s848_s25 + $0x190] sm:$0xff] %v558_v53  ;;  %v560_v16 = vsel %vm432_vm4, %v368_v33, %v496_v24  ;;  %vm433_vm5 = vcmp.ge.f32.partialorder %v369_v15, 0.0  ;;  %v497_v26 = vmul.f32 0.2, %v369_v15 }
  0x59   : > { %623 = vst [vmem:[%s848_s25 + $0x198] sm:$0xff] %v559_v25  ;;  %vm434_vm6 = vcmp.ge.f32.partialorder %v370_v38, 0.0  ;;  %624 = vst [vmem:[%s848_s25 + $0x1a0] sm:$0xff] %v560_v16  ;;  %v498_v39 = vmul.f32 0.2, %v370_v38  ;;  %v371_v41 = vadd.f32 %v767_v1, %v300_v61  ;;  %v372_v6 = vadd.f32 %v767_v1, %v301_v63 }
  0x5a   : > { %v302_v27 = vmul.f32 %v755_v0, %v1222_v42  ;;  %v561_v43 = vsel %vm433_vm5, %v369_v15, %v497_v26  ;;  %v303_v60 = vmul.f32 %v755_v0, %v969_v55  ;;  %v304_v17 = vmul.f32 %v755_v0, %v972_v57 }
  0x5b   : > { %v305_v2 = vmul.f32 %v755_v0, %v1223_v18  ;;  %625 = vst [vmem:[%s848_s25 + $0x1a8] sm:$0xff] %v561_v43  ;;  %v562_v3 = vsel %vm434_vm6, %v370_v38, %v498_v39  ;;  %vm435_vm7 = vcmp.ge.f32.partialorder %v371_v41, 0.0  ;;  %v499_v19 = vmul.f32 0.2, %v371_v41 }
  0x5c   : > { %vm436_vm8 = vcmp.ge.f32.partialorder %v372_v6, 0.0  ;;  %626 = vst [vmem:[%s848_s25 + $0x1b0] sm:$0xff] %v562_v3  ;;  %v500_v20 = vmul.f32 0.2, %v372_v6  ;;  %v373_v45 = vadd.f32 %v767_v1, %v302_v27  ;;  %v374_v46 = vadd.f32 %v767_v1, %v303_v60 }
  0x5d   : > { %v375_v55 = vadd.f32 %v767_v1, %v304_v17  ;;  %v563_v4 = vsel %vm435_vm7, %v371_v41, %v499_v19  ;;  %v376_v57 = vadd.f32 %v767_v1, %v305_v2  ;;  %v306_v28 = vmul.f32 %v755_v0, %v982_v11 }
  0x5e   : > { %v307_v29 = vmul.f32 %v755_v0, %v985_v12  ;;  %627 = vst [vmem:[%s848_s25 + $0x1b8] sm:$0xff] %v563_v4  ;;  %v564_v7 = vsel %vm436_vm8, %v372_v6, %v500_v20  ;;  %vm437_vm9 = vcmp.ge.f32.partialorder %v373_v45, 0.0  ;;  %v501_v14 = vmul.f32 0.2, %v373_v45 }
  0x5f   : > { %vm438_vm10 = vcmp.ge.f32.partialorder %v374_v46, 0.0  ;;  %628 = vst [vmem:[%s848_s25 + $0x1c0] sm:$0xff] %v564_v7  ;;  %v502_v8 = vmul.f32 0.2, %v374_v46  ;;  %vm439_vm11 = vcmp.ge.f32.partialorder %v375_v55, 0.0  ;;  %vm440_vm12 = vcmp.ge.f32.partialorder %v376_v57, 0.0 }
  0x60   : > { %v503_v21 = vmul.f32 0.2, %v375_v55  ;;  %v565_v22 = vsel %vm437_vm9, %v373_v45, %v501_v14  ;;  %v504_v47 = vmul.f32 0.2, %v376_v57  ;;  %v377_v11 = vadd.f32 %v767_v1, %v306_v28 }
  0x61   : > { %v378_v12 = vadd.f32 %v767_v1, %v307_v29  ;;  %629 = vst [vmem:[%s848_s25 + $0x1c8] sm:$0xff] %v565_v22  ;;  %v566_v34 = vsel %vm438_vm10, %v374_v46, %v502_v8  ;;  %v308_v30 = vmul.f32 %v755_v0, %v988_v59 }
  0x62   : > { %v567_v49 = vsel %vm439_vm11, %v375_v55, %v503_v21  ;;  %630 = vst [vmem:[%s848_s25 + $0x1d0] sm:$0xff] %v566_v34  ;;  %v568_v37 = vsel %vm440_vm12, %v376_v57, %v504_v47  ;;  %vm441_vm13 = vcmp.ge.f32.partialorder %v377_v11, 0.0  ;;  %v505_v31 = vmul.f32 0.2, %v377_v11 }
  0x63   : > { %631 = vst [vmem:[%s848_s25 + $0x1d8] sm:$0xff] %v567_v49  ;;  %vm442_vm14 = vcmp.ge.f32.partialorder %v378_v12, 0.0  ;;  %632 = vst [vmem:[%s848_s25 + $0x1e0] sm:$0xff] %v568_v37  ;;  %v506_v32 = vmul.f32 0.2, %v378_v12  ;;  %v379_v40 = vadd.f32 %v767_v1, %v308_v30 }
  0x64   : > { %v569_v44 = vsel %vm441_vm13, %v377_v11, %v505_v31 }
  0x65   : > { %633 = vst [vmem:[%s848_s25 + $0x1e8] sm:$0xff] %v569_v44  ;;  %v570_v48 = vsel %vm442_vm14, %v378_v12, %v506_v32  ;;  %vm443_vm15 = vcmp.ge.f32.partialorder %v379_v40, 0.0  ;;  %v507_v50 = vmul.f32 0.2, %v379_v40 }
  0x66   : > { %634 = vst [vmem:[%s848_s25 + $0x1f0] sm:$0xff] %v570_v48 }
  0x67   : > { %v571_v51 = vsel %vm443_vm15, %v379_v40, %v507_v50 }
  0x68   : > { %635 = vst [vmem:[%s848_s25 + $0x1f8] sm:$0xff] %v571_v51 }
  0x69 PF: > { %s13_s12 = sadd.s32 1, %s719_s12  }
  0x6a   : > { %p10_p4 = scmp.ge.s32.totalorder %s13_s12, 5  }
  0x6c   :  { %12 = sbr.rel (!%p10_p4) target bundleno = 1 (0x1), region = 62 }

// kernel: discriminador_condicional_forward.7
= control target key start
LH: loop header
LB: loop body
LE: loop exit
PB: predicated region body
PF: predicated region fallthrough
CT: control target
= control target key end

     0   :  { %s1447_s15 = smov 0   ;;  %s1872_s0 = inlined_call_operand.vmem [shape: bf16[1536,16], index: 0, kind: input, shape index: {}]   ;;  %s1873_s1 = inlined_call_operand.vmem [shape: bf16[16,128], index: 1, kind: input, shape index: {}]   ;;  %s1874_s2 = inlined_call_operand.vmem [shape: f32[1,128], index: 2, kind: input, shape index: {}]   ;;  %s1875_s3 = inlined_call_operand.vmem [shape: f32[1536,128], index: 3, kind: output, shape index: {0}]   ;;  %s1876_s4 = inlined_call_operand.vmem [shape: f32[3,2,128], index: 4, kind: output, shape index: {1}]  }
   0x1 LB: > { %s1453_s16 = sadd.s32 4294967295, %s1420_s15   ;;  %p1198_p0 = scmp.ge.s32.totalorder %s1420_s15, 1  ;;  %s1420_s15 = sphi %s1447_s15, %s15_s15  }
   0x2   : > { %p166_p1 = scmp.lt.s32.totalorder %s1420_s15, 4 }
   0x4   : > { %p167_p2 = pnand %p1198_p0, %p166_p1 }
   0x5   : > { %v1381_v0 = vld [vmem:[%s1873_s1] sm:$0xff] (!%p167_p2)   ;;  %s1199_s19 = sshll.u32 (!%p167_p2), %s1453_s16, 6  ;;  %vm452_vm0 = vcmask (!%p167_p2), 130048   ;;  %p208_p4 = scmp.lt.s32.totalorder (!%p167_p2), %s1453_s16, 2  ;;  %vm1104_vm1 = vcmask (!%p167_p2), 1040384  }
   0x6   : > { %170 = sbr.rel (%p167_p2) target bundleno = 377 (0x179), region = 32  ;;  %p197_p3 = scmp.lt.s32.totalorder (!%p167_p2), %s1199_s19, 191  ;;  %1305 = vmatprep.subr.bf16.mxu0 (!%p167_p2), %v1381_v0  ;;  %1371 = vmatprep.subr.bf16.mxu1 (!%p167_p2), %v1381_v0  ;;  %v1537_v33 = vld [vmem:[%s1874_s2] ss:$0 sm:$0xff] (!%p167_p2) }
   0x7   : > { %1306 = vmatpush3.bf16.msra.mxu0 (!%p167_p2), %v1381_v0  ;;  %1372 = vmatpush3.bf16.msra.mxu1 (!%p167_p2), %v1381_v0 }
   0xd   : > { %s1878_s19 = smov (!%p197_p3, %s1199_s19), 191  ;;  %s1880_s16 = smov (!%p208_p4, %s1453_s16), 2 }
   0xe   : > { %s1200_s20 = sshll.u32 %s1878_s19, 2  ;;  %s1202_s24 = sshll.u32 %s1878_s19, 3 }
   0xf   : > { %s1467_s23 = scalar_lea.vmem %s1872_s0, %s1200_s20  ;;  %s1542_s29 = scalar_lea.vmem %s1875_s3, %s1202_s24 }
  0x10   : > { %v1382_v1 = vld [vmem:[%s1467_s23] sm:$0xff]   ;;  %v1383_v2 = vld [vmem:[%s1467_s23 + $0x8] sm:$0xff]   ;;  %v1384_v3 = vld [vmem:[%s1467_s23 + $0x10] sm:$0xff]   ;;  %s1203_s30 = sshll.u32 %s1880_s16, 1 }
  0x11   : > { %1307 = vmatprep.mubr.msk.bf16.mxu0 %vm452_vm0, %v1382_v1  ;;  %v1385_v4 = vld [vmem:[%s1467_s23 + $0x18] sm:$0xff]   ;;  %v1386_v5 = vld [vmem:[%s1467_s23 + $0x20] sm:$0xff]   ;;  %v1387_v6 = vld [vmem:[%s1467_s23 + $0x28] sm:$0xff]   ;;  %s211_s7 = scalar_lea.vmem %s1876_s4, %s1203_s30 }
  0x12   : > { %1308 = vmatmul.mubr.msk.bf16.vlgmr.msra.gmra.mrb[0].mxu0 %vm452_vm0, %v1383_v2  ;;  %v1388_v7 = vld [vmem:[%s1467_s23 + $0x30] sm:$0xff]   ;;  %v1398_v8 = vld [vmem:[%s1467_s23 + $0x80] sm:$0xff]   ;;  %v1399_v9 = vld [vmem:[%s1467_s23 + $0x88] sm:$0xff]  }
  0x13   : > { %1311 = vmatprep.mubr.msk.bf16.mxu0 %vm452_vm0, %v1384_v3  ;;  %1339 = vmatprep.mubr.msk.bf16.mxu1 %vm452_vm0, %v1398_v8  ;;  %v1400_v10 = vld [vmem:[%s1467_s23 + $0x90] sm:$0xff]   ;;  %v1389_v11 = vld [vmem:[%s1467_s23 + $0x38] sm:$0xff]   ;;  %v1390_v12 = vld [vmem:[%s1467_s23 + $0x40] sm:$0xff]  }
  0x14   : > { %1340 = vmatmul.mubr.msk.bf16.vlgmr.msra.gmra.mrb[0].mxu1 %vm452_vm0, %v1399_v9  ;;  %v1401_v13 = vld [vmem:[%s1467_s23 + $0x98] sm:$0xff]   ;;  %v1402_v14 = vld [vmem:[%s1467_s23 + $0xa0] sm:$0xff]   ;;  %v1391_v15 = vld [vmem:[%s1467_s23 + $0x48] sm:$0xff]  }
  0x15   : > { %1343 = vmatprep.mubr.msk.bf16.mxu1 %vm452_vm0, %v1400_v10  ;;  %v1403_v16 = vld [vmem:[%s1467_s23 + $0xa8] sm:$0xff]   ;;  %v1392_v17 = vld [vmem:[%s1467_s23 + $0x50] sm:$0xff]   ;;  %v1393_v19 = vld [vmem:[%s1467_s23 + $0x58] sm:$0xff]  }
  0x16   : > { %v1404_v18 = vld [vmem:[%s1467_s23 + $0xb0] sm:$0xff]   ;;  %v1405_v20 = vld [vmem:[%s1467_s23 + $0xb8] sm:$0xff]   ;;  %v1394_v21 = vld [vmem:[%s1467_s23 + $0x60] sm:$0xff]  }
  0x17   : > { %v1406_v22 = vld [vmem:[%s1467_s23 + $0xc0] sm:$0xff]   ;;  %v1395_v23 = vld [vmem:[%s1467_s23 + $0x68] sm:$0xff]   ;;  %v1396_v25 = vld [vmem:[%s1467_s23 + $0x70] sm:$0xff]  }
  0x18   : > { %v1407_v24 = vld [vmem:[%s1467_s23 + $0xc8] sm:$0xff]   ;;  %v1408_v26 = vld [vmem:[%s1467_s23 + $0xd0] sm:$0xff]   ;;  %v1397_v27 = vld [vmem:[%s1467_s23 + $0x78] sm:$0xff]  }
  0x19   : > { %v1409_v28 = vld [vmem:[%s1467_s23 + $0xd8] sm:$0xff]   ;;  %v1410_v29 = vld [vmem:[%s1467_s23 + $0xe0] sm:$0xff]   ;;  %v1411_v30 = vld [vmem:[%s1467_s23 + $0xe8] sm:$0xff]  }
  0x1a   : > { %1312 = vmatmul.mubr.msk.bf16.gmra.mrb[4].mxu0 %vm452_vm0, %v1385_v4  ;;  %v1412_v31 = vld [vmem:[%s1467_s23 + $0xf0] sm:$0xff]   ;;  %v1413_v32 = vld [vmem:[%s1467_s23 + $0xf8] sm:$0xff]  }
  0x1b   : > { %1315 = vmatprep.mubr.msk.bf16.mxu0 %vm452_vm0, %v1386_v5 }
  0x1c   : > { %1344 = vmatmul.mubr.msk.bf16.gmra.mrb[4].mxu1 %vm452_vm0, %v1401_v13 }
  0x1d   : > { %1347 = vmatprep.mubr.msk.bf16.mxu1 %vm452_vm0, %v1402_v14 }
  0x22   : > { %1316 = vmatmul.mubr.msk.bf16.gmra.mrb[8].mxu0 %vm452_vm0, %v1387_v6 }
  0x23   : > { %1319 = vmatprep.mubr.msk.bf16.mxu0 %vm452_vm0, %v1388_v7 }
  0x24   : > { %1348 = vmatmul.mubr.msk.bf16.gmra.mrb[8].mxu1 %vm452_vm0, %v1403_v16 }
  0x25   : > { %1351 = vmatprep.mubr.msk.bf16.mxu1 %vm452_vm0, %v1404_v18 }
  0x2a   : > { %1320 = vmatmul.mubr.msk.bf16.gmra.mrb[12].mxu0 %vm452_vm0, %v1389_v11 }
  0x2b   : > { %1323 = vmatprep.mubr.msk.bf16.mxu0 %vm452_vm0, %v1390_v12 }
  0x2c   : > { %1352 = vmatmul.mubr.msk.bf16.gmra.mrb[12].mxu1 %vm452_vm0, %v1405_v20 }
  0x2d   : > { %1355 = vmatprep.mubr.msk.bf16.mxu1 %vm452_vm0, %v1406_v22 }
  0x32   : > { %1324 = vmatmul.mubr.msk.bf16.gmra.mrb[16].mxu0 %vm452_vm0, %v1391_v15 }
  0x33   : > { %1327 = vmatprep.mubr.msk.bf16.mxu0 %vm452_vm0, %v1392_v17 }
  0x34   : > { %1356 = vmatmul.mubr.msk.bf16.gmra.mrb[16].mxu1 %vm452_vm0, %v1407_v24 }
  0x35   : > { %1359 = vmatprep.mubr.msk.bf16.mxu1 %vm452_vm0, %v1408_v26 }
  0x3a   : > { %1328 = vmatmul.mubr.msk.bf16.gmra.mrb[20].mxu0 %vm452_vm0, %v1393_v19 }
  0x3b   : > { %1331 = vmatprep.mubr.msk.bf16.mxu0 %vm452_vm0, %v1394_v21 }
  0x3c   : > { %1360 = vmatmul.mubr.msk.bf16.gmra.mrb[20].mxu1 %vm452_vm0, %v1409_v28 }
  0x3d   : > { %1363 = vmatprep.mubr.msk.bf16.mxu1 %vm452_vm0, %v1410_v29 }
  0x42   : > { %1332 = vmatmul.mubr.msk.bf16.gmra.mrb[24].mxu0 %vm452_vm0, %v1395_v23 }
  0x43   : > { %1335 = vmatprep.mubr.msk.bf16.mxu0 %vm452_vm0, %v1396_v25 }
  0x44   : > { %1364 = vmatmul.mubr.msk.bf16.gmra.mrb[24].mxu1 %vm452_vm0, %v1411_v30 }
  0x45   : > { %1367 = vmatprep.mubr.msk.bf16.mxu1 %vm452_vm0, %v1412_v31 }
  0x4a   : > { %1336 = vmatmul.mubr.msk.bf16.gmra.mrb[28].mxu0 %vm452_vm0, %v1397_v27 }
  0x4c   : > { %1368 = vmatmul.mubr.msk.bf16.gmra.mrb[28].mxu1 %vm452_vm0, %v1413_v32 }
  0xe5   : > { %v1309_v34 = vpop.f32.mrb[0].mxu0 }
  0xe6   : > { %v592_v35 = vadd.f32 %v1309_v34, %v1537_v33  ;;  %v583_v36 = vpop.f32.mrb[1].mxu0 }
  0xe7   : > { %v584_v37 = vadd.f32 %v1537_v33, %v583_v36  ;;  %v1310_v38 = vpop.f32.mrb[2].mxu0  ;;  %v1341_v5 = vpop.f32.mrb[0].mxu1 }
  0xe8   : > { %840 = vst [vmem:[%s1542_s29 + $0x10] sm:$0xff] %v592_v35  ;;  %v595_v39 = vadd.f32 %v1310_v38, %v1537_v33  ;;  %v586_v40 = vpop.f32.mrb[3].mxu0  ;;  %v973_v45 = vmul.f32 %v592_v35, %v592_v35  ;;  %v1562_v9 = vadd.f32 %v1341_v5, %v1537_v33  ;;  %v711_v10 = vpop.f32.mrb[1].mxu1 }
  0xe9   : > { %838 = vst [vmem:[%s1542_s29] sm:$0xff] %v584_v37  ;;  %v587_v41 = vadd.f32 %v1537_v33, %v586_v40  ;;  %v971_v42 = vmul.f32 %v584_v37, %v584_v37  ;;  %v1566_v15 = vadd.f32 %v1537_v33, %v711_v10  ;;  %v1342_v16 = vpop.f32.mrb[2].mxu1 }
  0xea   : > { %841 = vst [vmem:[%s1542_s29 + $0x18] sm:$0xff] %v595_v39  ;;  %v974_v51 = vmul.f32 %v595_v39, %v595_v39  ;;  %872 = vst [vmem:[%s1542_s29 + $0x110] sm:$0xff] %v1562_v9  ;;  %v1573_v19 = vadd.f32 %v1342_v16, %v1537_v33  ;;  %v714_v20 = vpop.f32.mrb[3].mxu1 }
  0xeb   : > { %839 = vst [vmem:[%s1542_s29 + $0x8] sm:$0xff] %v587_v41  ;;  %v902_v43 = vadd.f32 %v587_v41, %v584_v37  ;;  %v972_v44 = vmul.f32 %v587_v41, %v587_v41  ;;  %870 = vst [vmem:[%s1542_s29 + $0x100] sm:$0xff] %v1566_v15  ;;  %v1583_v25 = vadd.f32 %v1537_v33, %v714_v20 }
  0xec   : > { %873 = vst [vmem:[%s1542_s29 + $0x118] sm:$0xff] %v1573_v19 }
  0xed   : > { %v903_v46 = vadd.f32 %v902_v43, %v592_v35  ;;  %v1035_v47 = vadd.f32 %v972_v44, %v971_v42  ;;  %v1313_v48 = vpop.f32.mrb[4].mxu0  ;;  %871 = vst [vmem:[%s1542_s29 + $0x108] sm:$0xff] %v1583_v25 }
  0xee   : > { %v608_v49 = vadd.f32 %v1313_v48, %v1537_v33  ;;  %v599_v50 = vpop.f32.mrb[5].mxu0 }
  0xef   : > { %v1036_v52 = vadd.f32 %v1035_v47, %v973_v45  ;;  %v600_v53 = vadd.f32 %v1537_v33, %v599_v50  ;;  %v904_v54 = vadd.f32 %v903_v46, %v595_v39  ;;  %v1314_v55 = vpop.f32.mrb[6].mxu0  ;;  %v1345_v34 = vpop.f32.mrb[4].mxu1 }
  0xf0   : > { %844 = vst [vmem:[%s1542_s29 + $0x30] sm:$0xff] %v608_v49  ;;  %v611_v56 = vadd.f32 %v1314_v55, %v1537_v33  ;;  %v602_v57 = vpop.f32.mrb[7].mxu0  ;;  %v977_v1 = vmul.f32 %v608_v49, %v608_v49  ;;  %v1590_v38 = vadd.f32 %v1345_v34, %v1537_v33  ;;  %v727_v39 = vpop.f32.mrb[5].mxu1 }
  0xf1   : > { %842 = vst [vmem:[%s1542_s29 + $0x20] sm:$0xff] %v600_v53  ;;  %v905_v58 = vadd.f32 %v904_v54, %v600_v53  ;;  %v975_v59 = vmul.f32 %v600_v53, %v600_v53  ;;  %v1037_v60 = vadd.f32 %v1036_v52, %v974_v51  ;;  %v603_v61 = vadd.f32 %v1537_v33, %v602_v57  ;;  %v1346_v45 = vpop.f32.mrb[6].mxu1 }
  0xf2   : > { %845 = vst [vmem:[%s1542_s29 + $0x38] sm:$0xff] %v611_v56  ;;  %v978_v6 = vmul.f32 %v611_v56, %v611_v56  ;;  %v1594_v44 = vadd.f32 %v1537_v33, %v727_v39  ;;  %876 = vst [vmem:[%s1542_s29 + $0x130] sm:$0xff] %v1590_v38  ;;  %v1601_v48 = vadd.f32 %v1346_v45, %v1537_v33 }
  0xf3   : > { %v1038_v62 = vadd.f32 %v1037_v60, %v975_v59  ;;  %843 = vst [vmem:[%s1542_s29 + $0x28] sm:$0xff] %v603_v61  ;;  %v906_v63 = vadd.f32 %v905_v58, %v603_v61  ;;  %v976_v0 = vmul.f32 %v603_v61, %v603_v61 }
  0xf4   : > { %874 = vst [vmem:[%s1542_s29 + $0x120] sm:$0xff] %v1594_v44  ;;  %877 = vst [vmem:[%s1542_s29 + $0x138] sm:$0xff] %v1601_v48 }
  0xf5   : > { %v907_v2 = vadd.f32 %v906_v63, %v608_v49  ;;  %v1039_v3 = vadd.f32 %v1038_v62, %v976_v0  ;;  %v1317_v4 = vpop.f32.mrb[8].mxu0  ;;  %v730_v49 = vpop.f32.mrb[7].mxu1 }
  0xf6   : > { %v624_v7 = vadd.f32 %v1317_v4, %v1537_v33  ;;  %v615_v8 = vpop.f32.mrb[9].mxu0  ;;  %v1611_v54 = vadd.f32 %v1537_v33, %v730_v49 }
  0xf7   : > { %v1040_v11 = vadd.f32 %v1039_v3, %v977_v1  ;;  %v616_v12 = vadd.f32 %v1537_v33, %v615_v8  ;;  %v908_v13 = vadd.f32 %v907_v2, %v611_v56  ;;  %v1318_v14 = vpop.f32.mrb[10].mxu0  ;;  %v1349_v62 = vpop.f32.mrb[8].mxu1 }
  0xf8   : > { %848 = vst [vmem:[%s1542_s29 + $0x50] sm:$0xff] %v624_v7  ;;  %v627_v17 = vadd.f32 %v1318_v14, %v1537_v33  ;;  %v618_v18 = vpop.f32.mrb[11].mxu0  ;;  %v981_v29 = vmul.f32 %v624_v7, %v624_v7  ;;  %875 = vst [vmem:[%s1542_s29 + $0x128] sm:$0xff] %v1611_v54  ;;  %v1618_v2 = vadd.f32 %v1349_v62, %v1537_v33  ;;  %v743_v3 = vpop.f32.mrb[9].mxu1 }
  0xf9   : > { %846 = vst [vmem:[%s1542_s29 + $0x40] sm:$0xff] %v616_v12  ;;  %v909_v21 = vadd.f32 %v908_v13, %v616_v12  ;;  %v979_v22 = vmul.f32 %v616_v12, %v616_v12  ;;  %v1041_v23 = vadd.f32 %v1040_v11, %v978_v6  ;;  %v619_v24 = vadd.f32 %v1537_v33, %v618_v18  ;;  %v1350_v10 = vpop.f32.mrb[10].mxu1 }
  0xfa   : > { %849 = vst [vmem:[%s1542_s29 + $0x58] sm:$0xff] %v627_v17  ;;  %v982_v35 = vmul.f32 %v627_v17, %v627_v17  ;;  %v1622_v8 = vadd.f32 %v1537_v33, %v743_v3  ;;  %880 = vst [vmem:[%s1542_s29 + $0x150] sm:$0xff] %v1618_v2  ;;  %v1629_v13 = vadd.f32 %v1350_v10, %v1537_v33  ;;  %v746_v14 = vpop.f32.mrb[11].mxu1 }
  0xfb   : > { %v1042_v26 = vadd.f32 %v1041_v23, %v979_v22  ;;  %847 = vst [vmem:[%s1542_s29 + $0x48] sm:$0xff] %v619_v24  ;;  %v910_v27 = vadd.f32 %v909_v21, %v619_v24  ;;  %v980_v28 = vmul.f32 %v619_v24, %v619_v24  ;;  %v1639_v21 = vadd.f32 %v1537_v33, %v746_v14 }
  0xfc   : > { %878 = vst [vmem:[%s1542_s29 + $0x140] sm:$0xff] %v1622_v8  ;;  %881 = vst [vmem:[%s1542_s29 + $0x158] sm:$0xff] %v1629_v13 }
  0xfd   : > { %v911_v30 = vadd.f32 %v910_v27, %v624_v7  ;;  %v1043_v31 = vadd.f32 %v1042_v26, %v980_v28  ;;  %v1321_v32 = vpop.f32.mrb[12].mxu0  ;;  %879 = vst [vmem:[%s1542_s29 + $0x148] sm:$0xff] %v1639_v21 }
  0xfe   : > { %v640_v36 = vadd.f32 %v1321_v32, %v1537_v33  ;;  %v631_v37 = vpop.f32.mrb[13].mxu0 }
  0xff   : > { %v1044_v40 = vadd.f32 %v1043_v31, %v981_v29  ;;  %v632_v41 = vadd.f32 %v1537_v33, %v631_v37  ;;  %v912_v42 = vadd.f32 %v911_v30, %v627_v17  ;;  %v1322_v43 = vpop.f32.mrb[14].mxu0  ;;  %v1353_v30 = vpop.f32.mrb[12].mxu1 }
 0x100   : > { %852 = vst [vmem:[%s1542_s29 + $0x70] sm:$0xff] %v640_v36  ;;  %v643_v46 = vadd.f32 %v1322_v43, %v1537_v33  ;;  %v634_v47 = vpop.f32.mrb[15].mxu0  ;;  %v985_v58 = vmul.f32 %v640_v36, %v640_v36 }
 0x101   : > { %850 = vst [vmem:[%s1542_s29 + $0x60] sm:$0xff] %v632_v41  ;;  %v913_v50 = vadd.f32 %v912_v42, %v632_v41  ;;  %v983_v51 = vmul.f32 %v632_v41, %v632_v41  ;;  %v1045_v52 = vadd.f32 %v1044_v40, %v982_v35  ;;  %v635_v53 = vadd.f32 %v1537_v33, %v634_v47 }
 0x102   : > { %853 = vst [vmem:[%s1542_s29 + $0x78] sm:$0xff] %v643_v46  ;;  %v986_v63 = vmul.f32 %v643_v46, %v643_v46  ;;  %v1646_v35 = vadd.f32 %v1353_v30, %v1537_v33 }
 0x103   : > { %v1046_v55 = vadd.f32 %v1045_v52, %v983_v51  ;;  %851 = vst [vmem:[%s1542_s29 + $0x68] sm:$0xff] %v635_v53  ;;  %v914_v56 = vadd.f32 %v913_v50, %v635_v53  ;;  %v984_v57 = vmul.f32 %v635_v53, %v635_v53 }
 0x104   : > { %884 = vst [vmem:[%s1542_s29 + $0x170] sm:$0xff] %v1646_v35 }
 0x105   : > { %v915_v59 = vadd.f32 %v914_v56, %v640_v36  ;;  %v1047_v60 = vadd.f32 %v1046_v55, %v984_v57  ;;  %v1325_v61 = vpop.f32.mrb[16].mxu0  ;;  %v759_v36 = vpop.f32.mrb[13].mxu1 }
 0x106   : > { %v656_v0 = vadd.f32 %v1325_v61, %v1537_v33  ;;  %v647_v1 = vpop.f32.mrb[17].mxu0  ;;  %v1650_v42 = vadd.f32 %v1537_v33, %v759_v36  ;;  %v1354_v43 = vpop.f32.mrb[14].mxu1 }
 0x107   : > { %v1048_v4 = vadd.f32 %v1047_v60, %v985_v58  ;;  %v648_v5 = vadd.f32 %v1537_v33, %v647_v1  ;;  %v916_v6 = vadd.f32 %v915_v59, %v643_v46  ;;  %v1326_v7 = vpop.f32.mrb[18].mxu0  ;;  %v1657_v47 = vadd.f32 %v1354_v43, %v1537_v33  ;;  %v762_v49 = vpop.f32.mrb[15].mxu1 }
 0x108   : > { %856 = vst [vmem:[%s1542_s29 + $0x90] sm:$0xff] %v656_v0  ;;  %v659_v11 = vadd.f32 %v1326_v7, %v1537_v33  ;;  %v650_v12 = vpop.f32.mrb[19].mxu0  ;;  %v989_v26 = vmul.f32 %v656_v0, %v656_v0  ;;  %882 = vst [vmem:[%s1542_s29 + $0x160] sm:$0xff] %v1650_v42  ;;  %v1667_v55 = vadd.f32 %v1537_v33, %v762_v49 }
 0x109   : > { %854 = vst [vmem:[%s1542_s29 + $0x80] sm:$0xff] %v648_v5  ;;  %v917_v16 = vadd.f32 %v916_v6, %v648_v5  ;;  %v987_v17 = vmul.f32 %v648_v5, %v648_v5  ;;  %v1049_v18 = vadd.f32 %v1048_v4, %v986_v63  ;;  %v651_v20 = vadd.f32 %v1537_v33, %v650_v12  ;;  %v1357_v63 = vpop.f32.mrb[16].mxu1 }
 0x10a   : > { %857 = vst [vmem:[%s1542_s29 + $0x98] sm:$0xff] %v659_v11  ;;  %v990_v31 = vmul.f32 %v659_v11, %v659_v11  ;;  %885 = vst [vmem:[%s1542_s29 + $0x178] sm:$0xff] %v1657_v47  ;;  %v1674_v4 = vadd.f32 %v1357_v63, %v1537_v33  ;;  %v775_v5 = vpop.f32.mrb[17].mxu1 }
 0x10b   : > { %v1050_v22 = vadd.f32 %v1049_v18, %v987_v17  ;;  %855 = vst [vmem:[%s1542_s29 + $0x88] sm:$0xff] %v651_v20  ;;  %v918_v23 = vadd.f32 %v917_v16, %v651_v20  ;;  %v988_v24 = vmul.f32 %v651_v20, %v651_v20  ;;  %883 = vst [vmem:[%s1542_s29 + $0x168] sm:$0xff] %v1667_v55  ;;  %v1358_v14 = vpop.f32.mrb[18].mxu1 }
 0x10c   : > { %v1678_v12 = vadd.f32 %v1537_v33, %v775_v5  ;;  %888 = vst [vmem:[%s1542_s29 + $0x190] sm:$0xff] %v1674_v4  ;;  %v1685_v18 = vadd.f32 %v1358_v14, %v1537_v33  ;;  %v778_v20 = vpop.f32.mrb[19].mxu1  ;;  %v1003_v14 = vmul.f32 %v1566_v15, %v1566_v15 }
 0x10d   : > { %v919_v27 = vadd.f32 %v918_v23, %v656_v0  ;;  %v1051_v28 = vadd.f32 %v1050_v22, %v988_v24  ;;  %v1329_v29 = vpop.f32.mrb[20].mxu0 }
 0x10e   : > { %v672_v32 = vadd.f32 %v1329_v29, %v1537_v33  ;;  %v663_v34 = vpop.f32.mrb[21].mxu0  ;;  %886 = vst [vmem:[%s1542_s29 + $0x180] sm:$0xff] %v1678_v12  ;;  %889 = vst [vmem:[%s1542_s29 + $0x198] sm:$0xff] %v1685_v18 }
 0x10f   : > { %v1052_v37 = vadd.f32 %v1051_v28, %v989_v26  ;;  %v664_v39 = vadd.f32 %v1537_v33, %v663_v34  ;;  %v920_v40 = vadd.f32 %v919_v27, %v659_v11  ;;  %v1330_v41 = vpop.f32.mrb[22].mxu0  ;;  %v1695_v27 = vadd.f32 %v1537_v33, %v778_v20 }
 0x110   : > { %860 = vst [vmem:[%s1542_s29 + $0xb0] sm:$0xff] %v672_v32  ;;  %v675_v45 = vadd.f32 %v1330_v41, %v1537_v33  ;;  %v666_v46 = vpop.f32.mrb[23].mxu0  ;;  %v993_v59 = vmul.f32 %v672_v32, %v672_v32 }
 0x111   : > { %858 = vst [vmem:[%s1542_s29 + $0xa0] sm:$0xff] %v664_v39  ;;  %v921_v50 = vadd.f32 %v920_v40, %v664_v39  ;;  %v991_v51 = vmul.f32 %v664_v39, %v664_v39  ;;  %v1053_v52 = vadd.f32 %v1052_v37, %v990_v31  ;;  %v667_v53 = vadd.f32 %v1537_v33, %v666_v46  ;;  %v1361_v37 = vpop.f32.mrb[20].mxu1 }
 0x112   : > { %861 = vst [vmem:[%s1542_s29 + $0xb8] sm:$0xff] %v675_v45  ;;  %v994_v0 = vmul.f32 %v675_v45, %v675_v45  ;;  %887 = vst [vmem:[%s1542_s29 + $0x188] sm:$0xff] %v1695_v27  ;;  %v1702_v43 = vadd.f32 %v1361_v37, %v1537_v33  ;;  %v1004_v37 = vmul.f32 %v1583_v25, %v1583_v25 }
 0x113   : > { %v1054_v56 = vadd.f32 %v1053_v52, %v991_v51  ;;  %859 = vst [vmem:[%s1542_s29 + $0xa8] sm:$0xff] %v667_v53  ;;  %v922_v57 = vadd.f32 %v921_v50, %v667_v53  ;;  %v992_v58 = vmul.f32 %v667_v53, %v667_v53 }
 0x114   : > { %892 = vst [vmem:[%s1542_s29 + $0x1b0] sm:$0xff] %v1702_v43 }
 0x115   : > { %v923_v60 = vadd.f32 %v922_v57, %v672_v32  ;;  %v1055_v61 = vadd.f32 %v1054_v56, %v992_v58  ;;  %v1333_v62 = vpop.f32.mrb[24].mxu0 }
 0x116   : > { %v688_v1 = vadd.f32 %v1333_v62, %v1537_v33  ;;  %v679_v3 = vpop.f32.mrb[25].mxu0 }
 0x117   : > { %v1056_v6 = vadd.f32 %v1055_v61, %v993_v59  ;;  %v680_v7 = vadd.f32 %v1537_v33, %v679_v3  ;;  %v924_v10 = vadd.f32 %v923_v60, %v675_v45  ;;  %v1334_v11 = vpop.f32.mrb[26].mxu0  ;;  %v791_v45 = vpop.f32.mrb[21].mxu1 }
 0x118   : > { %864 = vst [vmem:[%s1542_s29 + $0xd0] sm:$0xff] %v688_v1  ;;  %v691_v16 = vadd.f32 %v1334_v11, %v1537_v33  ;;  %v682_v17 = vpop.f32.mrb[27].mxu0  ;;  %v997_v31 = vmul.f32 %v688_v1, %v688_v1  ;;  %v1706_v52 = vadd.f32 %v1537_v33, %v791_v45  ;;  %v1362_v53 = vpop.f32.mrb[22].mxu1  ;;  %v1006_v45 = vmul.f32 %v1573_v19, %v1573_v19 }
 0x119   : > { %862 = vst [vmem:[%s1542_s29 + $0xc0] sm:$0xff] %v680_v7  ;;  %v925_v22 = vadd.f32 %v924_v10, %v680_v7  ;;  %v995_v23 = vmul.f32 %v680_v7, %v680_v7  ;;  %v1057_v24 = vadd.f32 %v1056_v6, %v994_v0  ;;  %v683_v26 = vadd.f32 %v1537_v33, %v682_v17  ;;  %v794_v59 = vpop.f32.mrb[23].mxu1 }
 0x11a   : > { %865 = vst [vmem:[%s1542_s29 + $0xd8] sm:$0xff] %v691_v16  ;;  %v998_v39 = vmul.f32 %v691_v16, %v691_v16  ;;  %v1713_v58 = vadd.f32 %v1362_v53, %v1537_v33  ;;  %890 = vst [vmem:[%s1542_s29 + $0x1a0] sm:$0xff] %v1706_v52  ;;  %v1723_v0 = vadd.f32 %v1537_v33, %v794_v59  ;;  %v1365_v11 = vpop.f32.mrb[24].mxu1 }
 0x11b   : > { %v1058_v28 = vadd.f32 %v1057_v24, %v995_v23  ;;  %863 = vst [vmem:[%s1542_s29 + $0xc8] sm:$0xff] %v683_v26  ;;  %v926_v29 = vadd.f32 %v925_v22, %v683_v26  ;;  %v996_v30 = vmul.f32 %v683_v26, %v683_v26  ;;  %v807_v17 = vpop.f32.mrb[25].mxu1 }
 0x11c   : > { %893 = vst [vmem:[%s1542_s29 + $0x1b8] sm:$0xff] %v1713_v58  ;;  %891 = vst [vmem:[%s1542_s29 + $0x1a8] sm:$0xff] %v1723_v0  ;;  %v1734_v24 = vadd.f32 %v1537_v33, %v807_v17  ;;  %v1366_v26 = vpop.f32.mrb[26].mxu1  ;;  %v1012_v17 = vmul.f32 %v1639_v21, %v1639_v21 }
 0x11d   : > { %v927_v32 = vadd.f32 %v926_v29, %v688_v1  ;;  %v1059_v34 = vadd.f32 %v1058_v28, %v996_v30  ;;  %v1337_v36 = vpop.f32.mrb[28].mxu0  ;;  %v1739_v28 = vadd.f32 %v1366_v26, %v1537_v33  ;;  %v810_v29 = vpop.f32.mrb[27].mxu1 }
 0x11e   : > { %v704_v40 = vadd.f32 %v1337_v36, %v1537_v33  ;;  %v695_v41 = vpop.f32.mrb[29].mxu0  ;;  %894 = vst [vmem:[%s1542_s29 + $0x1c0] sm:$0xff] %v1734_v24 }
 0x11f   : > { %v1060_v46 = vadd.f32 %v1059_v34, %v997_v31  ;;  %v696_v49 = vadd.f32 %v1537_v33, %v695_v41  ;;  %v928_v50 = vadd.f32 %v927_v32, %v691_v16  ;;  %v1338_v51 = vpop.f32.mrb[30].mxu0  ;;  %v1731_v16 = vadd.f32 %v1365_v11, %v1537_v33  ;;  %897 = vst [vmem:[%s1542_s29 + $0x1d8] sm:$0xff] %v1739_v28  ;;  %v1369_v41 = vpop.f32.mrb[28].mxu1 }
 0x120   : > { %868 = vst [vmem:[%s1542_s29 + $0xf0] sm:$0xff] %v704_v40  ;;  %v707_v56 = vadd.f32 %v1338_v51, %v1537_v33  ;;  %v698_v57 = vpop.f32.mrb[31].mxu0  ;;  %v1001_v6 = vmul.f32 %v704_v40, %v704_v40  ;;  %v1745_v32 = vadd.f32 %v1537_v33, %v810_v29  ;;  %v1007_v51 = vmul.f32 %v1594_v44, %v1594_v44 }
 0x121   : > { %866 = vst [vmem:[%s1542_s29 + $0xe0] sm:$0xff] %v696_v49  ;;  %v929_v60 = vadd.f32 %v928_v50, %v696_v49  ;;  %v999_v61 = vmul.f32 %v696_v49, %v696_v49  ;;  %v1061_v62 = vadd.f32 %v1060_v46, %v998_v39  ;;  %v699_v63 = vadd.f32 %v1537_v33, %v698_v57  ;;  %v823_v49 = vpop.f32.mrb[29].mxu1 }
 0x122   : > { %869 = vst [vmem:[%s1542_s29 + $0xf8] sm:$0xff] %v707_v56  ;;  %v1002_v20 = vmul.f32 %v707_v56, %v707_v56  ;;  %896 = vst [vmem:[%s1542_s29 + $0x1d0] sm:$0xff] %v1731_v16  ;;  %v1760_v46 = vadd.f32 %v1369_v41, %v1537_v33  ;;  %v1370_v53 = vpop.f32.mrb[30].mxu1 }
 0x123   : > { %v1062_v1 = vadd.f32 %v1061_v62, %v999_v61  ;;  %867 = vst [vmem:[%s1542_s29 + $0xe8] sm:$0xff] %v699_v63  ;;  %v930_v3 = vadd.f32 %v929_v60, %v699_v63  ;;  %v1000_v5 = vmul.f32 %v699_v63, %v699_v63  ;;  %895 = vst [vmem:[%s1542_s29 + $0x1c8] sm:$0xff] %v1745_v32  ;;  %v826_v57 = vpop.f32.mrb[31].mxu1 }
 0x124   : > { %900 = vst [vmem:[%s1542_s29 + $0x1f0] sm:$0xff] %v1760_v46  ;;  %v1008_v63 = vmul.f32 %v1611_v54, %v1611_v54 }
 0x125   : > { %v931_v7 = vadd.f32 %v930_v3, %v704_v40  ;;  %v1063_v10 = vadd.f32 %v1062_v1, %v1000_v5  ;;  %v1009_v1 = vmul.f32 %v1590_v38, %v1590_v38 }
 0x127   : > { %v1064_v22 = vadd.f32 %v1063_v10, %v1001_v6  ;;  %v932_v23 = vadd.f32 %v931_v7, %v707_v56  ;;  %v1771_v56 = vadd.f32 %v1370_v53, %v1537_v33  ;;  %v1011_v7 = vmul.f32 %v1622_v8, %v1622_v8 }
 0x129   : > { %v933_v30 = vadd.f32 %v932_v23, %v1566_v15  ;;  %v1065_v31 = vadd.f32 %v1064_v22, %v1002_v20  ;;  %v1005_v15 = vmul.f32 %v1562_v9, %v1562_v9  ;;  %901 = vst [vmem:[%s1542_s29 + $0x1f8] sm:$0xff] %v1771_v56 }
 0x12b   : > { %v1066_v34 = vadd.f32 %v1065_v31, %v1003_v14  ;;  %v934_v36 = vadd.f32 %v933_v30, %v1583_v25 }
 0x12d   : > { %v935_v39 = vadd.f32 %v934_v36, %v1562_v9  ;;  %v1067_v40 = vadd.f32 %v1066_v34, %v1004_v37  ;;  %v1766_v9 = vadd.f32 %v1537_v33, %v823_v49  ;;  %v1016_v34 = vmul.f32 %v1667_v55, %v1667_v55 }
 0x12e   : > { %v1020_v49 = vmul.f32 %v1695_v27, %v1695_v27 }
 0x12f   : > { %v1068_v50 = vadd.f32 %v1067_v40, %v1005_v15  ;;  %v936_v25 = vadd.f32 %v935_v39, %v1573_v19  ;;  %898 = vst [vmem:[%s1542_s29 + $0x1e0] sm:$0xff] %v1766_v9  ;;  %v1777_v19 = vadd.f32 %v1537_v33, %v826_v57  ;;  %v1010_v33 = vmul.f32 %v1601_v48, %v1601_v48 }
 0x131   : > { %v937_v59 = vadd.f32 %v936_v25, %v1594_v44  ;;  %v1069_v60 = vadd.f32 %v1068_v50, %v1006_v45  ;;  %899 = vst [vmem:[%s1542_s29 + $0x1e8] sm:$0xff] %v1777_v19 }
 0x133   : > { %v1070_v61 = vadd.f32 %v1069_v60, %v1007_v51  ;;  %v938_v62 = vadd.f32 %v937_v59, %v1611_v54 }
 0x135   : > { %v939_v44 = vadd.f32 %v938_v62, %v1590_v38  ;;  %v1071_v3 = vadd.f32 %v1070_v61, %v1008_v63  ;;  %v1013_v38 = vmul.f32 %v1618_v2, %v1618_v2  ;;  %v1024_v61 = vmul.f32 %v1723_v0, %v1723_v0 }
 0x137   : > { %v1072_v5 = vadd.f32 %v1071_v3, %v1009_v1  ;;  %v940_v6 = vadd.f32 %v939_v44, %v1601_v48  ;;  %v1014_v48 = vmul.f32 %v1629_v13, %v1629_v13 }
 0x139   : > { %v941_v10 = vadd.f32 %v940_v6, %v1622_v8  ;;  %v1073_v54 = vadd.f32 %v1072_v5, %v1010_v33  ;;  %v1015_v8 = vmul.f32 %v1650_v42, %v1650_v42  ;;  %v1028_v6 = vmul.f32 %v1745_v32, %v1745_v32 }
 0x13b   : > { %v1074_v11 = vadd.f32 %v1073_v54, %v1011_v7  ;;  %v942_v14 = vadd.f32 %v941_v10, %v1639_v21 }
 0x13d   : > { %v943_v20 = vadd.f32 %v942_v14, %v1618_v2  ;;  %v1075_v22 = vadd.f32 %v1074_v11, %v1012_v17  ;;  %v1017_v2 = vmul.f32 %v1646_v35, %v1646_v35  ;;  %v1031_v11 = vmul.f32 %v1766_v9, %v1766_v9 }
 0x13f   : > { %v1076_v23 = vadd.f32 %v1075_v22, %v1013_v38  ;;  %v944_v26 = vadd.f32 %v943_v20, %v1629_v13  ;;  %v1018_v13 = vmul.f32 %v1657_v47, %v1657_v47  ;;  %v1033_v20 = vmul.f32 %v1760_v46, %v1760_v46 }
 0x141   : > { %v945_v29 = vadd.f32 %v944_v26, %v1650_v42  ;;  %v1077_v30 = vadd.f32 %v1076_v23, %v1014_v48  ;;  %v1019_v42 = vmul.f32 %v1678_v12, %v1678_v12 }
 0x143   : > { %v1078_v31 = vadd.f32 %v1077_v30, %v1015_v8  ;;  %v946_v21 = vadd.f32 %v945_v29, %v1667_v55 }
 0x145   : > { %v947_v36 = vadd.f32 %v946_v21, %v1646_v35  ;;  %v1079_v37 = vadd.f32 %v1078_v31, %v1016_v34  ;;  %v1021_v35 = vmul.f32 %v1674_v4, %v1674_v4 }
 0x147   : > { %v1080_v15 = vadd.f32 %v1079_v37, %v1017_v2  ;;  %v948_v39 = vadd.f32 %v947_v36, %v1657_v47  ;;  %v1022_v47 = vmul.f32 %v1685_v18, %v1685_v18 }
 0x149   : > { %v949_v40 = vadd.f32 %v948_v39, %v1678_v12  ;;  %v1081_v41 = vadd.f32 %v1080_v15, %v1018_v13  ;;  %v1023_v12 = vmul.f32 %v1706_v52, %v1706_v52 }
 0x14b   : > { %v1082_v45 = vadd.f32 %v1081_v41, %v1019_v42  ;;  %v950_v55 = vadd.f32 %v949_v40, %v1695_v27 }
 0x14d   : > { %v951_v50 = vadd.f32 %v950_v55, %v1674_v4  ;;  %v1083_v25 = vadd.f32 %v1082_v45, %v1020_v49  ;;  %v1025_v4 = vmul.f32 %v1702_v43, %v1702_v43 }
 0x14f   : > { %v1084_v51 = vadd.f32 %v1083_v25, %v1021_v35  ;;  %v952_v53 = vadd.f32 %v951_v50, %v1685_v18  ;;  %v1026_v18 = vmul.f32 %v1713_v58, %v1713_v58 }
 0x151   : > { %v953_v57 = vadd.f32 %v952_v53, %v1706_v52  ;;  %v1085_v59 = vadd.f32 %v1084_v51, %v1022_v47  ;;  %v1027_v52 = vmul.f32 %v1734_v24, %v1734_v24 }
 0x153   : > { %v1086_v60 = vadd.f32 %v1085_v59, %v1023_v12  ;;  %v954_v27 = vadd.f32 %v953_v57, %v1723_v0 }
 0x155   : > { %v955_v62 = vadd.f32 %v954_v27, %v1702_v43  ;;  %v1087_v63 = vadd.f32 %v1086_v60, %v1024_v61  ;;  %v1029_v43 = vmul.f32 %v1731_v16, %v1731_v16 }
 0x157   : > { %v1088_v1 = vadd.f32 %v1087_v63, %v1025_v4  ;;  %v956_v44 = vadd.f32 %v955_v62, %v1713_v58  ;;  %v1030_v58 = vmul.f32 %v1739_v28, %v1739_v28 }
 0x159   : > { %v957_v3 = vadd.f32 %v956_v44, %v1734_v24  ;;  %v1089_v33 = vadd.f32 %v1088_v1, %v1026_v18 }
 0x15b   : > { %v1090_v5 = vadd.f32 %v1089_v33, %v1027_v52  ;;  %v958_v0 = vadd.f32 %v957_v3, %v1745_v32 }
 0x15d   : > { %v959_v7 = vadd.f32 %v958_v0, %v1731_v16  ;;  %v1091_v10 = vadd.f32 %v1090_v5, %v1028_v6  ;;  %v1032_v16 = vmul.f32 %v1777_v19, %v1777_v19 }
 0x15f   : > { %v1092_v54 = vadd.f32 %v1091_v10, %v1029_v43  ;;  %v960_v24 = vadd.f32 %v959_v7, %v1739_v28  ;;  %v1034_v28 = vmul.f32 %v1771_v56, %v1771_v56 }
 0x161   : > { %v961_v14 = vadd.f32 %v960_v24, %v1766_v9  ;;  %v1093_v17 = vadd.f32 %v1092_v54, %v1030_v58 }
 0x163   : > { %v1094_v32 = vadd.f32 %v1093_v17, %v1031_v11  ;;  %v962_v38 = vadd.f32 %v961_v14, %v1777_v19 }
 0x165   : > { %v963_v22 = vadd.f32 %v962_v38, %v1760_v46  ;;  %v1095_v48 = vadd.f32 %v1094_v32, %v1032_v16 }
 0x167   : > { %v964_v23 = vadd.f32 %v963_v22, %v1771_v56  ;;  %v1096_v9 = vadd.f32 %v1095_v48, %v1033_v20 }
 0x169   : > { %v965_v26 = vrot.slane %v964_v23, 4  ;;  %v1097_v8 = vadd.f32 %v1096_v9, %v1034_v28 }
 0x16b   : > { %v966_v29 = vadd.f32 %v965_v26, %v964_v23  ;;  %v1098_v30 = vrot.slane %v1097_v8, 4 }
 0x16d   : > { %v967_v31 = vrot.slane %v966_v29, 2  ;;  %v1099_v21 = vadd.f32 %v1098_v30, %v1097_v8 }
 0x16f   : > { %v968_v19 = vadd.f32 %v967_v31, %v966_v29  ;;  %v1100_v34 = vrot.slane %v1099_v21, 2 }
 0x171   : > { %v969_v2 = vrot.slane %v968_v19, 1  ;;  %v1101_v36 = vadd.f32 %v1100_v34, %v1099_v21 }
 0x173   : > { %v1102_v46 = vrot.slane %v1101_v36, 1  ;;  %v970_v56 = vadd.f32 %v969_v2, %v968_v19 }
 0x175   : > { %v1103_v37 = vadd.f32 %v1102_v46, %v1101_v36 }
 0x177   : > { %v1105_v13 = vsel %vm1104_vm1, %v970_v56, %v1103_v37 }
 0x178   : > { %1106 = vst [vmem:[%s211_s7] sm:$0x3] %v1105_v13 }
 0x179 PF: > { %s15_s15 = sadd.s32 1, %s1420_s15  }
 0x17a   : > { %p12_p5 = scmp.ge.s32.totalorder %s15_s15, 5  }
 0x17c   :  { %14 = sbr.rel (!%p12_p5) target bundleno = 1 (0x1), region = 74 }

// kernel: discriminador_condicional_forward.9
= control target key start
LH: loop header
LB: loop body
LE: loop exit
PB: predicated region body
PF: predicated region fallthrough
CT: control target
= control target key end

     0   :  { %v596_v0 = vmov 0.0   ;;  %vm597_vm0 = vmmov 0   ;;  %vm435_vm1 = vcmask 1040384   ;;  %s896_s1 = inlined_call_operand.vmem [shape: bf16[128,128], index: 1, kind: input, shape index: {}]   ;;  %s897_s0 = inlined_call_operand.vmem [shape: bf16[200,128], index: 0, kind: input, shape index: {}]   ;;  %s898_s2 = inlined_call_operand.vmem [shape: f32[1,128], index: 2, kind: input, shape index: {}]   ;;  %s899_s3 = inlined_call_operand.vmem [shape: f32[200,128], index: 3, kind: output, shape index: {0}]   ;;  %s900_s4 = inlined_call_operand.vmem [shape: f32[1,2,128], index: 4, kind: output, shape index: {1}]  }
   0x1   :  { %489 = vmatprep.subr.bf16.mxu0 %v596_v0  ;;  %v575_v1 = vld [vmem:[%s896_s1] sm:$0xff]   ;;  %557 = vmatprep.subr.bf16.mxu1 %v596_v0  ;;  %v576_v2 = vld [vmem:[%s896_s1 + $0x8] sm:$0xff]   ;;  %v577_v3 = vld [vmem:[%s896_s1 + $0x10] sm:$0xff]  }
   0x2   :  { %505 = vmatprep.mubr.msk.bf16.mxu0 %vm597_vm0, %v596_v0  ;;  %533 = vmatprep.mubr.msk.bf16.mxu1 %vm597_vm0, %v596_v0  ;;  %v578_v4 = vld [vmem:[%s896_s1 + $0x18] sm:$0xff]   ;;  %v579_v5 = vld [vmem:[%s896_s1 + $0x20] sm:$0xff]   ;;  %v580_v6 = vld [vmem:[%s896_s1 + $0x28] sm:$0xff]  }
   0x3   :  { %490 = vmatpush3.bf16.msra.mxu0 %v575_v1  ;;  %565 = vmatpush3.bf16.msra.mxu1 %v575_v1  ;;  %v581_v7 = vld [vmem:[%s896_s1 + $0x30] sm:$0xff]   ;;  %v582_v8 = vld [vmem:[%s896_s1 + $0x38] sm:$0xff]   ;;  %v583_v9 = vld [vmem:[%s897_s0] sm:$0xff]  }
   0x4   :  { %491 = vmatprep.subr.bf16.mxu0 %v596_v0  ;;  %558 = vmatprep.subr.bf16.mxu1 %v596_v0  ;;  %v587_v10 = vld [vmem:[%s897_s0 + $0x38] sm:$0xff]   ;;  %v584_v11 = vld [vmem:[%s897_s0 + $0x8] sm:$0xff]   ;;  %v589_v12 = vld [vmem:[%s897_s0 + $0x40] sm:$0xff]  }
   0x5   :  { %v585_v13 = vld [vmem:[%s897_s0 + $0x10] sm:$0xff]   ;;  %v591_v14 = vld [vmem:[%s897_s0 + $0x48] sm:$0xff]   ;;  %v586_v15 = vld [vmem:[%s897_s0 + $0x18] sm:$0xff]  }
   0x6   :  { %v593_v16 = vld [vmem:[%s897_s0 + $0x50] sm:$0xff]   ;;  %v588_v17 = vld [vmem:[%s897_s0 + $0x20] sm:$0xff]   ;;  %v594_v18 = vld [vmem:[%s897_s0 + $0x58] sm:$0xff]  }
   0x7   :  { %492 = vmatpush3.bf16.msra.mxu0 %v576_v2  ;;  %566 = vmatpush3.bf16.msra.mxu1 %v576_v2  ;;  %v590_v19 = vld [vmem:[%s897_s0 + $0x28] sm:$0xff]   ;;  %v595_v20 = vld [vmem:[%s897_s0 + $0x60] ss:$0 sps:$4 sm:$0xff]   ;;  %v592_v21 = vld [vmem:[%s897_s0 + $0x30] sm:$0xff]  }
   0x8   :  { %493 = vmatprep.subr.bf16.mxu0 %v596_v0  ;;  %559 = vmatprep.subr.bf16.mxu1 %v596_v0  ;;  %v731_v22 = vld [vmem:[%s898_s2] ss:$0 sm:$0xff] }
   0xb   :  { %494 = vmatpush3.bf16.msra.mxu0 %v577_v3  ;;  %567 = vmatpush3.bf16.msra.mxu1 %v577_v3 }
   0xc   :  { %495 = vmatprep.subr.bf16.mxu0 %v596_v0  ;;  %560 = vmatprep.subr.bf16.mxu1 %v596_v0 }
   0xf   :  { %496 = vmatpush3.bf16.msra.mxu0 %v578_v4  ;;  %568 = vmatpush3.bf16.msra.mxu1 %v578_v4 }
  0x10   :  { %497 = vmatprep.subr.bf16.mxu0 %v596_v0  ;;  %561 = vmatprep.subr.bf16.mxu1 %v596_v0 }
  0x13   :  { %498 = vmatpush3.bf16.msra.mxu0 %v579_v5  ;;  %569 = vmatpush3.bf16.msra.mxu1 %v579_v5 }
  0x14   :  { %499 = vmatprep.subr.bf16.mxu0 %v596_v0  ;;  %562 = vmatprep.subr.bf16.mxu1 %v596_v0 }
  0x17   :  { %500 = vmatpush3.bf16.msra.mxu0 %v580_v6  ;;  %570 = vmatpush3.bf16.msra.mxu1 %v580_v6 }
  0x18   :  { %501 = vmatprep.subr.bf16.mxu0 %v596_v0  ;;  %563 = vmatprep.subr.bf16.mxu1 %v596_v0 }
  0x1b   :  { %502 = vmatpush3.bf16.msra.mxu0 %v581_v7  ;;  %571 = vmatpush3.bf16.msra.mxu1 %v581_v7 }
  0x1c   :  { %503 = vmatprep.subr.bf16.mxu0 %v596_v0  ;;  %564 = vmatprep.subr.bf16.mxu1 %v596_v0 }
  0x1f   :  { %504 = vmatpush3.bf16.msra.mxu0 %v582_v8  ;;  %572 = vmatpush3.bf16.msra.mxu1 %v582_v8 }
  0x22   :  { %506 = vmatmul.mubr.bf16.vlgmr.msra.gmra.mrb[0].mxu0 %v583_v9  ;;  %534 = vmatmul.mubr.bf16.vlgmr.msra.gmra.mrb[0].mxu1 %v587_v10 }
  0x23   :  { %509 = vmatprep.mubr.msk.bf16.mxu0 %vm597_vm0, %v596_v0  ;;  %537 = vmatprep.mubr.msk.bf16.mxu1 %vm597_vm0, %v596_v0 }
  0x2a   :  { %510 = vmatmul.mubr.bf16.gmra.mrb[4].mxu0 %v584_v11  ;;  %538 = vmatmul.mubr.bf16.gmra.mrb[4].mxu1 %v589_v12 }
  0x2b   :  { %513 = vmatprep.mubr.msk.bf16.mxu0 %vm597_vm0, %v596_v0  ;;  %541 = vmatprep.mubr.msk.bf16.mxu1 %vm597_vm0, %v596_v0 }
  0x32   :  { %514 = vmatmul.mubr.bf16.gmra.mrb[8].mxu0 %v585_v13  ;;  %542 = vmatmul.mubr.bf16.gmra.mrb[8].mxu1 %v591_v14 }
  0x33   :  { %517 = vmatprep.mubr.msk.bf16.mxu0 %vm597_vm0, %v596_v0  ;;  %545 = vmatprep.mubr.msk.bf16.mxu1 %vm597_vm0, %v596_v0 }
  0x3a   :  { %518 = vmatmul.mubr.bf16.gmra.mrb[12].mxu0 %v586_v15  ;;  %546 = vmatmul.mubr.bf16.gmra.mrb[12].mxu1 %v593_v16 }
  0x3b   :  { %521 = vmatprep.mubr.msk.bf16.mxu0 %vm597_vm0, %v596_v0  ;;  %549 = vmatprep.mubr.msk.bf16.mxu1 %vm597_vm0, %v596_v0 }
  0x42   :  { %522 = vmatmul.mubr.bf16.gmra.mrb[16].mxu0 %v588_v17  ;;  %550 = vmatmul.mubr.bf16.gmra.mrb[16].mxu1 %v594_v18 }
  0x43   :  { %525 = vmatprep.mubr.msk.bf16.mxu0 %vm597_vm0, %v596_v0  ;;  %553 = vmatprep.mubr.msk.bf16.mxu1 %vm597_vm0, %v596_v0 }
  0x4a   :  { %526 = vmatmul.mubr.bf16.gmra.mrb[20].mxu0 %v590_v19  ;;  %554 = vmatmul.mubr.bf16.gmra.mrb[20].mxu1 %v595_v20 }
  0x4b   :  { %529 = vmatprep.mubr.msk.bf16.mxu0 %vm597_vm0, %v596_v0 }
  0x52   :  { %530 = vmatmul.mubr.bf16.gmra.mrb[24].mxu0 %v592_v21 }
  0xf5   :  { %v223_v23 = vpop.f32.mrb[0].mxu0  ;;  %v279_v24 = vpop.f32.mrb[0].mxu1 }
  0xf6   :  { %v224_v25 = vadd.f32 %v731_v22, %v223_v23  ;;  %v507_v26 = vpop.f32.mrb[1].mxu0  ;;  %v735_v27 = vadd.f32 %v731_v22, %v279_v24  ;;  %v535_v28 = vpop.f32.mrb[1].mxu1 }
  0xf7   :  { %v226_v29 = vpop.f32.mrb[2].mxu0  ;;  %v282_v30 = vpop.f32.mrb[2].mxu1 }
  0xf8   :  { %325 = vst [vmem:[%s899_s3] sm:$0xff] %v224_v25  ;;  %v227_v31 = vadd.f32 %v731_v22, %v226_v29  ;;  %v508_v32 = vpop.f32.mrb[3].mxu0  ;;  %339 = vst [vmem:[%s899_s3 + $0x70] sm:$0xff] %v735_v27  ;;  %v746_v33 = vadd.f32 %v731_v22, %v282_v30  ;;  %v536_v34 = vpop.f32.mrb[3].mxu1  ;;  %v380_v35 = vmul.f32 %v224_v25, %v224_v25 }
  0xfa   :  { %326 = vst [vmem:[%s899_s3 + $0x8] sm:$0xff] %v227_v31  ;;  %v350_v36 = vadd.f32 %v227_v31, %v224_v25  ;;  %v381_v37 = vmul.f32 %v227_v31, %v227_v31  ;;  %340 = vst [vmem:[%s899_s3 + $0x78] sm:$0xff] %v746_v33 }
  0xfc   :  { %v405_v38 = vadd.f32 %v381_v37, %v380_v35 }
  0xfd   :  { %v231_v39 = vpop.f32.mrb[4].mxu0  ;;  %v287_v40 = vpop.f32.mrb[4].mxu1 }
  0xfe   :  { %v232_v41 = vadd.f32 %v731_v22, %v231_v39  ;;  %v511_v42 = vpop.f32.mrb[5].mxu0  ;;  %v757_v43 = vadd.f32 %v731_v22, %v287_v40  ;;  %v539_v44 = vpop.f32.mrb[5].mxu1 }
  0xff   :  { %v234_v45 = vpop.f32.mrb[6].mxu0  ;;  %v290_v46 = vpop.f32.mrb[6].mxu1 }
 0x100   :  { %327 = vst [vmem:[%s899_s3 + $0x10] sm:$0xff] %v232_v41  ;;  %v351_v47 = vadd.f32 %v350_v36, %v232_v41  ;;  %v382_v48 = vmul.f32 %v232_v41, %v232_v41  ;;  %v235_v49 = vadd.f32 %v731_v22, %v234_v45  ;;  %v512_v50 = vpop.f32.mrb[7].mxu0  ;;  %341 = vst [vmem:[%s899_s3 + $0x80] sm:$0xff] %v757_v43  ;;  %v540_v51 = vpop.f32.mrb[7].mxu1 }
 0x101   :  { %v768_v52 = vadd.f32 %v731_v22, %v290_v46 }
 0x102   :  { %v406_v53 = vadd.f32 %v405_v38, %v382_v48  ;;  %328 = vst [vmem:[%s899_s3 + $0x18] sm:$0xff] %v235_v49  ;;  %v352_v54 = vadd.f32 %v351_v47, %v235_v49  ;;  %v383_v55 = vmul.f32 %v235_v49, %v235_v49 }
 0x103   :  { %342 = vst [vmem:[%s899_s3 + $0x88] sm:$0xff] %v768_v52 }
 0x104   :  { %v407_v56 = vadd.f32 %v406_v53, %v383_v55 }
 0x105   :  { %v239_v57 = vpop.f32.mrb[8].mxu0  ;;  %v295_v58 = vpop.f32.mrb[8].mxu1 }
 0x106   :  { %v240_v59 = vadd.f32 %v731_v22, %v239_v57  ;;  %v515_v60 = vpop.f32.mrb[9].mxu0  ;;  %v779_v61 = vadd.f32 %v731_v22, %v295_v58  ;;  %v543_v62 = vpop.f32.mrb[9].mxu1 }
 0x107   :  { %v242_v63 = vpop.f32.mrb[10].mxu0  ;;  %v298_v0 = vpop.f32.mrb[10].mxu1 }
 0x108   :  { %329 = vst [vmem:[%s899_s3 + $0x20] sm:$0xff] %v240_v59  ;;  %v353_v1 = vadd.f32 %v352_v54, %v240_v59  ;;  %v384_v2 = vmul.f32 %v240_v59, %v240_v59  ;;  %v243_v3 = vadd.f32 %v731_v22, %v242_v63  ;;  %v516_v4 = vpop.f32.mrb[11].mxu0  ;;  %343 = vst [vmem:[%s899_s3 + $0x90] sm:$0xff] %v779_v61  ;;  %v544_v5 = vpop.f32.mrb[11].mxu1 }
 0x109   :  { %v790_v6 = vadd.f32 %v731_v22, %v298_v0 }
 0x10a   :  { %v408_v7 = vadd.f32 %v407_v56, %v384_v2  ;;  %330 = vst [vmem:[%s899_s3 + $0x28] sm:$0xff] %v243_v3  ;;  %v354_v8 = vadd.f32 %v353_v1, %v243_v3  ;;  %v385_v9 = vmul.f32 %v243_v3, %v243_v3 }
 0x10b   :  { %344 = vst [vmem:[%s899_s3 + $0x98] sm:$0xff] %v790_v6 }
 0x10c   :  { %v409_v10 = vadd.f32 %v408_v7, %v385_v9 }
 0x10d   :  { %v247_v11 = vpop.f32.mrb[12].mxu0  ;;  %v303_v12 = vpop.f32.mrb[12].mxu1 }
 0x10e   :  { %v248_v13 = vadd.f32 %v731_v22, %v247_v11  ;;  %v519_v14 = vpop.f32.mrb[13].mxu0  ;;  %v801_v15 = vadd.f32 %v731_v22, %v303_v12  ;;  %v547_v16 = vpop.f32.mrb[13].mxu1 }
 0x10f   :  { %v250_v17 = vpop.f32.mrb[14].mxu0  ;;  %v306_v18 = vpop.f32.mrb[14].mxu1 }
 0x110   :  { %331 = vst [vmem:[%s899_s3 + $0x30] sm:$0xff] %v248_v13  ;;  %v355_v19 = vadd.f32 %v354_v8, %v248_v13  ;;  %v386_v20 = vmul.f32 %v248_v13, %v248_v13  ;;  %v251_v21 = vadd.f32 %v731_v22, %v250_v17  ;;  %v520_v23 = vpop.f32.mrb[15].mxu0  ;;  %345 = vst [vmem:[%s899_s3 + $0xa0] sm:$0xff] %v801_v15  ;;  %v548_v24 = vpop.f32.mrb[15].mxu1 }
 0x111   :  { %v812_v25 = vadd.f32 %v731_v22, %v306_v18  ;;  %v395_v23 = vmul.f32 %v746_v33, %v746_v33 }
 0x112   :  { %v410_v26 = vadd.f32 %v409_v10, %v386_v20  ;;  %332 = vst [vmem:[%s899_s3 + $0x38] sm:$0xff] %v251_v21  ;;  %v356_v28 = vadd.f32 %v355_v19, %v251_v21  ;;  %v387_v29 = vmul.f32 %v251_v21, %v251_v21  ;;  %v394_v19 = vmul.f32 %v735_v27, %v735_v27 }
 0x113   :  { %346 = vst [vmem:[%s899_s3 + $0xa8] sm:$0xff] %v812_v25 }
 0x114   :  { %v411_v30 = vadd.f32 %v410_v26, %v387_v29  ;;  %v396_v26 = vmul.f32 %v757_v43, %v757_v43 }
 0x115   :  { %v255_v31 = vpop.f32.mrb[16].mxu0  ;;  %v311_v32 = vpop.f32.mrb[16].mxu1 }
 0x116   :  { %v256_v34 = vadd.f32 %v731_v22, %v255_v31  ;;  %v523_v35 = vpop.f32.mrb[17].mxu0  ;;  %v823_v36 = vadd.f32 %v731_v22, %v311_v32  ;;  %v551_v37 = vpop.f32.mrb[17].mxu1 }
 0x117   :  { %v258_v38 = vpop.f32.mrb[18].mxu0  ;;  %v314_v39 = vpop.f32.mrb[18].mxu1 }
 0x118   :  { %333 = vst [vmem:[%s899_s3 + $0x40] sm:$0xff] %v256_v34  ;;  %v357_v40 = vadd.f32 %v356_v28, %v256_v34  ;;  %v388_v41 = vmul.f32 %v256_v34, %v256_v34  ;;  %v259_v42 = vadd.f32 %v731_v22, %v258_v38  ;;  %v524_v44 = vpop.f32.mrb[19].mxu0  ;;  %347 = vst [vmem:[%s899_s3 + $0xb0] sm:$0xff] %v823_v36  ;;  %v552_v45 = vpop.f32.mrb[19].mxu1 }
 0x119   :  { %v834_v46 = vadd.f32 %v731_v22, %v314_v39  ;;  %v400_v39 = vmul.f32 %v801_v15, %v801_v15  ;;  %v402_v45 = vmul.f32 %v823_v36, %v823_v36 }
 0x11a   :  { %v412_v47 = vadd.f32 %v411_v30, %v388_v41  ;;  %334 = vst [vmem:[%s899_s3 + $0x48] sm:$0xff] %v259_v42  ;;  %v358_v48 = vadd.f32 %v357_v40, %v259_v42  ;;  %v389_v49 = vmul.f32 %v259_v42, %v259_v42  ;;  %v397_v30 = vmul.f32 %v768_v52, %v768_v52 }
 0x11b   :  { %348 = vst [vmem:[%s899_s3 + $0xb8] sm:$0xff] %v834_v46  ;;  %v401_v42 = vmul.f32 %v812_v25, %v812_v25 }
 0x11c   :  { %v413_v50 = vadd.f32 %v412_v47, %v389_v49 }
 0x11d   :  { %v263_v51 = vpop.f32.mrb[20].mxu0  ;;  %v319_v53 = vpop.f32.mrb[20].mxu1 }
 0x11e   :  { %v264_v54 = vadd.f32 %v731_v22, %v263_v51  ;;  %v527_v55 = vpop.f32.mrb[21].mxu0  ;;  %v320_v56 = vadd.f32 %v731_v22, %v319_v53  ;;  %v555_v57 = vpop.f32.mrb[21].mxu1 }
 0x11f   :  { %v266_v58 = vpop.f32.mrb[22].mxu0  ;;  %v322_v59 = vpop.f32.mrb[22].mxu1 }
 0x120   :  { %335 = vst [vmem:[%s899_s3 + $0x50] sm:$0xff] %v264_v54  ;;  %v359_v60 = vadd.f32 %v358_v48, %v264_v54  ;;  %v390_v62 = vmul.f32 %v264_v54, %v264_v54  ;;  %v267_v63 = vadd.f32 %v731_v22, %v266_v58  ;;  %v528_v0 = vpop.f32.mrb[23].mxu0  ;;  %349 = vst [vmem:[%s899_s3 + $0xc0] sm:$0xff] %v320_v56  ;;  %v556_v1 = vpop.f32.mrb[23].mxu1 }
 0x121   :  { %v403_v48 = vmul.f32 %v834_v46, %v834_v46 }
 0x122   :  { %v414_v2 = vadd.f32 %v413_v50, %v390_v62  ;;  %336 = vst [vmem:[%s899_s3 + $0x58] sm:$0xff] %v267_v63  ;;  %v360_v3 = vadd.f32 %v359_v60, %v267_v63  ;;  %v391_v4 = vmul.f32 %v267_v63, %v267_v63 }
 0x124   :  { %v415_v5 = vadd.f32 %v414_v2, %v391_v4 }
 0x125   :  { %v271_v7 = vpop.f32.mrb[24].mxu0 }
 0x126   :  { %v272_v8 = vadd.f32 %v731_v22, %v271_v7  ;;  %v531_v9 = vpop.f32.mrb[25].mxu0 }
 0x127   :  { %v274_v10 = vpop.f32.mrb[26].mxu0 }
 0x128   :  { %337 = vst [vmem:[%s899_s3 + $0x60] sm:$0xff] %v272_v8  ;;  %v361_v11 = vadd.f32 %v360_v3, %v272_v8  ;;  %v392_v12 = vmul.f32 %v272_v8, %v272_v8  ;;  %v275_v13 = vadd.f32 %v731_v22, %v274_v10  ;;  %v532_v14 = vpop.f32.mrb[27].mxu0 }
 0x12a   :  { %v416_v16 = vadd.f32 %v415_v5, %v392_v12  ;;  %338 = vst [vmem:[%s899_s3 + $0x68] sm:$0xff] %v275_v13  ;;  %v362_v17 = vadd.f32 %v361_v11, %v275_v13  ;;  %v393_v18 = vmul.f32 %v275_v13, %v275_v13 }
 0x12c   :  { %v363_v20 = vadd.f32 %v362_v17, %v735_v27  ;;  %v417_v21 = vadd.f32 %v416_v16, %v393_v18  ;;  %v398_v27 = vmul.f32 %v779_v61, %v779_v61 }
 0x12e   :  { %v364_v24 = vadd.f32 %v363_v20, %v746_v33  ;;  %v418_v22 = vadd.f32 %v417_v21, %v394_v19  ;;  %v399_v33 = vmul.f32 %v790_v6, %v790_v6 }
 0x130   :  { %v365_v28 = vadd.f32 %v364_v24, %v757_v43  ;;  %v419_v29 = vadd.f32 %v418_v22, %v395_v23 }
 0x132   :  { %v420_v31 = vadd.f32 %v419_v29, %v396_v26  ;;  %v366_v32 = vadd.f32 %v365_v28, %v768_v52 }
 0x134   :  { %v367_v34 = vadd.f32 %v366_v32, %v779_v61  ;;  %v421_v35 = vadd.f32 %v420_v31, %v397_v30 }
 0x136   :  { %v368_v37 = vadd.f32 %v367_v34, %v790_v6  ;;  %v422_v38 = vadd.f32 %v421_v35, %v398_v27 }
 0x138   :  { %v369_v43 = vadd.f32 %v368_v37, %v801_v15  ;;  %v423_v40 = vadd.f32 %v422_v38, %v399_v33  ;;  %v404_v15 = vmul.f32 %v320_v56, %v320_v56 }
 0x13a   :  { %v424_v41 = vadd.f32 %v423_v40, %v400_v39  ;;  %v370_v52 = vadd.f32 %v369_v43, %v812_v25 }
 0x13c   :  { %v425_v61 = vadd.f32 %v424_v41, %v401_v42  ;;  %v371_v44 = vadd.f32 %v370_v52, %v823_v36 }
 0x13e   :  { %v426_v6 = vadd.f32 %v425_v61, %v402_v45  ;;  %v372_v47 = vadd.f32 %v371_v44, %v834_v46 }
 0x140   :  { %v427_v49 = vadd.f32 %v426_v6, %v403_v48  ;;  %v373_v50 = vadd.f32 %v372_v47, %v320_v56 }
 0x142   :  { %v374_v51 = vrot.slane %v373_v50, 4  ;;  %v428_v53 = vadd.f32 %v427_v49, %v404_v15 }
 0x144   :  { %v375_v54 = vadd.f32 %v374_v51, %v373_v50  ;;  %v429_v55 = vrot.slane %v428_v53, 4 }
 0x146   :  { %v376_v25 = vrot.slane %v375_v54, 2  ;;  %v430_v57 = vadd.f32 %v429_v55, %v428_v53 }
 0x148   :  { %v377_v58 = vadd.f32 %v376_v25, %v375_v54  ;;  %v431_v59 = vrot.slane %v430_v57, 2 }
 0x14a   :  { %v378_v60 = vrot.slane %v377_v58, 1  ;;  %v432_v62 = vadd.f32 %v431_v59, %v430_v57 }
 0x14c   :  { %v433_v36 = vrot.slane %v432_v62, 1  ;;  %v379_v63 = vadd.f32 %v378_v60, %v377_v58 }
 0x14e   :  { %v434_v0 = vadd.f32 %v433_v36, %v432_v62 }
 0x150   :  { %v436_v1 = vsel %vm435_vm1, %v379_v63, %v434_v0 }
 0x151   :  { %437 = vst [vmem:[%s900_s4] sm:$0x3] %v436_v1 }

// kernel: discriminador_condicional_forward.10
= control target key start
LH: loop header
LB: loop body
LE: loop exit
PB: predicated region body
PF: predicated region fallthrough
CT: control target
= control target key end

     0   :  { %s440_s0 = inlined_call_operand.vmem [shape: f32[200,128], index: 0, kind: input, shape index: {}, may-alias: {0,3}]   ;;  %s441_s1 = inlined_call_operand.vmem [shape: f32[1,128], index: 1, kind: input, shape index: {}]   ;;  %s442_s2 = inlined_call_operand.vmem [shape: f32[1,128], index: 2, kind: input, shape index: {}]   ;;  %s443_s3 = inlined_call_operand.vmem [shape: f32[200,128], index: 3, kind: output, shape index: {}, may-alias: {0,3}]  }
   0x1   :  { %v14_v0 = vld [vmem:[%s440_s0] sm:$0xff]  ;;  %v15_v4 = vld [vmem:[%s440_s0 + $0x8] sm:$0xff]  ;;  %v16_v5 = vld [vmem:[%s440_s0 + $0x10] sm:$0xff] }
   0x2   :  { %v235_v1 = vld [vmem:[%s441_s1] ss:$0 sm:$0xff]  ;;  %v17_v6 = vld [vmem:[%s440_s0 + $0x18] sm:$0xff]  ;;  %v19_v11 = vld [vmem:[%s440_s0 + $0x28] sm:$0xff] }
   0x3   :  { %v240_v2 = vld [vmem:[%s442_s2] ss:$0 sm:$0xff]  ;;  %v46_v3 = vmul.f32 %v235_v1, %v14_v0  ;;  %v47_v7 = vmul.f32 %v235_v1, %v15_v4  ;;  %v48_v8 = vmul.f32 %v235_v1, %v16_v5  ;;  %v49_v9 = vmul.f32 %v235_v1, %v17_v6  ;;  %v20_v12 = vld [vmem:[%s440_s0 + $0x30] sm:$0xff]  ;;  %v21_v17 = vld [vmem:[%s440_s0 + $0x38] sm:$0xff] }
   0x4   :  { %v18_v10 = vld [vmem:[%s440_s0 + $0x20] sm:$0xff]  ;;  %v51_v15 = vmul.f32 %v235_v1, %v19_v11  ;;  %v52_v16 = vmul.f32 %v235_v1, %v20_v12  ;;  %v53_v21 = vmul.f32 %v235_v1, %v21_v17  ;;  %v23_v30 = vld [vmem:[%s440_s0 + $0x48] sm:$0xff]  ;;  %v24_v31 = vld [vmem:[%s440_s0 + $0x50] sm:$0xff] }
   0x5   :  { %v78_v13 = vadd.f32 %v240_v2, %v46_v3  ;;  %v50_v14 = vmul.f32 %v235_v1, %v18_v10  ;;  %v79_v18 = vadd.f32 %v240_v2, %v47_v7  ;;  %v80_v19 = vadd.f32 %v240_v2, %v48_v8  ;;  %v22_v25 = vld [vmem:[%s440_s0 + $0x40] sm:$0xff] }
   0x6   :  { %v81_v20 = vadd.f32 %v240_v2, %v49_v9  ;;  %v83_v24 = vadd.f32 %v240_v2, %v51_v15  ;;  %v84_v37 = vadd.f32 %v240_v2, %v52_v16  ;;  %v85_v38 = vadd.f32 %v240_v2, %v53_v21 }
   0x7   :  { %vm103_vm0 = vcmp.ge.f32.partialorder %v78_v13, 0.0  ;;  %v128_v22 = vmul.f32 0.2, %v78_v13  ;;  %v82_v23 = vadd.f32 %v240_v2, %v50_v14  ;;  %vm104_vm1 = vcmp.ge.f32.partialorder %v79_v18, 0.0 }
   0x8   :  { %v129_v26 = vmul.f32 0.2, %v79_v18  ;;  %vm105_vm2 = vcmp.ge.f32.partialorder %v80_v19, 0.0  ;;  %v130_v27 = vmul.f32 0.2, %v80_v19  ;;  %vm106_vm3 = vcmp.ge.f32.partialorder %v81_v20, 0.0 }
   0x9   :  { %v153_v28 = vsel %vm103_vm0, %v78_v13, %v128_v22  ;;  %v131_v29 = vmul.f32 0.2, %v81_v20  ;;  %vm107_vm4 = vcmp.ge.f32.partialorder %v82_v23, 0.0  ;;  %v132_v34 = vmul.f32 0.2, %v82_v23 }
   0xa   :  { %178 = vst [vmem:[%s443_s3] sm:$0xff] %v153_v28  ;;  %v154_v32 = vsel %vm104_vm1, %v79_v18, %v129_v26  ;;  %v155_v33 = vsel %vm105_vm2, %v80_v19, %v130_v27  ;;  %vm108_vm5 = vcmp.ge.f32.partialorder %v83_v24, 0.0  ;;  %v133_v36 = vmul.f32 0.2, %v83_v24 }
   0xb   :  { %179 = vst [vmem:[%s443_s3 + $0x8] sm:$0xff] %v154_v32  ;;  %180 = vst [vmem:[%s443_s3 + $0x10] sm:$0xff] %v155_v33  ;;  %v156_v35 = vsel %vm106_vm3, %v81_v20, %v131_v29  ;;  %v157_v39 = vsel %vm107_vm4, %v82_v23, %v132_v34  ;;  %v54_v40 = vmul.f32 %v235_v1, %v22_v25  ;;  %vm109_vm6 = vcmp.ge.f32.partialorder %v84_v37, 0.0 }
   0xc   :  { %181 = vst [vmem:[%s443_s3 + $0x18] sm:$0xff] %v156_v35  ;;  %v55_v41 = vmul.f32 %v235_v1, %v23_v30  ;;  %v56_v42 = vmul.f32 %v235_v1, %v24_v31  ;;  %v158_v46 = vsel %vm108_vm5, %v83_v24, %v133_v36  ;;  %v134_v47 = vmul.f32 0.2, %v84_v37 }
   0xd   :  { %vm110_vm7 = vcmp.ge.f32.partialorder %v85_v38, 0.0  ;;  %v135_v48 = vmul.f32 0.2, %v85_v38  ;;  %v86_v49 = vadd.f32 %v240_v2, %v54_v40 }
   0xe   :  { %v87_v50 = vadd.f32 %v240_v2, %v55_v41  ;;  %v88_v51 = vadd.f32 %v240_v2, %v56_v42  ;;  %v159_v52 = vsel %vm109_vm6, %v84_v37, %v134_v47 }
   0xf   :  { %v160_v57 = vsel %vm110_vm7, %v85_v38, %v135_v48  ;;  %vm111_vm8 = vcmp.ge.f32.partialorder %v86_v49, 0.0  ;;  %v136_v58 = vmul.f32 0.2, %v86_v49 }
  0x10   :  { %vm112_vm9 = vcmp.ge.f32.partialorder %v87_v50, 0.0  ;;  %v137_v59 = vmul.f32 0.2, %v87_v50  ;;  %vm113_vm10 = vcmp.ge.f32.partialorder %v88_v51, 0.0  ;;  %v138_v60 = vmul.f32 0.2, %v88_v51 }
  0x11   :  { %v161_v62 = vsel %vm111_vm8, %v86_v49, %v136_v58 }
  0x12   :  { %v162_v6 = vsel %vm112_vm9, %v87_v50, %v137_v59  ;;  %v163_v7 = vsel %vm113_vm10, %v88_v51, %v138_v60 }
  0x13   :  { %v25_v43 = vld [vmem:[%s440_s0 + $0x58] sm:$0xff]  ;;  %v26_v44 = vld [vmem:[%s440_s0 + $0x60] sm:$0xff]  ;;  %v27_v45 = vld [vmem:[%s440_s0 + $0x68] sm:$0xff] }
  0x14   :  { %182 = vst [vmem:[%s443_s3 + $0x20] sm:$0xff] %v157_v39  ;;  %183 = vst [vmem:[%s443_s3 + $0x28] sm:$0xff] %v158_v46  ;;  %v57_v53 = vmul.f32 %v235_v1, %v25_v43  ;;  %v58_v54 = vmul.f32 %v235_v1, %v26_v44  ;;  %v59_v55 = vmul.f32 %v235_v1, %v27_v45 }
  0x16   :  { %v89_v61 = vadd.f32 %v240_v2, %v57_v53  ;;  %v90_v63 = vadd.f32 %v240_v2, %v58_v54  ;;  %v91_v0 = vadd.f32 %v240_v2, %v59_v55 }
  0x18   :  { %vm114_vm11 = vcmp.ge.f32.partialorder %v89_v61, 0.0  ;;  %v139_v8 = vmul.f32 0.2, %v89_v61  ;;  %vm115_vm12 = vcmp.ge.f32.partialorder %v90_v63, 0.0  ;;  %v140_v11 = vmul.f32 0.2, %v90_v63 }
  0x19   :  { %vm116_vm13 = vcmp.ge.f32.partialorder %v91_v0, 0.0  ;;  %v141_v12 = vmul.f32 0.2, %v91_v0 }
  0x1a   :  { %v164_v13 = vsel %vm114_vm11, %v89_v61, %v139_v8  ;;  %v165_v19 = vsel %vm115_vm12, %v90_v63, %v140_v11 }
  0x1b   :  { %v28_v56 = vld [vmem:[%s440_s0 + $0x70] sm:$0xff]  ;;  %v166_v20 = vsel %vm116_vm13, %v91_v0, %v141_v12 }
  0x1c   :  { %184 = vst [vmem:[%s443_s3 + $0x30] sm:$0xff] %v159_v52  ;;  %185 = vst [vmem:[%s443_s3 + $0x38] sm:$0xff] %v160_v57  ;;  %v60_v3 = vmul.f32 %v235_v1, %v28_v56 }
  0x1e   :  { %v92_v14 = vadd.f32 %v240_v2, %v60_v3 }
  0x20   :  { %vm117_vm14 = vcmp.ge.f32.partialorder %v92_v14, 0.0  ;;  %v142_v23 = vmul.f32 0.2, %v92_v14 }
  0x22   :  { %v167_v30 = vsel %vm117_vm14, %v92_v14, %v142_v23 }
  0x23   :  { %v29_v4 = vld [vmem:[%s440_s0 + $0x78] sm:$0xff]  ;;  %v30_v5 = vld [vmem:[%s440_s0 + $0x80] sm:$0xff] }
  0x24   :  { %186 = vst [vmem:[%s443_s3 + $0x40] sm:$0xff] %v161_v62  ;;  %v61_v15 = vmul.f32 %v235_v1, %v29_v4  ;;  %v62_v16 = vmul.f32 %v235_v1, %v30_v5 }
  0x26   :  { %v93_v24 = vadd.f32 %v240_v2, %v61_v15  ;;  %v94_v25 = vadd.f32 %v240_v2, %v62_v16 }
  0x28   :  { %vm118_vm15 = vcmp.ge.f32.partialorder %v93_v24, 0.0  ;;  %v143_v31 = vmul.f32 0.2, %v93_v24  ;;  %vm119_vm0 = vcmp.ge.f32.partialorder %v94_v25, 0.0  ;;  %v144_v34 = vmul.f32 0.2, %v94_v25 }
  0x2a   :  { %v168_v36 = vsel %vm118_vm15, %v93_v24, %v143_v31  ;;  %v169_v41 = vsel %vm119_vm0, %v94_v25, %v144_v34 }
  0x2b   :  { %v31_v9 = vld [vmem:[%s440_s0 + $0x88] sm:$0xff]  ;;  %v32_v10 = vld [vmem:[%s440_s0 + $0x90] sm:$0xff] }
  0x2c   :  { %187 = vst [vmem:[%s443_s3 + $0x48] sm:$0xff] %v162_v6  ;;  %188 = vst [vmem:[%s443_s3 + $0x50] sm:$0xff] %v163_v7  ;;  %v63_v21 = vmul.f32 %v235_v1, %v31_v9  ;;  %v64_v22 = vmul.f32 %v235_v1, %v32_v10 }
  0x2e   :  { %v95_v26 = vadd.f32 %v240_v2, %v63_v21  ;;  %v96_v27 = vadd.f32 %v240_v2, %v64_v22 }
  0x30   :  { %vm120_vm1 = vcmp.ge.f32.partialorder %v95_v26, 0.0  ;;  %v145_v35 = vmul.f32 0.2, %v95_v26  ;;  %vm121_vm2 = vcmp.ge.f32.partialorder %v96_v27, 0.0  ;;  %v146_v37 = vmul.f32 0.2, %v96_v27 }
  0x32   :  { %v170_v42 = vsel %vm120_vm1, %v95_v26, %v145_v35  ;;  %v171_v46 = vsel %vm121_vm2, %v96_v27, %v146_v37 }
  0x33   :  { %v33_v17 = vld [vmem:[%s440_s0 + $0x98] sm:$0xff]  ;;  %v34_v18 = vld [vmem:[%s440_s0 + $0xa0] sm:$0xff] }
  0x34   :  { %189 = vst [vmem:[%s443_s3 + $0x58] sm:$0xff] %v164_v13  ;;  %190 = vst [vmem:[%s443_s3 + $0x60] sm:$0xff] %v165_v19  ;;  %v65_v28 = vmul.f32 %v235_v1, %v33_v17  ;;  %v66_v29 = vmul.f32 %v235_v1, %v34_v18 }
  0x35   :  { %191 = vst [vmem:[%s443_s3 + $0x68] sm:$0xff] %v166_v20 }
  0x36   :  { %v97_v38 = vadd.f32 %v240_v2, %v65_v28  ;;  %v98_v39 = vadd.f32 %v240_v2, %v66_v29 }
  0x38   :  { %vm122_vm3 = vcmp.ge.f32.partialorder %v97_v38, 0.0  ;;  %v147_v47 = vmul.f32 0.2, %v97_v38  ;;  %vm123_vm4 = vcmp.ge.f32.partialorder %v98_v39, 0.0  ;;  %v148_v48 = vmul.f32 0.2, %v98_v39 }
  0x3a   :  { %v172_v52 = vsel %vm122_vm3, %v97_v38, %v147_v47  ;;  %v173_v54 = vsel %vm123_vm4, %v98_v39, %v148_v48 }
  0x3c   :  { %v35_v32 = vld [vmem:[%s440_s0 + $0xa8] sm:$0xff]  ;;  %v36_v33 = vld [vmem:[%s440_s0 + $0xb0] sm:$0xff] }
  0x3d   :  { %192 = vst [vmem:[%s443_s3 + $0x70] sm:$0xff] %v167_v30  ;;  %v67_v43 = vmul.f32 %v235_v1, %v35_v32  ;;  %v68_v44 = vmul.f32 %v235_v1, %v36_v33 }
  0x3f   :  { %v99_v49 = vadd.f32 %v240_v2, %v67_v43  ;;  %v100_v50 = vadd.f32 %v240_v2, %v68_v44 }
  0x41   :  { %vm124_vm5 = vcmp.ge.f32.partialorder %v99_v49, 0.0  ;;  %v149_v55 = vmul.f32 0.2, %v99_v49  ;;  %vm125_vm6 = vcmp.ge.f32.partialorder %v100_v50, 0.0  ;;  %v150_v56 = vmul.f32 0.2, %v100_v50 }
  0x43   :  { %v174_v59 = vsel %vm124_vm5, %v99_v49, %v149_v55 }
  0x44   :  { %v37_v40 = vld [vmem:[%s440_s0 + $0xb8] sm:$0xff] }
  0x45   :  { %193 = vst [vmem:[%s443_s3 + $0x78] sm:$0xff] %v168_v36  ;;  %v69_v51 = vmul.f32 %v235_v1, %v37_v40 }
  0x47   :  { %v101_v57 = vadd.f32 %v240_v2, %v69_v51 }
  0x49   :  { %vm126_vm7 = vcmp.ge.f32.partialorder %v101_v57, 0.0  ;;  %v151_v60 = vmul.f32 0.2, %v101_v57 }
  0x4b   :  { %v176_v62 = vsel %vm126_vm7, %v101_v57, %v151_v60 }
  0x4c   :  { %v38_v45 = vld [vmem:[%s440_s0 + $0xc0] sm:$0xff] }
  0x4d   :  { %194 = vst [vmem:[%s443_s3 + $0x80] sm:$0xff] %v169_v41  ;;  %195 = vst [vmem:[%s443_s3 + $0x88] sm:$0xff] %v170_v42  ;;  %v70_v53 = vmul.f32 %v235_v1, %v38_v45  ;;  %v175_v1 = vsel %vm125_vm6, %v100_v50, %v150_v56 }
  0x4e   :  { %196 = vst [vmem:[%s443_s3 + $0x90] sm:$0xff] %v171_v46  ;;  %197 = vst [vmem:[%s443_s3 + $0x98] sm:$0xff] %v172_v52 }
  0x4f   :  { %198 = vst [vmem:[%s443_s3 + $0xa0] sm:$0xff] %v173_v54  ;;  %v102_v58 = vadd.f32 %v240_v2, %v70_v53  ;;  %199 = vst [vmem:[%s443_s3 + $0xa8] sm:$0xff] %v174_v59 }
  0x50   :  { %200 = vst [vmem:[%s443_s3 + $0xb0] sm:$0xff] %v175_v1  ;;  %201 = vst [vmem:[%s443_s3 + $0xb8] sm:$0xff] %v176_v62 }
  0x51   :  { %vm127_vm8 = vcmp.ge.f32.partialorder %v102_v58, 0.0  ;;  %v152_v61 = vmul.f32 0.2, %v102_v58 }
  0x53   :  { %v177_v2 = vsel %vm127_vm8, %v102_v58, %v152_v61 }
  0x54   :  { %202 = vst [vmem:[%s443_s3 + $0xc0] sm:$0xff] %v177_v2 }

// kernel: discriminador_condicional_forward.12
= control target key start
LH: loop header
LB: loop body
LE: loop exit
PB: predicated region body
PF: predicated region fallthrough
CT: control target
= control target key end

     0   :  { %s112_s0 = inlined_call_operand.vmem [shape: f32[32,128], index: 0, kind: input, shape index: {}, may-alias: {0,3}]   ;;  %s113_s1 = inlined_call_operand.vmem [shape: f32[1,128], index: 1, kind: input, shape index: {}]   ;;  %s114_s2 = inlined_call_operand.vmem [shape: f32[1,128], index: 2, kind: input, shape index: {}]   ;;  %s115_s3 = inlined_call_operand.vmem [shape: f32[32,128], index: 3, kind: output, shape index: {}, may-alias: {0,3}]  }
   0x1   :  { %v14_v0 = vld [vmem:[%s112_s0] sm:$0xff]  ;;  %v15_v4 = vld [vmem:[%s112_s0 + $0x8] sm:$0xff]  ;;  %v16_v5 = vld [vmem:[%s112_s0 + $0x10] sm:$0xff] }
   0x2   :  { %v60_v1 = vld [vmem:[%s113_s1] ss:$0 sm:$0xff]  ;;  %v17_v6 = vld [vmem:[%s112_s0 + $0x18] sm:$0xff] }
   0x3   :  { %v61_v2 = vld [vmem:[%s114_s2] ss:$0 sm:$0xff]  ;;  %v25_v3 = vmul.f32 %v60_v1, %v14_v0  ;;  %v26_v7 = vmul.f32 %v60_v1, %v15_v4  ;;  %v27_v8 = vmul.f32 %v60_v1, %v16_v5  ;;  %v28_v9 = vmul.f32 %v60_v1, %v17_v6 }
   0x5   :  { %v36_v10 = vadd.f32 %v61_v2, %v25_v3  ;;  %v37_v11 = vadd.f32 %v61_v2, %v26_v7  ;;  %v38_v12 = vadd.f32 %v61_v2, %v27_v8  ;;  %v39_v13 = vadd.f32 %v61_v2, %v28_v9 }
   0x7   :  { %vm40_vm0 = vcmp.ge.f32.partialorder %v36_v10, 0.0  ;;  %v44_v14 = vmul.f32 0.2, %v36_v10  ;;  %vm41_vm1 = vcmp.ge.f32.partialorder %v37_v11, 0.0  ;;  %v45_v15 = vmul.f32 0.2, %v37_v11 }
   0x8   :  { %vm42_vm2 = vcmp.ge.f32.partialorder %v38_v12, 0.0  ;;  %v46_v16 = vmul.f32 0.2, %v38_v12  ;;  %vm43_vm3 = vcmp.ge.f32.partialorder %v39_v13, 0.0  ;;  %v47_v18 = vmul.f32 0.2, %v39_v13 }
   0x9   :  { %v48_v17 = vsel %vm40_vm0, %v36_v10, %v44_v14  ;;  %v49_v19 = vsel %vm41_vm1, %v37_v11, %v45_v15 }
   0xa   :  { %52 = vst [vmem:[%s115_s3] sm:$0xff] %v48_v17  ;;  %v50_v20 = vsel %vm42_vm2, %v38_v12, %v46_v16  ;;  %53 = vst [vmem:[%s115_s3 + $0x8] sm:$0xff] %v49_v19  ;;  %v51_v21 = vsel %vm43_vm3, %v39_v13, %v47_v18 }
   0xb   :  { %54 = vst [vmem:[%s115_s3 + $0x10] sm:$0xff] %v50_v20  ;;  %55 = vst [vmem:[%s115_s3 + $0x18] sm:$0xff] %v51_v21 }

// kernel: discriminador_condicional_forward.11
= control target key start
LH: loop header
LB: loop body
LE: loop exit
PB: predicated region body
PF: predicated region fallthrough
CT: control target
= control target key end

     0   :  { %vm251_vm0 = vcmask 1040384   ;;  %s452_s1 = inlined_call_operand.vmem [shape: bf16[256,128], index: 1, kind: input, shape index: {}]   ;;  %s453_s0 = inlined_call_operand.vmem [shape: bf16[32,256], index: 0, kind: input, shape index: {}]   ;;  %s454_s2 = inlined_call_operand.vmem [shape: f32[1,128], index: 2, kind: input, shape index: {}]   ;;  %s455_s3 = inlined_call_operand.vmem [shape: f32[32,128], index: 3, kind: output, shape index: {0}]   ;;  %s456_s4 = inlined_call_operand.vmem [shape: f32[1,2,128], index: 4, kind: output, shape index: {1}]  }
   0x1   :  { %v327_v0 = vld [vmem:[%s452_s1 + $0x40] sm:$0xff]   ;;  %v329_v2 = vld [vmem:[%s452_s1 + $0x48] sm:$0xff]   ;;  %v331_v4 = vld [vmem:[%s452_s1 + $0x50] sm:$0xff]  }
   0x2   :  { %v328_v1 = vld [vmem:[%s452_s1] sm:$0xff]   ;;  %283 = vmatprep.subr.bf16.mxu0 %v327_v0  ;;  %311 = vmatprep.subr.bf16.mxu1 %v327_v0  ;;  %v330_v3 = vld [vmem:[%s452_s1 + $0x8] sm:$0xff]   ;;  %v332_v5 = vld [vmem:[%s452_s1 + $0x10] sm:$0xff]  }
   0x3   :  { %284 = vmatpush3.bf16.msra.mxu0 %v328_v1  ;;  %319 = vmatpush3.bf16.msra.mxu1 %v328_v1  ;;  %v333_v6 = vld [vmem:[%s452_s1 + $0x58] sm:$0xff]   ;;  %v335_v8 = vld [vmem:[%s452_s1 + $0x60] sm:$0xff]   ;;  %v337_v10 = vld [vmem:[%s452_s1 + $0x68] sm:$0xff]  }
   0x4   :  { %285 = vmatprep.subr.bf16.mxu0 %v329_v2  ;;  %312 = vmatprep.subr.bf16.mxu1 %v329_v2  ;;  %v334_v7 = vld [vmem:[%s452_s1 + $0x18] sm:$0xff]   ;;  %v336_v9 = vld [vmem:[%s452_s1 + $0x20] sm:$0xff]   ;;  %v338_v13 = vld [vmem:[%s452_s1 + $0x28] sm:$0xff]  }
   0x5   :  { %v345_v11 = vld [vmem:[%s453_s0 + $0x4] ss:$8 sps:$4 sm:$0xff]   ;;  %v348_v12 = vld [vmem:[%s453_s0 + $0x14] ss:$8 sps:$4 sm:$0xff]   ;;  %v343_v18 = vld [vmem:[%s453_s0] ss:$8 sps:$4 sm:$0xff]  }
   0x6   :  { %v339_v14 = vld [vmem:[%s452_s1 + $0x70] sm:$0xff]   ;;  %208 = vmatprep.mubr.bf16.mxu0 %v345_v11  ;;  %216 = vmatprep.mubr.bf16.mxu1 %v348_v12  ;;  %v341_v16 = vld [vmem:[%s452_s1 + $0x78] sm:$0xff]   ;;  %v262_v22 = vld [vmem:[%s454_s2] ss:$0 sm:$0xff] }
   0x7   :  { %286 = vmatpush3.bf16.msra.mxu0 %v330_v3  ;;  %320 = vmatpush3.bf16.msra.mxu1 %v330_v3  ;;  %v340_v15 = vld [vmem:[%s452_s1 + $0x30] sm:$0xff]   ;;  %v342_v17 = vld [vmem:[%s452_s1 + $0x38] sm:$0xff]  }
   0x8   :  { %287 = vmatprep.subr.bf16.mxu0 %v331_v4  ;;  %313 = vmatprep.subr.bf16.mxu1 %v331_v4  ;;  %v346_v19 = vld [vmem:[%s453_s0 + $0x10] ss:$8 sps:$4 sm:$0xff]  }
   0xb   :  { %288 = vmatpush3.bf16.msra.mxu0 %v332_v5  ;;  %321 = vmatpush3.bf16.msra.mxu1 %v332_v5 }
   0xc   :  { %289 = vmatprep.subr.bf16.mxu0 %v333_v6  ;;  %314 = vmatprep.subr.bf16.mxu1 %v333_v6 }
   0xf   :  { %290 = vmatpush3.bf16.msra.mxu0 %v334_v7  ;;  %322 = vmatpush3.bf16.msra.mxu1 %v334_v7 }
  0x10   :  { %291 = vmatprep.subr.bf16.mxu0 %v335_v8  ;;  %315 = vmatprep.subr.bf16.mxu1 %v335_v8 }
  0x13   :  { %292 = vmatpush3.bf16.msra.mxu0 %v336_v9  ;;  %323 = vmatpush3.bf16.msra.mxu1 %v336_v9 }
  0x14   :  { %293 = vmatprep.subr.bf16.mxu0 %v337_v10  ;;  %316 = vmatprep.subr.bf16.mxu1 %v337_v10 }
  0x17   :  { %294 = vmatpush3.bf16.msra.mxu0 %v338_v13  ;;  %324 = vmatpush3.bf16.msra.mxu1 %v338_v13 }
  0x18   :  { %295 = vmatprep.subr.bf16.mxu0 %v339_v14  ;;  %317 = vmatprep.subr.bf16.mxu1 %v339_v14 }
  0x1b   :  { %296 = vmatpush3.bf16.msra.mxu0 %v340_v15  ;;  %325 = vmatpush3.bf16.msra.mxu1 %v340_v15 }
  0x1c   :  { %297 = vmatprep.subr.bf16.mxu0 %v341_v16  ;;  %318 = vmatprep.subr.bf16.mxu1 %v341_v16 }
  0x1f   :  { %298 = vmatpush3.bf16.msra.mxu0 %v342_v17  ;;  %326 = vmatpush3.bf16.msra.mxu1 %v342_v17 }
  0x22   :  { %209 = vmatmul.mubr.bf16.vlgmr.msra.gmra.mrb[0].mxu0 %v343_v18  ;;  %217 = vmatmul.mubr.bf16.vlgmr.msra.gmra.mrb[0].mxu1 %v346_v19 }
  0xf5   :  { %v299_v20 = vpop.f32.mrb[0].mxu0  ;;  %v305_v21 = vpop.f32.mrb[0].mxu1 }
  0xf6   :  { %v300_v23 = vpop.f32.mrb[1].mxu0  ;;  %v306_v24 = vpop.f32.mrb[1].mxu1 }
  0xf7   :  { %v301_v25 = vadd.f32 %v300_v23, %v299_v20  ;;  %v302_v26 = vpop.f32.mrb[2].mxu0  ;;  %v307_v27 = vadd.f32 %v306_v24, %v305_v21  ;;  %v308_v28 = vpop.f32.mrb[2].mxu1 }
  0xf8   :  { %v303_v29 = vpop.f32.mrb[3].mxu0  ;;  %v309_v30 = vpop.f32.mrb[3].mxu1 }
  0xf9   :  { %v211_v31 = vadd.f32 %v301_v25, %v262_v22  ;;  %v219_v32 = vadd.f32 %v307_v27, %v262_v22  ;;  %v304_v33 = vadd.f32 %v303_v29, %v302_v26  ;;  %v310_v34 = vadd.f32 %v309_v30, %v308_v28 }
  0xfb   :  { %225 = vst [vmem:[%s455_s3] sm:$0xff] %v211_v31  ;;  %227 = vst [vmem:[%s455_s3 + $0x10] sm:$0xff] %v219_v32  ;;  %v214_v35 = vadd.f32 %v304_v33, %v262_v22  ;;  %v222_v36 = vadd.f32 %v310_v34, %v262_v22  ;;  %v238_v37 = vmul.f32 %v211_v31, %v211_v31 }
  0xfc   :  { %v240_v38 = vmul.f32 %v219_v32, %v219_v32 }
  0xfd   :  { %226 = vst [vmem:[%s455_s3 + $0x8] sm:$0xff] %v214_v35  ;;  %v229_v39 = vadd.f32 %v214_v35, %v211_v31  ;;  %v239_v40 = vmul.f32 %v214_v35, %v214_v35  ;;  %228 = vst [vmem:[%s455_s3 + $0x18] sm:$0xff] %v222_v36  ;;  %v241_v44 = vmul.f32 %v222_v36, %v222_v36 }
  0xff   :  { %v242_v41 = vadd.f32 %v239_v40, %v238_v37  ;;  %v230_v42 = vadd.f32 %v229_v39, %v219_v32 }
 0x101   :  { %v231_v43 = vadd.f32 %v230_v42, %v222_v36  ;;  %v243_v45 = vadd.f32 %v242_v41, %v240_v38 }
 0x103   :  { %v232_v46 = vrot.slane %v231_v43, 4  ;;  %v244_v47 = vadd.f32 %v243_v45, %v241_v44 }
 0x105   :  { %v233_v48 = vadd.f32 %v232_v46, %v231_v43  ;;  %v245_v49 = vrot.slane %v244_v47, 4 }
 0x107   :  { %v234_v50 = vrot.slane %v233_v48, 2  ;;  %v246_v51 = vadd.f32 %v245_v49, %v244_v47 }
 0x109   :  { %v235_v52 = vadd.f32 %v234_v50, %v233_v48  ;;  %v247_v53 = vrot.slane %v246_v51, 2 }
 0x10b   :  { %v236_v54 = vrot.slane %v235_v52, 1  ;;  %v248_v55 = vadd.f32 %v247_v53, %v246_v51 }
 0x10d   :  { %v249_v56 = vrot.slane %v248_v55, 1  ;;  %v237_v57 = vadd.f32 %v236_v54, %v235_v52 }
 0x10f   :  { %v250_v58 = vadd.f32 %v249_v56, %v248_v55 }
 0x111   :  { %v252_v59 = vsel %vm251_vm0, %v237_v57, %v250_v58 }
 0x112   :  { %253 = vst [vmem:[%s456_s4] sm:$0x3] %v252_v59 }

// kernel: discriminador_condicional_forward.13
= control target key start
LH: loop header
LB: loop body
LE: loop exit
PB: predicated region body
PF: predicated region fallthrough
CT: control target
= control target key end

     0   :  { %s624_s1 = inlined_call_operand.vmem [shape: bf16[512,128], index: 1, kind: input, shape index: {}]   ;;  %s625_s0 = inlined_call_operand.vmem [shape: bf16[8,512], index: 0, kind: input, shape index: {}]   ;;  %s626_s2 = inlined_call_operand.vmem [shape: f32[1,128], index: 2, kind: input, shape index: {}]   ;;  %s627_s3 = inlined_call_operand.vmem [shape: f32[8,128], index: 3, kind: output, shape index: {}]  }
   0x1   :  { %v460_v0 = vld [vmem:[%s624_s1 + $0x40] sm:$0xff]   ;;  %v464_v4 = vld [vmem:[%s624_s1 + $0x48] sm:$0xff]   ;;  %v468_v8 = vld [vmem:[%s624_s1 + $0x50] sm:$0xff]  }
   0x2   :  { %v461_v1 = vld [vmem:[%s624_s1 + $0xc0] sm:$0xff]   ;;  %416 = vmatprep.subr.bf16.mxu0 %v460_v0  ;;  %v465_v5 = vld [vmem:[%s624_s1 + $0xc8] sm:$0xff]   ;;  %v469_v9 = vld [vmem:[%s624_s1 + $0xd0] sm:$0xff]  }
   0x3   :  { %v462_v2 = vld [vmem:[%s624_s1] sm:$0xff]   ;;  %438 = vmatprep.subr.bf16.mxu1 %v461_v1  ;;  %v466_v6 = vld [vmem:[%s624_s1 + $0x8] sm:$0xff]   ;;  %v470_v10 = vld [vmem:[%s624_s1 + $0x10] sm:$0xff]  }
   0x4   :  { %v463_v3 = vld [vmem:[%s624_s1 + $0x80] sm:$0xff]   ;;  %417 = vmatpush3.bf16.msra.mxu0 %v462_v2  ;;  %v467_v7 = vld [vmem:[%s624_s1 + $0x88] sm:$0xff]   ;;  %v471_v11 = vld [vmem:[%s624_s1 + $0x90] sm:$0xff]  }
   0x5   :  { %439 = vmatpush3.bf16.msra.mxu1 %v463_v3  ;;  %418 = vmatprep.subr.bf16.mxu0 %v464_v4  ;;  %v472_v12 = vld [vmem:[%s624_s1 + $0x58] sm:$0xff]   ;;  %v476_v16 = vld [vmem:[%s624_s1 + $0x60] sm:$0xff]   ;;  %v480_v20 = vld [vmem:[%s624_s1 + $0x68] sm:$0xff]  }
   0x6   :  { %440 = vmatprep.subr.bf16.mxu1 %v465_v5  ;;  %v473_v13 = vld [vmem:[%s624_s1 + $0xd8] sm:$0xff]   ;;  %v477_v17 = vld [vmem:[%s624_s1 + $0xe0] sm:$0xff]   ;;  %v481_v21 = vld [vmem:[%s624_s1 + $0xe8] sm:$0xff]  }
   0x7   :  { %v474_v14 = vld [vmem:[%s624_s1 + $0x18] sm:$0xff]   ;;  %v478_v18 = vld [vmem:[%s624_s1 + $0x20] sm:$0xff]   ;;  %v482_v22 = vld [vmem:[%s624_s1 + $0x28] sm:$0xff]  }
   0x8   :  { %419 = vmatpush3.bf16.msra.mxu0 %v466_v6  ;;  %v475_v15 = vld [vmem:[%s624_s1 + $0x98] sm:$0xff]   ;;  %v479_v19 = vld [vmem:[%s624_s1 + $0xa0] sm:$0xff]   ;;  %v483_v23 = vld [vmem:[%s624_s1 + $0xa8] sm:$0xff]  }
   0x9   :  { %441 = vmatpush3.bf16.msra.mxu1 %v467_v7  ;;  %420 = vmatprep.subr.bf16.mxu0 %v468_v8  ;;  %v484_v24 = vld [vmem:[%s624_s1 + $0x70] sm:$0xff]   ;;  %v488_v28 = vld [vmem:[%s624_s1 + $0x78] sm:$0xff]   ;;  %v15_v32 = vld [vmem:[%s625_s0] sm:$0xff] }
   0xa   :  { %442 = vmatprep.subr.bf16.mxu1 %v469_v9  ;;  %v485_v25 = vld [vmem:[%s624_s1 + $0xf0] sm:$0xff]   ;;  %v489_v29 = vld [vmem:[%s624_s1 + $0xf8] sm:$0xff]   ;;  %v16_v33 = vld [vmem:[%s625_s0 + $0x8] sm:$0xff]  ;;  %v380_v34 = vcombine.low %v15_v32, %v15_v32  ;;  %v381_v35 = vcombine.high %v15_v32, %v15_v32 }
   0xb   :  { %v486_v26 = vld [vmem:[%s624_s1 + $0x30] sm:$0xff]   ;;  %v490_v30 = vld [vmem:[%s624_s1 + $0x38] sm:$0xff]   ;;  %v382_v36 = vcombine.low %v16_v33, %v16_v33  ;;  %v383_v37 = vcombine.high %v16_v33, %v16_v33  ;;  %v379_v40 = vld [vmem:[%s626_s2] ss:$0 sm:$0xff] }
   0xc   :  { %421 = vmatpush3.bf16.msra.mxu0 %v470_v10  ;;  %v487_v27 = vld [vmem:[%s624_s1 + $0xb0] sm:$0xff]   ;;  %v491_v31 = vld [vmem:[%s624_s1 + $0xb8] sm:$0xff]   ;;  %326 = vmatprep.mubr.bf16.mxu0 %v381_v35 }
   0xd   :  { %443 = vmatpush3.bf16.msra.mxu1 %v471_v11  ;;  %422 = vmatprep.subr.bf16.mxu0 %v472_v12 }
   0xe   :  { %444 = vmatprep.subr.bf16.mxu1 %v473_v13  ;;  %366 = vmatprep.mubr.bf16.mxu1 %v383_v37 }
  0x10   :  { %423 = vmatpush3.bf16.msra.mxu0 %v474_v14 }
  0x11   :  { %445 = vmatpush3.bf16.msra.mxu1 %v475_v15  ;;  %424 = vmatprep.subr.bf16.mxu0 %v476_v16 }
  0x12   :  { %446 = vmatprep.subr.bf16.mxu1 %v477_v17 }
  0x14   :  { %425 = vmatpush3.bf16.msra.mxu0 %v478_v18 }
  0x15   :  { %447 = vmatpush3.bf16.msra.mxu1 %v479_v19  ;;  %426 = vmatprep.subr.bf16.mxu0 %v480_v20 }
  0x16   :  { %448 = vmatprep.subr.bf16.mxu1 %v481_v21 }
  0x18   :  { %427 = vmatpush3.bf16.msra.mxu0 %v482_v22 }
  0x19   :  { %449 = vmatpush3.bf16.msra.mxu1 %v483_v23  ;;  %428 = vmatprep.subr.bf16.mxu0 %v484_v24 }
  0x1a   :  { %450 = vmatprep.subr.bf16.mxu1 %v485_v25 }
  0x1c   :  { %429 = vmatpush3.bf16.msra.mxu0 %v486_v26 }
  0x1d   :  { %451 = vmatpush3.bf16.msra.mxu1 %v487_v27  ;;  %430 = vmatprep.subr.bf16.mxu0 %v488_v28 }
  0x1e   :  { %452 = vmatprep.subr.bf16.mxu1 %v489_v29 }
  0x20   :  { %431 = vmatpush3.bf16.msra.mxu0 %v490_v30 }
  0x21   :  { %453 = vmatpush3.bf16.msra.mxu1 %v491_v31 }
  0x23   :  { %327 = vmatmul.mubr.bf16.vlgmr.msra.gmra.mrb[0].mxu0 %v380_v34 }
  0x24   :  { %367 = vmatmul.mubr.bf16.vlgmr.msra.gmra.mrb[0].mxu1 %v382_v36 }
  0xf6   :  { %v432_v38 = vpop.f32.mrb[0].mxu0 }
  0xf7   :  { %v454_v39 = vpop.f32.mrb[0].mxu1  ;;  %v433_v41 = vpop.f32.mrb[1].mxu0 }
  0xf8   :  { %v455_v42 = vpop.f32.mrb[1].mxu1  ;;  %v434_v43 = vadd.f32 %v433_v41, %v432_v38  ;;  %v435_v45 = vpop.f32.mrb[2].mxu0 }
  0xf9   :  { %v456_v44 = vadd.f32 %v455_v42, %v454_v39  ;;  %v457_v46 = vpop.f32.mrb[2].mxu1  ;;  %v436_v47 = vpop.f32.mrb[3].mxu0 }
  0xfa   :  { %v458_v48 = vpop.f32.mrb[3].mxu1  ;;  %v329_v49 = vadd.f32 %v434_v43, %v379_v40 }
  0xfc   :  { %v369_v50 = vadd.f32 %v456_v44, %v329_v49 }
  0xfe   :  { %374 = vst [vmem:[%s627_s3] sm:$0xff] %v369_v50 }

</bundles_post_ra>
